<compile_context>
chip_gen: v7x
topology: tpu7x:2x2x1
jax: 0.10.0
libtpu: 0.0.40
codegen_flags: <defaults>
</compile_context>

<pallas_src>
import math
import jax
import jax.numpy as jnp
from jax import lax
from jax.experimental import pallas as pl
from jax.experimental.pallas import tpu as pltpu

D_MODEL = 32
N_HEADS = 4
D_K = D_MODEL // N_HEADS
D_FF = 64
N_LAYERS = 2
VOCAB = 50
EPS = 1e-6
INV_SQRT_DK = 1.0 / math.sqrt(D_K)
HD = N_HEADS * D_MODEL          # 128: width of the Wo-folded V' projection per layer


# ----------------------------- fused Pallas kernel ------------------------------

def _layernorm(x, g, b):
    # Annotated-transformer LayerNorm: g * (x - mean) / (std + eps) + b,
    # with torch's default *unbiased* std (ddof=1).  Divide via EUP reciprocal.
    mean = jnp.mean(x, axis=-1, keepdims=True)
    d = x - mean
    var = jnp.sum(d * d, axis=-1, keepdims=True) * (1.0 / (D_MODEL - 1))
    inv = pl.reciprocal(jnp.sqrt(var) + EPS, approx=False)
    return g * (d * inv) + b


def _mha(q, k, vfold, bias, bo, residual):
    """Multi-head attention on [rows, D] activations.

    q:      [Mq, D]   (softmax scale already folded into the Q projection)
    k:      [Mk, D]
    vfold:  [Mk, H*D] (Wo folded into the V projection per head)
    bias:   [Mq, Mk]  additive mask (0 keep, -1e9 masked)
    Heads are contiguous lane slices, so no transposes/reshapes are needed; the output
    projection + residual are folded into the per-head accumulation.
    NOTE: a fully-masked query row degenerates to a uniform softmax (same as the PyTorch
    reference); such rows do not occur for causal/padding masks.
    """
    acc = residual + bo
    for h in range(N_HEADS):
        lo, hi = h * D_K, (h + 1) * D_K
        # scores = q_h @ k_h^T  (NT matmul via dot_general, no explicit transpose)
        s = lax.dot_general(q[:, lo:hi], k[:, lo:hi], (((1,), (1,)), ((), ())),
                            preferred_element_type=jnp.float32)
        s = s + bias
        s = s - jnp.max(s, axis=-1, keepdims=True)
        p = jnp.exp(s)
        p = p * pl.reciprocal(jnp.sum(p, axis=-1, keepdims=True), approx=False)
        acc = acc + jnp.dot(p, vfold[:, h * D_MODEL:(h + 1) * D_MODEL],
                            preferred_element_type=jnp.float32)
    return acc


def _decoder_kernel(x_ref, mem_ref, sbias_ref, cbias_ref,
                    ln_g_ref, ln_b_ref,
                    wqkv_s_ref, bqkv_s_ref, bo_s_ref,
                    wq_c_ref, bq_c_ref,
                    wk_c_ref, bk_c_ref, wvo_c_ref, bvo_c_ref, bo_c_ref,
                    w1_ref, b1_ref, w2_ref, b2_ref,
                    fg_ref, fb_ref,
                    o_ref):
    x = x_ref[...]        # [Ss, D]   (this grid step's batch element)
    mem = mem_ref[...]    # [Sc, D]
    sbias = sbias_ref[...]   # [Ss, Ss] additive
    cbias = cbias_ref[...]   # [Ss, Sc] additive

    # Cross-attention K and V' projections are layer-invariant -> hoist out of the
    # layer loop: mem is read once, both matmuls are lane-dense (N=64 / N=256).
    kc_all = jnp.dot(mem, wk_c_ref[...],
                     preferred_element_type=jnp.float32) + bk_c_ref[...]   # [Sc, L*D]
    vc_all = jnp.dot(mem, wvo_c_ref[...],
                     preferred_element_type=jnp.float32) + bvo_c_ref[...]  # [Sc, L*H*D]

    for l in range(N_LAYERS):  # static unroll; weights stay resident in VMEM
        g = ln_g_ref[l]        # [3, D]
        b = ln_b_ref[l]

        # sublayer 0: pre-norm self-attention (fused [D, 2D+H*D] QKV' projection)
        nx = _layernorm(x, g[0:1], b[0:1])
        qkv = jnp.dot(nx, wqkv_s_ref[l],
                      preferred_element_type=jnp.float32) + bqkv_s_ref[l]
        x = _mha(qkv[:, :D_MODEL], qkv[:, D_MODEL:2 * D_MODEL], qkv[:, 2 * D_MODEL:],
                 sbias, bo_s_ref[l], x)

        # sublayer 1: pre-norm cross-attention over hoisted memory K / V'
        nx = _layernorm(x, g[1:2], b[1:2])
        q = jnp.dot(nx, wq_c_ref[l],
                    preferred_element_type=jnp.float32) + bq_c_ref[l]
        x = _mha(q, kc_all[:, l * D_MODEL:(l + 1) * D_MODEL],
                 vc_all[:, l * HD:(l + 1) * HD], cbias, bo_c_ref[l], x)

        # sublayer 2: pre-norm position-wise feed-forward (residual folded)
        nx = _layernorm(x, g[2:3], b[2:3])
        h1 = jnp.maximum(
            jnp.dot(nx, w1_ref[l], preferred_element_type=jnp.float32) + b1_ref[l],
            0.0)
        x = x + jnp.dot(h1, w2_ref[l], preferred_element_type=jnp.float32) + b2_ref[l]

    o_ref[...] = _layernorm(x, fg_ref[...], fb_ref[...])


_WEIGHT_ORDER = ("ln_g", "ln_b", "wqkv_s", "bqkv_s", "bo_s", "wq_c", "bq_c",
                 "wk_c_all", "bk_c_all", "wvo_c_all", "bvo_c_all", "bo_c",
                 "w1", "b1", "w2", "b2", "final_g", "final_b")


def _whole_spec(arr):
    # Whole-array block with a constant index map: fetched once, resident across the grid.
    if arr.ndim == 2:
        return pl.BlockSpec(arr.shape, lambda b: (0, 0))
    assert arr.ndim == 3
    return pl.BlockSpec(arr.shape, lambda b: (0, 0, 0))


def decoder_forward(params, x, mem, sbias, cbias):
    """Single fused pallas_call; grid over batch marked 'parallel' (2 TCs on v7x)."""
    B, Ss, _ = x.shape
    Sc = mem.shape[1]
    weights = [params[k] for k in _WEIGHT_ORDER]
    in_specs = [
        pl.BlockSpec((None, Ss, D_MODEL), lambda b: (b, 0, 0)),   # x
        pl.BlockSpec((None, Sc, D_MODEL), lambda b: (b, 0, 0)),   # mem
        pl.BlockSpec((None, Ss, Ss), lambda b: (b, 0, 0)),        # self additive bias
        pl.BlockSpec((None, Ss, Sc), lambda b: (b, 0, 0)),        # cross additive bias
    ] + [_whole_spec(w) for w in weights]
    grid_spec = pltpu.PrefetchScalarGridSpec(
        num_scalar_prefetch=0,
        grid=(B,),
        in_specs=in_specs,
        out_specs=pl.BlockSpec((None, Ss, D_MODEL), lambda b: (b, 0, 0)),
    )
    return pl.pallas_call(
        _decoder_kernel,
        out_shape=jax.ShapeDtypeStruct((B, Ss, D_MODEL), jnp.float32),
        grid_spec=grid_spec,
        compiler_params=pltpu.CompilerParams(dimension_semantics=("parallel",)),
    )(x, mem, sbias, cbias, *weights)


# ----------------------------- model glue (jit-fused) ------------------------------

def make_pe(max_len, d_model):
    position = jnp.arange(max_len, dtype=jnp.float32)[:, None]
    div_term = jnp.exp(jnp.arange(0, d_model, 2, dtype=jnp.float32)
                       * (-math.log(10000.0) / d_model))
    pe = jnp.zeros((max_len, d_model), jnp.float32)
    pe = pe.at[:, 0::2].set(jnp.sin(position * div_term))
    pe = pe.at[:, 1::2].set(jnp.cos(position * div_term))
    return pe


def _embed(tokens, emb_table, pe):
    # nn.Embedding lookup * sqrt(d_model) + sinusoidal PE (dropout = eval / identity).
    e = jnp.take(emb_table, tokens, axis=0) * math.sqrt(D_MODEL)      # [B, S, D]
    return e + pe[: tokens.shape[1]][None, :, :]


@jax.jit
def twoway_forward(params, context, src, context_mask, src_mask):
    """decoder(embed(src), embed(context), context_mask, src_mask)"""
    B, Ss = src.shape
    _, Sc = context.shape
    x = _embed(src, params["emb"], params["pe"])                       # [B, Ss, D]
    m = _embed(context, params["emb"], params["pe"])                   # [B, Sc, D]
    # masks -> additive bias (0 = keep, -1e9 = masked), per batch element
    sbias = (jnp.broadcast_to(src_mask.astype(jnp.float32), (B, Ss, Ss)) - 1.0) * 1e9
    cbias = (jnp.broadcast_to(context_mask.astype(jnp.float32), (B, Ss, Sc)) - 1.0) * 1e9
    return decoder_forward(params, x, m, sbias, cbias)                 # [B, Ss, D]


# ----------------------------- parameter init ------------------------------

def _init_linear(key, din, dout):
    kw, kb = jax.random.split(key)
    w = jax.random.normal(kw, (din, dout), jnp.float32) * (1.0 / math.sqrt(din))
    b = jax.random.normal(kb, (dout,), jnp.float32) * 0.01
    return w, b


def _fold_v_wo(wv, bv, wo):
    # Wv'[:, h*D:(h+1)*D] = Wv[:, h*dk:(h+1)*dk] @ Wo[h*dk:(h+1)*dk, :]
    blocks_w, blocks_b = [], []
    for h in range(N_HEADS):
        lo, hi = h * D_K, (h + 1) * D_K
        blocks_w.append(wv[:, lo:hi] @ wo[lo:hi, :])   # [D, D]
        blocks_b.append(bv[lo:hi] @ wo[lo:hi, :])      # [D]
    return jnp.concatenate(blocks_w, axis=1), jnp.concatenate(blocks_b)


def init_params(key):
    keys = jax.random.split(key, 1 + N_LAYERS)
    names = ["ln_g", "ln_b", "wqkv_s", "bqkv_s", "bo_s",
             "wq_c", "bq_c", "bo_c", "w1", "b1", "w2", "b2"]
    stacks = {n: [] for n in names}
    wk_c_list, bk_c_list, wvo_c_list, bvo_c_list = [], [], [], []
    for i in range(N_LAYERS):
        lk = jax.random.split(keys[1 + i], 10)
        wq_s, bq_s = _init_linear(lk[0], D_MODEL, D_MODEL)
        wk_s, bk_s = _init_linear(lk[1], D_MODEL, D_MODEL)
        wv_s, bv_s = _init_linear(lk[2], D_MODEL, D_MODEL)
        wo_s, bo_s = _init_linear(lk[3], D_MODEL, D_MODEL)
        wq_c, bq_c = _init_linear(lk[4], D_MODEL, D_MODEL)
        wk_c, bk_c = _init_linear(lk[5], D_MODEL, D_MODEL)
        wv_c, bv_c = _init_linear(lk[6], D_MODEL, D_MODEL)
        wo_c, bo_c = _init_linear(lk[7], D_MODEL, D_MODEL)
        w1, b1 = _init_linear(lk[8], D_MODEL, D_FF)
        w2, b2 = _init_linear(lk[9], D_FF, D_MODEL)

        # --- one-time parameter fusion (done at init, never per forward call) ---
        wvf_s, bvf_s = _fold_v_wo(wv_s, bv_s, wo_s)   # Wo folded into self V
        wvf_c, bvf_c = _fold_v_wo(wv_c, bv_c, wo_c)   # Wo folded into cross V

        stacks["ln_g"].append(jnp.ones((3, D_MODEL), jnp.float32))
        stacks["ln_b"].append(jnp.zeros((3, D_MODEL), jnp.float32))
        # self-attn: [Q*scale | K | V'] fused -> [D, 2D + H*D]
        stacks["wqkv_s"].append(jnp.concatenate(
            [wq_s * INV_SQRT_DK, wk_s, wvf_s], axis=1))
        stacks["bqkv_s"].append(jnp.concatenate(
            [bq_s * INV_SQRT_DK, bk_s, bvf_s])[None, :])
        stacks["bo_s"].append(bo_s[None, :])
        # cross-attn Q (scale folded)
        stacks["wq_c"].append(wq_c * INV_SQRT_DK)
        stacks["bq_c"].append((bq_c * INV_SQRT_DK)[None, :])
        stacks["bo_c"].append(bo_c[None, :])
        stacks["w1"].append(w1)
        stacks["b1"].append(b1[None, :])
        stacks["w2"].append(w2)
        stacks["b2"].append(b2[None, :])
        # cross-attn K / V' collected across layers (hoisted projection over memory)
        wk_c_list.append(wk_c)
        bk_c_list.append(bk_c)
        wvo_c_list.append(wvf_c)
        bvo_c_list.append(bvf_c)

    params = {n: jnp.stack(v, axis=0) for n, v in stacks.items()}
    params["wk_c_all"] = jnp.concatenate(wk_c_list, axis=1)        # [D, L*D]
    params["bk_c_all"] = jnp.concatenate(bk_c_list)[None, :]       # [1, L*D]
    params["wvo_c_all"] = jnp.concatenate(wvo_c_list, axis=1)      # [D, L*H*D]
    params["bvo_c_all"] = jnp.concatenate(bvo_c_list)[None, :]     # [1, L*H*D]
    params["emb"] = jax.random.normal(keys[0], (VOCAB, D_MODEL), jnp.float32)
    params["pe"] = make_pe(64, D_MODEL)
    params["final_g"] = jnp.ones((1, D_MODEL), jnp.float32)
    params["final_b"] = jnp.zeros((1, D_MODEL), jnp.float32)
    return params
    # TODO(synk): the pretrained HuggingFace BERT `encoder` submodule has no in-script
    # equivalent; the encoder memory is produced by the shared embedding + PE, and the
    # `generator` head is never invoked in forward(), so both are omitted.


# ----------------------------- main ------------------------------

if __name__ == "__main__":
    key = jax.random.PRNGKey(0)
    pkey, ckey, skey = jax.random.split(key, 3)
    params = init_params(pkey)

    B, Ss, Sc = 2, 8, 8
    src = jax.random.randint(skey, (B, Ss), 0, VOCAB)
    context = jax.random.randint(ckey, (B, Sc), 0, VOCAB)

    # src_mask: causal (subsequent) mask for decoder self-attention, shape (B, Ss, Ss)
    src_mask = jnp.broadcast_to(
        jnp.tril(jnp.ones((Ss, Ss), jnp.float32))[None], (B, Ss, Ss))
    # context_mask: padding mask over the context, shape (B, 1, Sc) (batch 1 has 2 pads)
    ctx_valid = jnp.array([[1.0] * Sc, [1.0] * (Sc - 2) + [0.0, 0.0]], jnp.float32)
    context_mask = ctx_valid[:, None, :]

    out = twoway_forward(params, context, src, context_mask, src_mask)
    jax.block_until_ready(out)
    assert out.shape == (B, Ss, D_MODEL)
    assert bool(jnp.all(jnp.isfinite(out)))
    print("KERNEL_OK")
</pallas_src>

<mosaic_0001>
module attributes {stable_mosaic.version = 11 : i64} {
  func.func @_decoder_kernel(%arg0: i32, %arg1: memref<1x8x32xf32, #tpu.memory_space<vmem>>, %arg2: memref<1x8x32xf32, #tpu.memory_space<vmem>>, %arg3: memref<1x8x8xf32, #tpu.memory_space<vmem>>, %arg4: memref<1x8x8xf32, #tpu.memory_space<vmem>>, %arg5: memref<2x3x32xf32, #tpu.memory_space<vmem>>, %arg6: memref<2x3x32xf32, #tpu.memory_space<vmem>>, %arg7: memref<2x32x192xf32, #tpu.memory_space<vmem>>, %arg8: memref<2x1x192xf32, #tpu.memory_space<vmem>>, %arg9: memref<2x1x32xf32, #tpu.memory_space<vmem>>, %arg10: memref<2x32x32xf32, #tpu.memory_space<vmem>>, %arg11: memref<2x1x32xf32, #tpu.memory_space<vmem>>, %arg12: memref<32x64xf32, #tpu.memory_space<vmem>>, %arg13: memref<1x64xf32, #tpu.memory_space<vmem>>, %arg14: memref<32x256xf32, #tpu.memory_space<vmem>>, %arg15: memref<1x256xf32, #tpu.memory_space<vmem>>, %arg16: memref<2x1x32xf32, #tpu.memory_space<vmem>>, %arg17: memref<2x32x64xf32, #tpu.memory_space<vmem>>, %arg18: memref<2x1x64xf32, #tpu.memory_space<vmem>>, %arg19: memref<2x64x32xf32, #tpu.memory_space<vmem>>, %arg20: memref<2x1x32xf32, #tpu.memory_space<vmem>>, %arg21: memref<1x32xf32, #tpu.memory_space<vmem>>, %arg22: memref<1x32xf32, #tpu.memory_space<vmem>>, %arg23: memref<1x8x32xf32, #tpu.memory_space<vmem>>) attributes {dimension_semantics = [#tpu.dimension_semantics<parallel>], iteration_bounds = array<i64: 2>, scalar_prefetch = 0 : i64, scratch_operands = 0 : i64, tpu.core_type = #tpu.core_type<tc>, window_params = [{transform_indices = @transform_0, window_bounds = array<i64: 1, 8, 32>}, {transform_indices = @transform_1, window_bounds = array<i64: 1, 8, 32>}, {transform_indices = @transform_2, window_bounds = array<i64: 1, 8, 8>}, {transform_indices = @transform_3, window_bounds = array<i64: 1, 8, 8>}, {pipeline_mode = #tpu.pipeline_mode<synchronous>, transform_indices = @transform_4, window_bounds = array<i64: 2, 3, 32>}, {pipeline_mode = #tpu.pipeline_mode<synchronous>, transform_indices = @transform_5, window_bounds = array<i64: 2, 3, 32>}, {pipeline_mode = #tpu.pipeline_mode<synchronous>, transform_indices = @transform_6, window_bounds = array<i64: 2, 32, 192>}, {pipeline_mode = #tpu.pipeline_mode<synchronous>, transform_indices = @transform_7, window_bounds = array<i64: 2, 1, 192>}, {pipeline_mode = #tpu.pipeline_mode<synchronous>, transform_indices = @transform_8, window_bounds = array<i64: 2, 1, 32>}, {pipeline_mode = #tpu.pipeline_mode<synchronous>, transform_indices = @transform_9, window_bounds = array<i64: 2, 32, 32>}, {pipeline_mode = #tpu.pipeline_mode<synchronous>, transform_indices = @transform_10, window_bounds = array<i64: 2, 1, 32>}, {pipeline_mode = #tpu.pipeline_mode<synchronous>, transform_indices = @transform_11, window_bounds = array<i64: 32, 64>}, {pipeline_mode = #tpu.pipeline_mode<synchronous>, transform_indices = @transform_12, window_bounds = array<i64: 1, 64>}, {pipeline_mode = #tpu.pipeline_mode<synchronous>, transform_indices = @transform_13, window_bounds = array<i64: 32, 256>}, {pipeline_mode = #tpu.pipeline_mode<synchronous>, transform_indices = @transform_14, window_bounds = array<i64: 1, 256>}, {pipeline_mode = #tpu.pipeline_mode<synchronous>, transform_indices = @transform_15, window_bounds = array<i64: 2, 1, 32>}, {pipeline_mode = #tpu.pipeline_mode<synchronous>, transform_indices = @transform_16, window_bounds = array<i64: 2, 32, 64>}, {pipeline_mode = #tpu.pipeline_mode<synchronous>, transform_indices = @transform_17, window_bounds = array<i64: 2, 1, 64>}, {pipeline_mode = #tpu.pipeline_mode<synchronous>, transform_indices = @transform_18, window_bounds = array<i64: 2, 64, 32>}, {pipeline_mode = #tpu.pipeline_mode<synchronous>, transform_indices = @transform_19, window_bounds = array<i64: 2, 1, 32>}, {pipeline_mode = #tpu.pipeline_mode<synchronous>, transform_indices = @transform_20, window_bounds = array<i64: 1, 32>}, {pipeline_mode = #tpu.pipeline_mode<synchronous>, transform_indices = @transform_21, window_bounds = array<i64: 1, 32>}, {transform_indices = @transform_22, window_bounds = array<i64: 1, 8, 32>}]} {
    %c0 = arith.constant 0 : index
    %c0_0 = arith.constant 0 : index
    %c0_1 = arith.constant 0 : index
    %0 = vector.load %arg1[%c0, %c0_0, %c0_1] : memref<1x8x32xf32, #tpu.memory_space<vmem>>, vector<1x8x32xf32>
    %1 = vector.shape_cast %0 : vector<1x8x32xf32> to vector<8x32xf32>
    %c0_2 = arith.constant 0 : index
    %c0_3 = arith.constant 0 : index
    %c0_4 = arith.constant 0 : index
    %2 = vector.load %arg2[%c0_2, %c0_3, %c0_4] : memref<1x8x32xf32, #tpu.memory_space<vmem>>, vector<1x8x32xf32>
    %3 = vector.shape_cast %2 : vector<1x8x32xf32> to vector<8x32xf32>
    %c0_5 = arith.constant 0 : index
    %c0_6 = arith.constant 0 : index
    %c0_7 = arith.constant 0 : index
    %4 = vector.load %arg3[%c0_5, %c0_6, %c0_7] : memref<1x8x8xf32, #tpu.memory_space<vmem>>, vector<1x8x8xf32>
    %5 = vector.shape_cast %4 : vector<1x8x8xf32> to vector<8x8xf32>
    %c0_8 = arith.constant 0 : index
    %c0_9 = arith.constant 0 : index
    %c0_10 = arith.constant 0 : index
    %6 = vector.load %arg4[%c0_8, %c0_9, %c0_10] : memref<1x8x8xf32, #tpu.memory_space<vmem>>, vector<1x8x8xf32>
    %7 = vector.shape_cast %6 : vector<1x8x8xf32> to vector<8x8xf32>
    %c0_11 = arith.constant 0 : index
    %c0_12 = arith.constant 0 : index
    %8 = vector.load %arg12[%c0_11, %c0_12] : memref<32x64xf32, #tpu.memory_space<vmem>>, vector<32x64xf32>
    %cst = arith.constant dense<0.000000e+00> : vector<8x64xf32>
    %9 = tpu.matmul %3, %8, %cst {dimension_numbers = #tpu.dot_dimension_numbers<[1], [0], [0], [1], [0, 0, 1, 1], [], []>} : vector<8x32xf32>, vector<32x64xf32>, vector<8x64xf32> -> vector<8x64xf32>
    %c0_13 = arith.constant 0 : index
    %c0_14 = arith.constant 0 : index
    %10 = vector.load %arg13[%c0_13, %c0_14] : memref<1x64xf32, #tpu.memory_space<vmem>>, vector<1x64xf32>
    %11 = vector.broadcast %10 : vector<1x64xf32> to vector<8x64xf32>
    %12 = arith.addf %9, %11 : vector<8x64xf32>
    %c0_15 = arith.constant 0 : index
    %c0_16 = arith.constant 0 : index
    %13 = vector.load %arg14[%c0_15, %c0_16] : memref<32x256xf32, #tpu.memory_space<vmem>>, vector<32x256xf32>
    %cst_17 = arith.constant dense<0.000000e+00> : vector<8x256xf32>
    %14 = tpu.matmul %3, %13, %cst_17 {dimension_numbers = #tpu.dot_dimension_numbers<[1], [0], [0], [1], [0, 0, 1, 1], [], []>} : vector<8x32xf32>, vector<32x256xf32>, vector<8x256xf32> -> vector<8x256xf32>
    %c0_18 = arith.constant 0 : index
    %c0_19 = arith.constant 0 : index
    %15 = vector.load %arg15[%c0_18, %c0_19] : memref<1x256xf32, #tpu.memory_space<vmem>>, vector<1x256xf32>
    %16 = vector.broadcast %15 : vector<1x256xf32> to vector<8x256xf32>
    %17 = arith.addf %14, %16 : vector<8x256xf32>
    %c0_20 = arith.constant 0 : index
    %c0_21 = arith.constant 0 : index
    %c0_22 = arith.constant 0 : index
    %18 = vector.load %arg5[%c0_20, %c0_21, %c0_22] : memref<2x3x32xf32, #tpu.memory_space<vmem>>, vector<1x3x32xf32>
    %19 = vector.shape_cast %18 : vector<1x3x32xf32> to vector<3x32xf32>
    %c0_23 = arith.constant 0 : index
    %c0_24 = arith.constant 0 : index
    %c0_25 = arith.constant 0 : index
    %20 = vector.load %arg6[%c0_23, %c0_24, %c0_25] : memref<2x3x32xf32, #tpu.memory_space<vmem>>, vector<1x3x32xf32>
    %21 = vector.shape_cast %20 : vector<1x3x32xf32> to vector<3x32xf32>
    %22 = vector.extract_strided_slice %19 {offsets = [0, 0], sizes = [1, 32], strides = [1, 1]} : vector<3x32xf32> to vector<1x32xf32>
    %23 = vector.extract_strided_slice %21 {offsets = [0, 0], sizes = [1, 32], strides = [1, 1]} : vector<3x32xf32> to vector<1x32xf32>
    %cst_26 = arith.constant dense<0.000000e+00> : vector<8xf32>
    %24 = vector.multi_reduction <add>, %1, %cst_26 [1] : vector<8x32xf32> to vector<8xf32>
    %25 = vector.shape_cast %24 : vector<8xf32> to vector<8x1xf32>
    %cst_27 = arith.constant 3.200000e+01 : f32
    %26 = vector.broadcast %cst_27 : f32 to vector<8x1xf32>
    %27 = arith.divf %25, %26 : vector<8x1xf32>
    %28 = vector.broadcast %27 : vector<8x1xf32> to vector<8x32xf32>
    %29 = arith.subf %1, %28 : vector<8x32xf32>
    %30 = arith.mulf %29, %29 : vector<8x32xf32>
    %cst_28 = arith.constant dense<0.000000e+00> : vector<8xf32>
    %31 = vector.multi_reduction <add>, %30, %cst_28 [1] : vector<8x32xf32> to vector<8xf32>
    %32 = vector.shape_cast %31 : vector<8xf32> to vector<8x1xf32>
    %cst_29 = arith.constant 0.0322580636 : f32
    %33 = vector.broadcast %cst_29 : f32 to vector<8x1xf32>
    %34 = arith.mulf %32, %33 : vector<8x1xf32>
    %35 = math.sqrt %34 : vector<8x1xf32>
    %cst_30 = arith.constant 9.99999997E-7 : f32
    %36 = vector.broadcast %cst_30 : f32 to vector<8x1xf32>
    %37 = arith.addf %35, %36 : vector<8x1xf32>
    %38 = tpu.reciprocal %37 : vector<8x1xf32> -> vector<8x1xf32>
    %39 = vector.broadcast %38 : vector<8x1xf32> to vector<8x32xf32>
    %40 = arith.mulf %29, %39 : vector<8x32xf32>
    %41 = vector.broadcast %22 : vector<1x32xf32> to vector<8x32xf32>
    %42 = arith.mulf %41, %40 : vector<8x32xf32>
    %43 = vector.broadcast %23 : vector<1x32xf32> to vector<8x32xf32>
    %44 = arith.addf %42, %43 : vector<8x32xf32>
    %c0_31 = arith.constant 0 : index
    %c0_32 = arith.constant 0 : index
    %c0_33 = arith.constant 0 : index
    %45 = vector.load %arg7[%c0_31, %c0_32, %c0_33] : memref<2x32x192xf32, #tpu.memory_space<vmem>>, vector<1x32x192xf32>
    %46 = vector.shape_cast %45 : vector<1x32x192xf32> to vector<32x192xf32>
    %cst_34 = arith.constant dense<0.000000e+00> : vector<8x192xf32>
    %47 = tpu.matmul %44, %46, %cst_34 {dimension_numbers = #tpu.dot_dimension_numbers<[1], [0], [0], [1], [0, 0, 1, 1], [], []>} : vector<8x32xf32>, vector<32x192xf32>, vector<8x192xf32> -> vector<8x192xf32>
    %c0_35 = arith.constant 0 : index
    %c0_36 = arith.constant 0 : index
    %c0_37 = arith.constant 0 : index
    %48 = vector.load %arg8[%c0_35, %c0_36, %c0_37] : memref<2x1x192xf32, #tpu.memory_space<vmem>>, vector<1x1x192xf32>
    %49 = vector.shape_cast %48 : vector<1x1x192xf32> to vector<1x192xf32>
    %50 = vector.broadcast %49 : vector<1x192xf32> to vector<8x192xf32>
    %51 = arith.addf %47, %50 : vector<8x192xf32>
    %52 = vector.extract_strided_slice %51 {offsets = [0, 0], sizes = [8, 32], strides = [1, 1]} : vector<8x192xf32> to vector<8x32xf32>
    %53 = vector.extract_strided_slice %51 {offsets = [0, 32], sizes = [8, 32], strides = [1, 1]} : vector<8x192xf32> to vector<8x32xf32>
    %54 = vector.extract_strided_slice %51 {offsets = [0, 64], sizes = [8, 128], strides = [1, 1]} : vector<8x192xf32> to vector<8x128xf32>
    %c0_38 = arith.constant 0 : index
    %c0_39 = arith.constant 0 : index
    %c0_40 = arith.constant 0 : index
    %55 = vector.load %arg9[%c0_38, %c0_39, %c0_40] : memref<2x1x32xf32, #tpu.memory_space<vmem>>, vector<1x1x32xf32>
    %56 = vector.shape_cast %55 : vector<1x1x32xf32> to vector<1x32xf32>
    %57 = vector.broadcast %56 : vector<1x32xf32> to vector<8x32xf32>
    %58 = arith.addf %1, %57 : vector<8x32xf32>
    %59 = vector.extract_strided_slice %52 {offsets = [0, 0], sizes = [8, 8], strides = [1, 1]} : vector<8x32xf32> to vector<8x8xf32>
    %60 = vector.extract_strided_slice %53 {offsets = [0, 0], sizes = [8, 8], strides = [1, 1]} : vector<8x32xf32> to vector<8x8xf32>
    %cst_41 = arith.constant dense<0.000000e+00> : vector<8x8xf32>
    %61 = tpu.matmul %59, %60, %cst_41 {dimension_numbers = #tpu.dot_dimension_numbers<[1], [1], [0], [0], [0, 0, 1, 0], [], []>} : vector<8x8xf32>, vector<8x8xf32>, vector<8x8xf32> -> vector<8x8xf32>
    %62 = arith.addf %61, %5 : vector<8x8xf32>
    %cst_42 = arith.constant dense<0xFF800000> : vector<8xf32>
    %63 = vector.multi_reduction <maximumf>, %62, %cst_42 [1] : vector<8x8xf32> to vector<8xf32>
    %64 = vector.shape_cast %63 : vector<8xf32> to vector<8x1xf32>
    %65 = vector.broadcast %64 : vector<8x1xf32> to vector<8x8xf32>
    %66 = arith.subf %62, %65 : vector<8x8xf32>
    %67 = math.exp %66 : vector<8x8xf32>
    %cst_43 = arith.constant dense<0.000000e+00> : vector<8xf32>
    %68 = vector.multi_reduction <add>, %67, %cst_43 [1] : vector<8x8xf32> to vector<8xf32>
    %69 = vector.shape_cast %68 : vector<8xf32> to vector<8x1xf32>
    %70 = tpu.reciprocal %69 : vector<8x1xf32> -> vector<8x1xf32>
    %71 = vector.broadcast %70 : vector<8x1xf32> to vector<8x8xf32>
    %72 = arith.mulf %67, %71 : vector<8x8xf32>
    %73 = vector.extract_strided_slice %54 {offsets = [0, 0], sizes = [8, 32], strides = [1, 1]} : vector<8x128xf32> to vector<8x32xf32>
    %cst_44 = arith.constant dense<0.000000e+00> : vector<8x32xf32>
    %74 = tpu.matmul %72, %73, %cst_44 {dimension_numbers = #tpu.dot_dimension_numbers<[1], [0], [0], [1], [0, 0, 1, 1], [], []>} : vector<8x8xf32>, vector<8x32xf32>, vector<8x32xf32> -> vector<8x32xf32>
    %75 = arith.addf %58, %74 : vector<8x32xf32>
    %76 = vector.extract_strided_slice %52 {offsets = [0, 8], sizes = [8, 8], strides = [1, 1]} : vector<8x32xf32> to vector<8x8xf32>
    %77 = vector.extract_strided_slice %53 {offsets = [0, 8], sizes = [8, 8], strides = [1, 1]} : vector<8x32xf32> to vector<8x8xf32>
    %cst_45 = arith.constant dense<0.000000e+00> : vector<8x8xf32>
    %78 = tpu.matmul %76, %77, %cst_45 {dimension_numbers = #tpu.dot_dimension_numbers<[1], [1], [0], [0], [0, 0, 1, 0], [], []>} : vector<8x8xf32>, vector<8x8xf32>, vector<8x8xf32> -> vector<8x8xf32>
    %79 = arith.addf %78, %5 : vector<8x8xf32>
    %cst_46 = arith.constant dense<0xFF800000> : vector<8xf32>
    %80 = vector.multi_reduction <maximumf>, %79, %cst_46 [1] : vector<8x8xf32> to vector<8xf32>
    %81 = vector.shape_cast %80 : vector<8xf32> to vector<8x1xf32>
    %82 = vector.broadcast %81 : vector<8x1xf32> to vector<8x8xf32>
    %83 = arith.subf %79, %82 : vector<8x8xf32>
    %84 = math.exp %83 : vector<8x8xf32>
    %cst_47 = arith.constant dense<0.000000e+00> : vector<8xf32>
    %85 = vector.multi_reduction <add>, %84, %cst_47 [1] : vector<8x8xf32> to vector<8xf32>
    %86 = vector.shape_cast %85 : vector<8xf32> to vector<8x1xf32>
    %87 = tpu.reciprocal %86 : vector<8x1xf32> -> vector<8x1xf32>
    %88 = vector.broadcast %87 : vector<8x1xf32> to vector<8x8xf32>
    %89 = arith.mulf %84, %88 : vector<8x8xf32>
    %90 = vector.extract_strided_slice %54 {offsets = [0, 32], sizes = [8, 32], strides = [1, 1]} : vector<8x128xf32> to vector<8x32xf32>
    %cst_48 = arith.constant dense<0.000000e+00> : vector<8x32xf32>
    %91 = tpu.matmul %89, %90, %cst_48 {dimension_numbers = #tpu.dot_dimension_numbers<[1], [0], [0], [1], [0, 0, 1, 1], [], []>} : vector<8x8xf32>, vector<8x32xf32>, vector<8x32xf32> -> vector<8x32xf32>
    %92 = arith.addf %75, %91 : vector<8x32xf32>
    %93 = vector.extract_strided_slice %52 {offsets = [0, 16], sizes = [8, 8], strides = [1, 1]} : vector<8x32xf32> to vector<8x8xf32>
    %94 = vector.extract_strided_slice %53 {offsets = [0, 16], sizes = [8, 8], strides = [1, 1]} : vector<8x32xf32> to vector<8x8xf32>
    %cst_49 = arith.constant dense<0.000000e+00> : vector<8x8xf32>
    %95 = tpu.matmul %93, %94, %cst_49 {dimension_numbers = #tpu.dot_dimension_numbers<[1], [1], [0], [0], [0, 0, 1, 0], [], []>} : vector<8x8xf32>, vector<8x8xf32>, vector<8x8xf32> -> vector<8x8xf32>
    %96 = arith.addf %95, %5 : vector<8x8xf32>
    %cst_50 = arith.constant dense<0xFF800000> : vector<8xf32>
    %97 = vector.multi_reduction <maximumf>, %96, %cst_50 [1] : vector<8x8xf32> to vector<8xf32>
    %98 = vector.shape_cast %97 : vector<8xf32> to vector<8x1xf32>
    %99 = vector.broadcast %98 : vector<8x1xf32> to vector<8x8xf32>
    %100 = arith.subf %96, %99 : vector<8x8xf32>
    %101 = math.exp %100 : vector<8x8xf32>
    %cst_51 = arith.constant dense<0.000000e+00> : vector<8xf32>
    %102 = vector.multi_reduction <add>, %101, %cst_51 [1] : vector<8x8xf32> to vector<8xf32>
    %103 = vector.shape_cast %102 : vector<8xf32> to vector<8x1xf32>
    %104 = tpu.reciprocal %103 : vector<8x1xf32> -> vector<8x1xf32>
    %105 = vector.broadcast %104 : vector<8x1xf32> to vector<8x8xf32>
    %106 = arith.mulf %101, %105 : vector<8x8xf32>
    %107 = vector.extract_strided_slice %54 {offsets = [0, 64], sizes = [8, 32], strides = [1, 1]} : vector<8x128xf32> to vector<8x32xf32>
    %cst_52 = arith.constant dense<0.000000e+00> : vector<8x32xf32>
    %108 = tpu.matmul %106, %107, %cst_52 {dimension_numbers = #tpu.dot_dimension_numbers<[1], [0], [0], [1], [0, 0, 1, 1], [], []>} : vector<8x8xf32>, vector<8x32xf32>, vector<8x32xf32> -> vector<8x32xf32>
    %109 = arith.addf %92, %108 : vector<8x32xf32>
    %110 = vector.extract_strided_slice %52 {offsets = [0, 24], sizes = [8, 8], strides = [1, 1]} : vector<8x32xf32> to vector<8x8xf32>
    %111 = vector.extract_strided_slice %53 {offsets = [0, 24], sizes = [8, 8], strides = [1, 1]} : vector<8x32xf32> to vector<8x8xf32>
    %cst_53 = arith.constant dense<0.000000e+00> : vector<8x8xf32>
    %112 = tpu.matmul %110, %111, %cst_53 {dimension_numbers = #tpu.dot_dimension_numbers<[1], [1], [0], [0], [0, 0, 1, 0], [], []>} : vector<8x8xf32>, vector<8x8xf32>, vector<8x8xf32> -> vector<8x8xf32>
    %113 = arith.addf %112, %5 : vector<8x8xf32>
    %cst_54 = arith.constant dense<0xFF800000> : vector<8xf32>
    %114 = vector.multi_reduction <maximumf>, %113, %cst_54 [1] : vector<8x8xf32> to vector<8xf32>
    %115 = vector.shape_cast %114 : vector<8xf32> to vector<8x1xf32>
    %116 = vector.broadcast %115 : vector<8x1xf32> to vector<8x8xf32>
    %117 = arith.subf %113, %116 : vector<8x8xf32>
    %118 = math.exp %117 : vector<8x8xf32>
    %cst_55 = arith.constant dense<0.000000e+00> : vector<8xf32>
    %119 = vector.multi_reduction <add>, %118, %cst_55 [1] : vector<8x8xf32> to vector<8xf32>
    %120 = vector.shape_cast %119 : vector<8xf32> to vector<8x1xf32>
    %121 = tpu.reciprocal %120 : vector<8x1xf32> -> vector<8x1xf32>
    %122 = vector.broadcast %121 : vector<8x1xf32> to vector<8x8xf32>
    %123 = arith.mulf %118, %122 : vector<8x8xf32>
    %124 = vector.extract_strided_slice %54 {offsets = [0, 96], sizes = [8, 32], strides = [1, 1]} : vector<8x128xf32> to vector<8x32xf32>
    %cst_56 = arith.constant dense<0.000000e+00> : vector<8x32xf32>
    %125 = tpu.matmul %123, %124, %cst_56 {dimension_numbers = #tpu.dot_dimension_numbers<[1], [0], [0], [1], [0, 0, 1, 1], [], []>} : vector<8x8xf32>, vector<8x32xf32>, vector<8x32xf32> -> vector<8x32xf32>
    %126 = arith.addf %109, %125 : vector<8x32xf32>
    %127 = vector.extract_strided_slice %19 {offsets = [1, 0], sizes = [1, 32], strides = [1, 1]} : vector<3x32xf32> to vector<1x32xf32>
    %128 = vector.extract_strided_slice %21 {offsets = [1, 0], sizes = [1, 32], strides = [1, 1]} : vector<3x32xf32> to vector<1x32xf32>
    %cst_57 = arith.constant dense<0.000000e+00> : vector<8xf32>
    %129 = vector.multi_reduction <add>, %126, %cst_57 [1] : vector<8x32xf32> to vector<8xf32>
    %130 = vector.shape_cast %129 : vector<8xf32> to vector<8x1xf32>
    %cst_58 = arith.constant 3.200000e+01 : f32
    %131 = vector.broadcast %cst_58 : f32 to vector<8x1xf32>
    %132 = arith.divf %130, %131 : vector<8x1xf32>
    %133 = vector.broadcast %132 : vector<8x1xf32> to vector<8x32xf32>
    %134 = arith.subf %126, %133 : vector<8x32xf32>
    %135 = arith.mulf %134, %134 : vector<8x32xf32>
    %cst_59 = arith.constant dense<0.000000e+00> : vector<8xf32>
    %136 = vector.multi_reduction <add>, %135, %cst_59 [1] : vector<8x32xf32> to vector<8xf32>
    %137 = vector.shape_cast %136 : vector<8xf32> to vector<8x1xf32>
    %cst_60 = arith.constant 0.0322580636 : f32
    %138 = vector.broadcast %cst_60 : f32 to vector<8x1xf32>
    %139 = arith.mulf %137, %138 : vector<8x1xf32>
    %140 = math.sqrt %139 : vector<8x1xf32>
    %cst_61 = arith.constant 9.99999997E-7 : f32
    %141 = vector.broadcast %cst_61 : f32 to vector<8x1xf32>
    %142 = arith.addf %140, %141 : vector<8x1xf32>
    %143 = tpu.reciprocal %142 : vector<8x1xf32> -> vector<8x1xf32>
    %144 = vector.broadcast %143 : vector<8x1xf32> to vector<8x32xf32>
    %145 = arith.mulf %134, %144 : vector<8x32xf32>
    %146 = vector.broadcast %127 : vector<1x32xf32> to vector<8x32xf32>
    %147 = arith.mulf %146, %145 : vector<8x32xf32>
    %148 = vector.broadcast %128 : vector<1x32xf32> to vector<8x32xf32>
    %149 = arith.addf %147, %148 : vector<8x32xf32>
    %c0_62 = arith.constant 0 : index
    %c0_63 = arith.constant 0 : index
    %c0_64 = arith.constant 0 : index
    %150 = vector.load %arg10[%c0_62, %c0_63, %c0_64] : memref<2x32x32xf32, #tpu.memory_space<vmem>>, vector<1x32x32xf32>
    %151 = vector.shape_cast %150 : vector<1x32x32xf32> to vector<32x32xf32>
    %cst_65 = arith.constant dense<0.000000e+00> : vector<8x32xf32>
    %152 = tpu.matmul %149, %151, %cst_65 {dimension_numbers = #tpu.dot_dimension_numbers<[1], [0], [0], [1], [0, 0, 1, 1], [], []>} : vector<8x32xf32>, vector<32x32xf32>, vector<8x32xf32> -> vector<8x32xf32>
    %c0_66 = arith.constant 0 : index
    %c0_67 = arith.constant 0 : index
    %c0_68 = arith.constant 0 : index
    %153 = vector.load %arg11[%c0_66, %c0_67, %c0_68] : memref<2x1x32xf32, #tpu.memory_space<vmem>>, vector<1x1x32xf32>
    %154 = vector.shape_cast %153 : vector<1x1x32xf32> to vector<1x32xf32>
    %155 = vector.broadcast %154 : vector<1x32xf32> to vector<8x32xf32>
    %156 = arith.addf %152, %155 : vector<8x32xf32>
    %157 = vector.extract_strided_slice %12 {offsets = [0, 0], sizes = [8, 32], strides = [1, 1]} : vector<8x64xf32> to vector<8x32xf32>
    %158 = vector.extract_strided_slice %17 {offsets = [0, 0], sizes = [8, 128], strides = [1, 1]} : vector<8x256xf32> to vector<8x128xf32>
    %c0_69 = arith.constant 0 : index
    %c0_70 = arith.constant 0 : index
    %c0_71 = arith.constant 0 : index
    %159 = vector.load %arg16[%c0_69, %c0_70, %c0_71] : memref<2x1x32xf32, #tpu.memory_space<vmem>>, vector<1x1x32xf32>
    %160 = vector.shape_cast %159 : vector<1x1x32xf32> to vector<1x32xf32>
    %161 = vector.broadcast %160 : vector<1x32xf32> to vector<8x32xf32>
    %162 = arith.addf %126, %161 : vector<8x32xf32>
    %163 = vector.extract_strided_slice %156 {offsets = [0, 0], sizes = [8, 8], strides = [1, 1]} : vector<8x32xf32> to vector<8x8xf32>
    %164 = vector.extract_strided_slice %157 {offsets = [0, 0], sizes = [8, 8], strides = [1, 1]} : vector<8x32xf32> to vector<8x8xf32>
    %cst_72 = arith.constant dense<0.000000e+00> : vector<8x8xf32>
    %165 = tpu.matmul %163, %164, %cst_72 {dimension_numbers = #tpu.dot_dimension_numbers<[1], [1], [0], [0], [0, 0, 1, 0], [], []>} : vector<8x8xf32>, vector<8x8xf32>, vector<8x8xf32> -> vector<8x8xf32>
    %166 = arith.addf %165, %7 : vector<8x8xf32>
    %cst_73 = arith.constant dense<0xFF800000> : vector<8xf32>
    %167 = vector.multi_reduction <maximumf>, %166, %cst_73 [1] : vector<8x8xf32> to vector<8xf32>
    %168 = vector.shape_cast %167 : vector<8xf32> to vector<8x1xf32>
    %169 = vector.broadcast %168 : vector<8x1xf32> to vector<8x8xf32>
    %170 = arith.subf %166, %169 : vector<8x8xf32>
    %171 = math.exp %170 : vector<8x8xf32>
    %cst_74 = arith.constant dense<0.000000e+00> : vector<8xf32>
    %172 = vector.multi_reduction <add>, %171, %cst_74 [1] : vector<8x8xf32> to vector<8xf32>
    %173 = vector.shape_cast %172 : vector<8xf32> to vector<8x1xf32>
    %174 = tpu.reciprocal %173 : vector<8x1xf32> -> vector<8x1xf32>
    %175 = vector.broadcast %174 : vector<8x1xf32> to vector<8x8xf32>
    %176 = arith.mulf %171, %175 : vector<8x8xf32>
    %177 = vector.extract_strided_slice %158 {offsets = [0, 0], sizes = [8, 32], strides = [1, 1]} : vector<8x128xf32> to vector<8x32xf32>
    %cst_75 = arith.constant dense<0.000000e+00> : vector<8x32xf32>
    %178 = tpu.matmul %176, %177, %cst_75 {dimension_numbers = #tpu.dot_dimension_numbers<[1], [0], [0], [1], [0, 0, 1, 1], [], []>} : vector<8x8xf32>, vector<8x32xf32>, vector<8x32xf32> -> vector<8x32xf32>
    %179 = arith.addf %162, %178 : vector<8x32xf32>
    %180 = vector.extract_strided_slice %156 {offsets = [0, 8], sizes = [8, 8], strides = [1, 1]} : vector<8x32xf32> to vector<8x8xf32>
    %181 = vector.extract_strided_slice %157 {offsets = [0, 8], sizes = [8, 8], strides = [1, 1]} : vector<8x32xf32> to vector<8x8xf32>
    %cst_76 = arith.constant dense<0.000000e+00> : vector<8x8xf32>
    %182 = tpu.matmul %180, %181, %cst_76 {dimension_numbers = #tpu.dot_dimension_numbers<[1], [1], [0], [0], [0, 0, 1, 0], [], []>} : vector<8x8xf32>, vector<8x8xf32>, vector<8x8xf32> -> vector<8x8xf32>
    %183 = arith.addf %182, %7 : vector<8x8xf32>
    %cst_77 = arith.constant dense<0xFF800000> : vector<8xf32>
    %184 = vector.multi_reduction <maximumf>, %183, %cst_77 [1] : vector<8x8xf32> to vector<8xf32>
    %185 = vector.shape_cast %184 : vector<8xf32> to vector<8x1xf32>
    %186 = vector.broadcast %185 : vector<8x1xf32> to vector<8x8xf32>
    %187 = arith.subf %183, %186 : vector<8x8xf32>
    %188 = math.exp %187 : vector<8x8xf32>
    %cst_78 = arith.constant dense<0.000000e+00> : vector<8xf32>
    %189 = vector.multi_reduction <add>, %188, %cst_78 [1] : vector<8x8xf32> to vector<8xf32>
    %190 = vector.shape_cast %189 : vector<8xf32> to vector<8x1xf32>
    %191 = tpu.reciprocal %190 : vector<8x1xf32> -> vector<8x1xf32>
    %192 = vector.broadcast %191 : vector<8x1xf32> to vector<8x8xf32>
    %193 = arith.mulf %188, %192 : vector<8x8xf32>
    %194 = vector.extract_strided_slice %158 {offsets = [0, 32], sizes = [8, 32], strides = [1, 1]} : vector<8x128xf32> to vector<8x32xf32>
    %cst_79 = arith.constant dense<0.000000e+00> : vector<8x32xf32>
    %195 = tpu.matmul %193, %194, %cst_79 {dimension_numbers = #tpu.dot_dimension_numbers<[1], [0], [0], [1], [0, 0, 1, 1], [], []>} : vector<8x8xf32>, vector<8x32xf32>, vector<8x32xf32> -> vector<8x32xf32>
    %196 = arith.addf %179, %195 : vector<8x32xf32>
    %197 = vector.extract_strided_slice %156 {offsets = [0, 16], sizes = [8, 8], strides = [1, 1]} : vector<8x32xf32> to vector<8x8xf32>
    %198 = vector.extract_strided_slice %157 {offsets = [0, 16], sizes = [8, 8], strides = [1, 1]} : vector<8x32xf32> to vector<8x8xf32>
    %cst_80 = arith.constant dense<0.000000e+00> : vector<8x8xf32>
    %199 = tpu.matmul %197, %198, %cst_80 {dimension_numbers = #tpu.dot_dimension_numbers<[1], [1], [0], [0], [0, 0, 1, 0], [], []>} : vector<8x8xf32>, vector<8x8xf32>, vector<8x8xf32> -> vector<8x8xf32>
    %200 = arith.addf %199, %7 : vector<8x8xf32>
    %cst_81 = arith.constant dense<0xFF800000> : vector<8xf32>
    %201 = vector.multi_reduction <maximumf>, %200, %cst_81 [1] : vector<8x8xf32> to vector<8xf32>
    %202 = vector.shape_cast %201 : vector<8xf32> to vector<8x1xf32>
    %203 = vector.broadcast %202 : vector<8x1xf32> to vector<8x8xf32>
    %204 = arith.subf %200, %203 : vector<8x8xf32>
    %205 = math.exp %204 : vector<8x8xf32>
    %cst_82 = arith.constant dense<0.000000e+00> : vector<8xf32>
    %206 = vector.multi_reduction <add>, %205, %cst_82 [1] : vector<8x8xf32> to vector<8xf32>
    %207 = vector.shape_cast %206 : vector<8xf32> to vector<8x1xf32>
    %208 = tpu.reciprocal %207 : vector<8x1xf32> -> vector<8x1xf32>
    %209 = vector.broadcast %208 : vector<8x1xf32> to vector<8x8xf32>
    %210 = arith.mulf %205, %209 : vector<8x8xf32>
    %211 = vector.extract_strided_slice %158 {offsets = [0, 64], sizes = [8, 32], strides = [1, 1]} : vector<8x128xf32> to vector<8x32xf32>
    %cst_83 = arith.constant dense<0.000000e+00> : vector<8x32xf32>
    %212 = tpu.matmul %210, %211, %cst_83 {dimension_numbers = #tpu.dot_dimension_numbers<[1], [0], [0], [1], [0, 0, 1, 1], [], []>} : vector<8x8xf32>, vector<8x32xf32>, vector<8x32xf32> -> vector<8x32xf32>
    %213 = arith.addf %196, %212 : vector<8x32xf32>
    %214 = vector.extract_strided_slice %156 {offsets = [0, 24], sizes = [8, 8], strides = [1, 1]} : vector<8x32xf32> to vector<8x8xf32>
    %215 = vector.extract_strided_slice %157 {offsets = [0, 24], sizes = [8, 8], strides = [1, 1]} : vector<8x32xf32> to vector<8x8xf32>
    %cst_84 = arith.constant dense<0.000000e+00> : vector<8x8xf32>
    %216 = tpu.matmul %214, %215, %cst_84 {dimension_numbers = #tpu.dot_dimension_numbers<[1], [1], [0], [0], [0, 0, 1, 0], [], []>} : vector<8x8xf32>, vector<8x8xf32>, vector<8x8xf32> -> vector<8x8xf32>
    %217 = arith.addf %216, %7 : vector<8x8xf32>
    %cst_85 = arith.constant dense<0xFF800000> : vector<8xf32>
    %218 = vector.multi_reduction <maximumf>, %217, %cst_85 [1] : vector<8x8xf32> to vector<8xf32>
    %219 = vector.shape_cast %218 : vector<8xf32> to vector<8x1xf32>
    %220 = vector.broadcast %219 : vector<8x1xf32> to vector<8x8xf32>
    %221 = arith.subf %217, %220 : vector<8x8xf32>
    %222 = math.exp %221 : vector<8x8xf32>
    %cst_86 = arith.constant dense<0.000000e+00> : vector<8xf32>
    %223 = vector.multi_reduction <add>, %222, %cst_86 [1] : vector<8x8xf32> to vector<8xf32>
    %224 = vector.shape_cast %223 : vector<8xf32> to vector<8x1xf32>
    %225 = tpu.reciprocal %224 : vector<8x1xf32> -> vector<8x1xf32>
    %226 = vector.broadcast %225 : vector<8x1xf32> to vector<8x8xf32>
    %227 = arith.mulf %222, %226 : vector<8x8xf32>
    %228 = vector.extract_strided_slice %158 {offsets = [0, 96], sizes = [8, 32], strides = [1, 1]} : vector<8x128xf32> to vector<8x32xf32>
    %cst_87 = arith.constant dense<0.000000e+00> : vector<8x32xf32>
    %229 = tpu.matmul %227, %228, %cst_87 {dimension_numbers = #tpu.dot_dimension_numbers<[1], [0], [0], [1], [0, 0, 1, 1], [], []>} : vector<8x8xf32>, vector<8x32xf32>, vector<8x32xf32> -> vector<8x32xf32>
    %230 = arith.addf %213, %229 : vector<8x32xf32>
    %231 = vector.extract_strided_slice %19 {offsets = [2, 0], sizes = [1, 32], strides = [1, 1]} : vector<3x32xf32> to vector<1x32xf32>
    %232 = vector.extract_strided_slice %21 {offsets = [2, 0], sizes = [1, 32], strides = [1, 1]} : vector<3x32xf32> to vector<1x32xf32>
    %cst_88 = arith.constant dense<0.000000e+00> : vector<8xf32>
    %233 = vector.multi_reduction <add>, %230, %cst_88 [1] : vector<8x32xf32> to vector<8xf32>
    %234 = vector.shape_cast %233 : vector<8xf32> to vector<8x1xf32>
    %cst_89 = arith.constant 3.200000e+01 : f32
    %235 = vector.broadcast %cst_89 : f32 to vector<8x1xf32>
    %236 = arith.divf %234, %235 : vector<8x1xf32>
    %237 = vector.broadcast %236 : vector<8x1xf32> to vector<8x32xf32>
    %238 = arith.subf %230, %237 : vector<8x32xf32>
    %239 = arith.mulf %238, %238 : vector<8x32xf32>
    %cst_90 = arith.constant dense<0.000000e+00> : vector<8xf32>
    %240 = vector.multi_reduction <add>, %239, %cst_90 [1] : vector<8x32xf32> to vector<8xf32>
    %241 = vector.shape_cast %240 : vector<8xf32> to vector<8x1xf32>
    %cst_91 = arith.constant 0.0322580636 : f32
    %242 = vector.broadcast %cst_91 : f32 to vector<8x1xf32>
    %243 = arith.mulf %241, %242 : vector<8x1xf32>
    %244 = math.sqrt %243 : vector<8x1xf32>
    %cst_92 = arith.constant 9.99999997E-7 : f32
    %245 = vector.broadcast %cst_92 : f32 to vector<8x1xf32>
    %246 = arith.addf %244, %245 : vector<8x1xf32>
    %247 = tpu.reciprocal %246 : vector<8x1xf32> -> vector<8x1xf32>
    %248 = vector.broadcast %247 : vector<8x1xf32> to vector<8x32xf32>
    %249 = arith.mulf %238, %248 : vector<8x32xf32>
    %250 = vector.broadcast %231 : vector<1x32xf32> to vector<8x32xf32>
    %251 = arith.mulf %250, %249 : vector<8x32xf32>
    %252 = vector.broadcast %232 : vector<1x32xf32> to vector<8x32xf32>
    %253 = arith.addf %251, %252 : vector<8x32xf32>
    %c0_93 = arith.constant 0 : index
    %c0_94 = arith.constant 0 : index
    %c0_95 = arith.constant 0 : index
    %254 = vector.load %arg17[%c0_93, %c0_94, %c0_95] : memref<2x32x64xf32, #tpu.memory_space<vmem>>, vector<1x32x64xf32>
    %255 = vector.shape_cast %254 : vector<1x32x64xf32> to vector<32x64xf32>
    %cst_96 = arith.constant dense<0.000000e+00> : vector<8x64xf32>
    %256 = tpu.matmul %253, %255, %cst_96 {dimension_numbers = #tpu.dot_dimension_numbers<[1], [0], [0], [1], [0, 0, 1, 1], [], []>} : vector<8x32xf32>, vector<32x64xf32>, vector<8x64xf32> -> vector<8x64xf32>
    %c0_97 = arith.constant 0 : index
    %c0_98 = arith.constant 0 : index
    %c0_99 = arith.constant 0 : index
    %257 = vector.load %arg18[%c0_97, %c0_98, %c0_99] : memref<2x1x64xf32, #tpu.memory_space<vmem>>, vector<1x1x64xf32>
    %258 = vector.shape_cast %257 : vector<1x1x64xf32> to vector<1x64xf32>
    %259 = vector.broadcast %258 : vector<1x64xf32> to vector<8x64xf32>
    %260 = arith.addf %256, %259 : vector<8x64xf32>
    %cst_100 = arith.constant 0.000000e+00 : f32
    %261 = vector.broadcast %cst_100 : f32 to vector<8x64xf32>
    %262 = arith.maximumf %260, %261 : vector<8x64xf32>
    %c0_101 = arith.constant 0 : index
    %c0_102 = arith.constant 0 : index
    %c0_103 = arith.constant 0 : index
    %263 = vector.load %arg19[%c0_101, %c0_102, %c0_103] : memref<2x64x32xf32, #tpu.memory_space<vmem>>, vector<1x64x32xf32>
    %264 = vector.shape_cast %263 : vector<1x64x32xf32> to vector<64x32xf32>
    %cst_104 = arith.constant dense<0.000000e+00> : vector<8x32xf32>
    %265 = tpu.matmul %262, %264, %cst_104 {dimension_numbers = #tpu.dot_dimension_numbers<[1], [0], [0], [1], [0, 0, 1, 1], [], []>} : vector<8x64xf32>, vector<64x32xf32>, vector<8x32xf32> -> vector<8x32xf32>
    %266 = arith.addf %230, %265 : vector<8x32xf32>
    %c0_105 = arith.constant 0 : index
    %c0_106 = arith.constant 0 : index
    %c0_107 = arith.constant 0 : index
    %267 = vector.load %arg20[%c0_105, %c0_106, %c0_107] : memref<2x1x32xf32, #tpu.memory_space<vmem>>, vector<1x1x32xf32>
    %268 = vector.shape_cast %267 : vector<1x1x32xf32> to vector<1x32xf32>
    %269 = vector.broadcast %268 : vector<1x32xf32> to vector<8x32xf32>
    %270 = arith.addf %266, %269 : vector<8x32xf32>
    %c1 = arith.constant 1 : index
    %c0_108 = arith.constant 0 : index
    %c0_109 = arith.constant 0 : index
    %271 = vector.load %arg5[%c1, %c0_108, %c0_109] : memref<2x3x32xf32, #tpu.memory_space<vmem>>, vector<1x3x32xf32>
    %272 = vector.shape_cast %271 : vector<1x3x32xf32> to vector<3x32xf32>
    %c1_110 = arith.constant 1 : index
    %c0_111 = arith.constant 0 : index
    %c0_112 = arith.constant 0 : index
    %273 = vector.load %arg6[%c1_110, %c0_111, %c0_112] : memref<2x3x32xf32, #tpu.memory_space<vmem>>, vector<1x3x32xf32>
    %274 = vector.shape_cast %273 : vector<1x3x32xf32> to vector<3x32xf32>
    %275 = vector.extract_strided_slice %272 {offsets = [0, 0], sizes = [1, 32], strides = [1, 1]} : vector<3x32xf32> to vector<1x32xf32>
    %276 = vector.extract_strided_slice %274 {offsets = [0, 0], sizes = [1, 32], strides = [1, 1]} : vector<3x32xf32> to vector<1x32xf32>
    %cst_113 = arith.constant dense<0.000000e+00> : vector<8xf32>
    %277 = vector.multi_reduction <add>, %270, %cst_113 [1] : vector<8x32xf32> to vector<8xf32>
    %278 = vector.shape_cast %277 : vector<8xf32> to vector<8x1xf32>
    %cst_114 = arith.constant 3.200000e+01 : f32
    %279 = vector.broadcast %cst_114 : f32 to vector<8x1xf32>
    %280 = arith.divf %278, %279 : vector<8x1xf32>
    %281 = vector.broadcast %280 : vector<8x1xf32> to vector<8x32xf32>
    %282 = arith.subf %270, %281 : vector<8x32xf32>
    %283 = arith.mulf %282, %282 : vector<8x32xf32>
    %cst_115 = arith.constant dense<0.000000e+00> : vector<8xf32>
    %284 = vector.multi_reduction <add>, %283, %cst_115 [1] : vector<8x32xf32> to vector<8xf32>
    %285 = vector.shape_cast %284 : vector<8xf32> to vector<8x1xf32>
    %cst_116 = arith.constant 0.0322580636 : f32
    %286 = vector.broadcast %cst_116 : f32 to vector<8x1xf32>
    %287 = arith.mulf %285, %286 : vector<8x1xf32>
    %288 = math.sqrt %287 : vector<8x1xf32>
    %cst_117 = arith.constant 9.99999997E-7 : f32
    %289 = vector.broadcast %cst_117 : f32 to vector<8x1xf32>
    %290 = arith.addf %288, %289 : vector<8x1xf32>
    %291 = tpu.reciprocal %290 : vector<8x1xf32> -> vector<8x1xf32>
    %292 = vector.broadcast %291 : vector<8x1xf32> to vector<8x32xf32>
    %293 = arith.mulf %282, %292 : vector<8x32xf32>
    %294 = vector.broadcast %275 : vector<1x32xf32> to vector<8x32xf32>
    %295 = arith.mulf %294, %293 : vector<8x32xf32>
    %296 = vector.broadcast %276 : vector<1x32xf32> to vector<8x32xf32>
    %297 = arith.addf %295, %296 : vector<8x32xf32>
    %c1_118 = arith.constant 1 : index
    %c0_119 = arith.constant 0 : index
    %c0_120 = arith.constant 0 : index
    %298 = vector.load %arg7[%c1_118, %c0_119, %c0_120] : memref<2x32x192xf32, #tpu.memory_space<vmem>>, vector<1x32x192xf32>
    %299 = vector.shape_cast %298 : vector<1x32x192xf32> to vector<32x192xf32>
    %cst_121 = arith.constant dense<0.000000e+00> : vector<8x192xf32>
    %300 = tpu.matmul %297, %299, %cst_121 {dimension_numbers = #tpu.dot_dimension_numbers<[1], [0], [0], [1], [0, 0, 1, 1], [], []>} : vector<8x32xf32>, vector<32x192xf32>, vector<8x192xf32> -> vector<8x192xf32>
    %c1_122 = arith.constant 1 : index
    %c0_123 = arith.constant 0 : index
    %c0_124 = arith.constant 0 : index
    %301 = vector.load %arg8[%c1_122, %c0_123, %c0_124] : memref<2x1x192xf32, #tpu.memory_space<vmem>>, vector<1x1x192xf32>
    %302 = vector.shape_cast %301 : vector<1x1x192xf32> to vector<1x192xf32>
    %303 = vector.broadcast %302 : vector<1x192xf32> to vector<8x192xf32>
    %304 = arith.addf %300, %303 : vector<8x192xf32>
    %305 = vector.extract_strided_slice %304 {offsets = [0, 0], sizes = [8, 32], strides = [1, 1]} : vector<8x192xf32> to vector<8x32xf32>
    %306 = vector.extract_strided_slice %304 {offsets = [0, 32], sizes = [8, 32], strides = [1, 1]} : vector<8x192xf32> to vector<8x32xf32>
    %307 = vector.extract_strided_slice %304 {offsets = [0, 64], sizes = [8, 128], strides = [1, 1]} : vector<8x192xf32> to vector<8x128xf32>
    %c1_125 = arith.constant 1 : index
    %c0_126 = arith.constant 0 : index
    %c0_127 = arith.constant 0 : index
    %308 = vector.load %arg9[%c1_125, %c0_126, %c0_127] : memref<2x1x32xf32, #tpu.memory_space<vmem>>, vector<1x1x32xf32>
    %309 = vector.shape_cast %308 : vector<1x1x32xf32> to vector<1x32xf32>
    %310 = vector.broadcast %309 : vector<1x32xf32> to vector<8x32xf32>
    %311 = arith.addf %270, %310 : vector<8x32xf32>
    %312 = vector.extract_strided_slice %305 {offsets = [0, 0], sizes = [8, 8], strides = [1, 1]} : vector<8x32xf32> to vector<8x8xf32>
    %313 = vector.extract_strided_slice %306 {offsets = [0, 0], sizes = [8, 8], strides = [1, 1]} : vector<8x32xf32> to vector<8x8xf32>
    %cst_128 = arith.constant dense<0.000000e+00> : vector<8x8xf32>
    %314 = tpu.matmul %312, %313, %cst_128 {dimension_numbers = #tpu.dot_dimension_numbers<[1], [1], [0], [0], [0, 0, 1, 0], [], []>} : vector<8x8xf32>, vector<8x8xf32>, vector<8x8xf32> -> vector<8x8xf32>
    %315 = arith.addf %314, %5 : vector<8x8xf32>
    %cst_129 = arith.constant dense<0xFF800000> : vector<8xf32>
    %316 = vector.multi_reduction <maximumf>, %315, %cst_129 [1] : vector<8x8xf32> to vector<8xf32>
    %317 = vector.shape_cast %316 : vector<8xf32> to vector<8x1xf32>
    %318 = vector.broadcast %317 : vector<8x1xf32> to vector<8x8xf32>
    %319 = arith.subf %315, %318 : vector<8x8xf32>
    %320 = math.exp %319 : vector<8x8xf32>
    %cst_130 = arith.constant dense<0.000000e+00> : vector<8xf32>
    %321 = vector.multi_reduction <add>, %320, %cst_130 [1] : vector<8x8xf32> to vector<8xf32>
    %322 = vector.shape_cast %321 : vector<8xf32> to vector<8x1xf32>
    %323 = tpu.reciprocal %322 : vector<8x1xf32> -> vector<8x1xf32>
    %324 = vector.broadcast %323 : vector<8x1xf32> to vector<8x8xf32>
    %325 = arith.mulf %320, %324 : vector<8x8xf32>
    %326 = vector.extract_strided_slice %307 {offsets = [0, 0], sizes = [8, 32], strides = [1, 1]} : vector<8x128xf32> to vector<8x32xf32>
    %cst_131 = arith.constant dense<0.000000e+00> : vector<8x32xf32>
    %327 = tpu.matmul %325, %326, %cst_131 {dimension_numbers = #tpu.dot_dimension_numbers<[1], [0], [0], [1], [0, 0, 1, 1], [], []>} : vector<8x8xf32>, vector<8x32xf32>, vector<8x32xf32> -> vector<8x32xf32>
    %328 = arith.addf %311, %327 : vector<8x32xf32>
    %329 = vector.extract_strided_slice %305 {offsets = [0, 8], sizes = [8, 8], strides = [1, 1]} : vector<8x32xf32> to vector<8x8xf32>
    %330 = vector.extract_strided_slice %306 {offsets = [0, 8], sizes = [8, 8], strides = [1, 1]} : vector<8x32xf32> to vector<8x8xf32>
    %cst_132 = arith.constant dense<0.000000e+00> : vector<8x8xf32>
    %331 = tpu.matmul %329, %330, %cst_132 {dimension_numbers = #tpu.dot_dimension_numbers<[1], [1], [0], [0], [0, 0, 1, 0], [], []>} : vector<8x8xf32>, vector<8x8xf32>, vector<8x8xf32> -> vector<8x8xf32>
    %332 = arith.addf %331, %5 : vector<8x8xf32>
    %cst_133 = arith.constant dense<0xFF800000> : vector<8xf32>
    %333 = vector.multi_reduction <maximumf>, %332, %cst_133 [1] : vector<8x8xf32> to vector<8xf32>
    %334 = vector.shape_cast %333 : vector<8xf32> to vector<8x1xf32>
    %335 = vector.broadcast %334 : vector<8x1xf32> to vector<8x8xf32>
    %336 = arith.subf %332, %335 : vector<8x8xf32>
    %337 = math.exp %336 : vector<8x8xf32>
    %cst_134 = arith.constant dense<0.000000e+00> : vector<8xf32>
    %338 = vector.multi_reduction <add>, %337, %cst_134 [1] : vector<8x8xf32> to vector<8xf32>
    %339 = vector.shape_cast %338 : vector<8xf32> to vector<8x1xf32>
    %340 = tpu.reciprocal %339 : vector<8x1xf32> -> vector<8x1xf32>
    %341 = vector.broadcast %340 : vector<8x1xf32> to vector<8x8xf32>
    %342 = arith.mulf %337, %341 : vector<8x8xf32>
    %343 = vector.extract_strided_slice %307 {offsets = [0, 32], sizes = [8, 32], strides = [1, 1]} : vector<8x128xf32> to vector<8x32xf32>
    %cst_135 = arith.constant dense<0.000000e+00> : vector<8x32xf32>
    %344 = tpu.matmul %342, %343, %cst_135 {dimension_numbers = #tpu.dot_dimension_numbers<[1], [0], [0], [1], [0, 0, 1, 1], [], []>} : vector<8x8xf32>, vector<8x32xf32>, vector<8x32xf32> -> vector<8x32xf32>
    %345 = arith.addf %328, %344 : vector<8x32xf32>
    %346 = vector.extract_strided_slice %305 {offsets = [0, 16], sizes = [8, 8], strides = [1, 1]} : vector<8x32xf32> to vector<8x8xf32>
    %347 = vector.extract_strided_slice %306 {offsets = [0, 16], sizes = [8, 8], strides = [1, 1]} : vector<8x32xf32> to vector<8x8xf32>
    %cst_136 = arith.constant dense<0.000000e+00> : vector<8x8xf32>
    %348 = tpu.matmul %346, %347, %cst_136 {dimension_numbers = #tpu.dot_dimension_numbers<[1], [1], [0], [0], [0, 0, 1, 0], [], []>} : vector<8x8xf32>, vector<8x8xf32>, vector<8x8xf32> -> vector<8x8xf32>
    %349 = arith.addf %348, %5 : vector<8x8xf32>
    %cst_137 = arith.constant dense<0xFF800000> : vector<8xf32>
    %350 = vector.multi_reduction <maximumf>, %349, %cst_137 [1] : vector<8x8xf32> to vector<8xf32>
    %351 = vector.shape_cast %350 : vector<8xf32> to vector<8x1xf32>
    %352 = vector.broadcast %351 : vector<8x1xf32> to vector<8x8xf32>
    %353 = arith.subf %349, %352 : vector<8x8xf32>
    %354 = math.exp %353 : vector<8x8xf32>
    %cst_138 = arith.constant dense<0.000000e+00> : vector<8xf32>
    %355 = vector.multi_reduction <add>, %354, %cst_138 [1] : vector<8x8xf32> to vector<8xf32>
    %356 = vector.shape_cast %355 : vector<8xf32> to vector<8x1xf32>
    %357 = tpu.reciprocal %356 : vector<8x1xf32> -> vector<8x1xf32>
    %358 = vector.broadcast %357 : vector<8x1xf32> to vector<8x8xf32>
    %359 = arith.mulf %354, %358 : vector<8x8xf32>
    %360 = vector.extract_strided_slice %307 {offsets = [0, 64], sizes = [8, 32], strides = [1, 1]} : vector<8x128xf32> to vector<8x32xf32>
    %cst_139 = arith.constant dense<0.000000e+00> : vector<8x32xf32>
    %361 = tpu.matmul %359, %360, %cst_139 {dimension_numbers = #tpu.dot_dimension_numbers<[1], [0], [0], [1], [0, 0, 1, 1], [], []>} : vector<8x8xf32>, vector<8x32xf32>, vector<8x32xf32> -> vector<8x32xf32>
    %362 = arith.addf %345, %361 : vector<8x32xf32>
    %363 = vector.extract_strided_slice %305 {offsets = [0, 24], sizes = [8, 8], strides = [1, 1]} : vector<8x32xf32> to vector<8x8xf32>
    %364 = vector.extract_strided_slice %306 {offsets = [0, 24], sizes = [8, 8], strides = [1, 1]} : vector<8x32xf32> to vector<8x8xf32>
    %cst_140 = arith.constant dense<0.000000e+00> : vector<8x8xf32>
    %365 = tpu.matmul %363, %364, %cst_140 {dimension_numbers = #tpu.dot_dimension_numbers<[1], [1], [0], [0], [0, 0, 1, 0], [], []>} : vector<8x8xf32>, vector<8x8xf32>, vector<8x8xf32> -> vector<8x8xf32>
    %366 = arith.addf %365, %5 : vector<8x8xf32>
    %cst_141 = arith.constant dense<0xFF800000> : vector<8xf32>
    %367 = vector.multi_reduction <maximumf>, %366, %cst_141 [1] : vector<8x8xf32> to vector<8xf32>
    %368 = vector.shape_cast %367 : vector<8xf32> to vector<8x1xf32>
    %369 = vector.broadcast %368 : vector<8x1xf32> to vector<8x8xf32>
    %370 = arith.subf %366, %369 : vector<8x8xf32>
    %371 = math.exp %370 : vector<8x8xf32>
    %cst_142 = arith.constant dense<0.000000e+00> : vector<8xf32>
    %372 = vector.multi_reduction <add>, %371, %cst_142 [1] : vector<8x8xf32> to vector<8xf32>
    %373 = vector.shape_cast %372 : vector<8xf32> to vector<8x1xf32>
    %374 = tpu.reciprocal %373 : vector<8x1xf32> -> vector<8x1xf32>
    %375 = vector.broadcast %374 : vector<8x1xf32> to vector<8x8xf32>
    %376 = arith.mulf %371, %375 : vector<8x8xf32>
    %377 = vector.extract_strided_slice %307 {offsets = [0, 96], sizes = [8, 32], strides = [1, 1]} : vector<8x128xf32> to vector<8x32xf32>
    %cst_143 = arith.constant dense<0.000000e+00> : vector<8x32xf32>
    %378 = tpu.matmul %376, %377, %cst_143 {dimension_numbers = #tpu.dot_dimension_numbers<[1], [0], [0], [1], [0, 0, 1, 1], [], []>} : vector<8x8xf32>, vector<8x32xf32>, vector<8x32xf32> -> vector<8x32xf32>
    %379 = arith.addf %362, %378 : vector<8x32xf32>
    %380 = vector.extract_strided_slice %272 {offsets = [1, 0], sizes = [1, 32], strides = [1, 1]} : vector<3x32xf32> to vector<1x32xf32>
    %381 = vector.extract_strided_slice %274 {offsets = [1, 0], sizes = [1, 32], strides = [1, 1]} : vector<3x32xf32> to vector<1x32xf32>
    %cst_144 = arith.constant dense<0.000000e+00> : vector<8xf32>
    %382 = vector.multi_reduction <add>, %379, %cst_144 [1] : vector<8x32xf32> to vector<8xf32>
    %383 = vector.shape_cast %382 : vector<8xf32> to vector<8x1xf32>
    %cst_145 = arith.constant 3.200000e+01 : f32
    %384 = vector.broadcast %cst_145 : f32 to vector<8x1xf32>
    %385 = arith.divf %383, %384 : vector<8x1xf32>
    %386 = vector.broadcast %385 : vector<8x1xf32> to vector<8x32xf32>
    %387 = arith.subf %379, %386 : vector<8x32xf32>
    %388 = arith.mulf %387, %387 : vector<8x32xf32>
    %cst_146 = arith.constant dense<0.000000e+00> : vector<8xf32>
    %389 = vector.multi_reduction <add>, %388, %cst_146 [1] : vector<8x32xf32> to vector<8xf32>
    %390 = vector.shape_cast %389 : vector<8xf32> to vector<8x1xf32>
    %cst_147 = arith.constant 0.0322580636 : f32
    %391 = vector.broadcast %cst_147 : f32 to vector<8x1xf32>
    %392 = arith.mulf %390, %391 : vector<8x1xf32>
    %393 = math.sqrt %392 : vector<8x1xf32>
    %cst_148 = arith.constant 9.99999997E-7 : f32
    %394 = vector.broadcast %cst_148 : f32 to vector<8x1xf32>
    %395 = arith.addf %393, %394 : vector<8x1xf32>
    %396 = tpu.reciprocal %395 : vector<8x1xf32> -> vector<8x1xf32>
    %397 = vector.broadcast %396 : vector<8x1xf32> to vector<8x32xf32>
    %398 = arith.mulf %387, %397 : vector<8x32xf32>
    %399 = vector.broadcast %380 : vector<1x32xf32> to vector<8x32xf32>
    %400 = arith.mulf %399, %398 : vector<8x32xf32>
    %401 = vector.broadcast %381 : vector<1x32xf32> to vector<8x32xf32>
    %402 = arith.addf %400, %401 : vector<8x32xf32>
    %c1_149 = arith.constant 1 : index
    %c0_150 = arith.constant 0 : index
    %c0_151 = arith.constant 0 : index
    %403 = vector.load %arg10[%c1_149, %c0_150, %c0_151] : memref<2x32x32xf32, #tpu.memory_space<vmem>>, vector<1x32x32xf32>
    %404 = vector.shape_cast %403 : vector<1x32x32xf32> to vector<32x32xf32>
    %cst_152 = arith.constant dense<0.000000e+00> : vector<8x32xf32>
    %405 = tpu.matmul %402, %404, %cst_152 {dimension_numbers = #tpu.dot_dimension_numbers<[1], [0], [0], [1], [0, 0, 1, 1], [], []>} : vector<8x32xf32>, vector<32x32xf32>, vector<8x32xf32> -> vector<8x32xf32>
    %c1_153 = arith.constant 1 : index
    %c0_154 = arith.constant 0 : index
    %c0_155 = arith.constant 0 : index
    %406 = vector.load %arg11[%c1_153, %c0_154, %c0_155] : memref<2x1x32xf32, #tpu.memory_space<vmem>>, vector<1x1x32xf32>
    %407 = vector.shape_cast %406 : vector<1x1x32xf32> to vector<1x32xf32>
    %408 = vector.broadcast %407 : vector<1x32xf32> to vector<8x32xf32>
    %409 = arith.addf %405, %408 : vector<8x32xf32>
    %410 = vector.extract_strided_slice %12 {offsets = [0, 32], sizes = [8, 32], strides = [1, 1]} : vector<8x64xf32> to vector<8x32xf32>
    %411 = vector.extract_strided_slice %17 {offsets = [0, 128], sizes = [8, 128], strides = [1, 1]} : vector<8x256xf32> to vector<8x128xf32>
    %c1_156 = arith.constant 1 : index
    %c0_157 = arith.constant 0 : index
    %c0_158 = arith.constant 0 : index
    %412 = vector.load %arg16[%c1_156, %c0_157, %c0_158] : memref<2x1x32xf32, #tpu.memory_space<vmem>>, vector<1x1x32xf32>
    %413 = vector.shape_cast %412 : vector<1x1x32xf32> to vector<1x32xf32>
    %414 = vector.broadcast %413 : vector<1x32xf32> to vector<8x32xf32>
    %415 = arith.addf %379, %414 : vector<8x32xf32>
    %416 = vector.extract_strided_slice %409 {offsets = [0, 0], sizes = [8, 8], strides = [1, 1]} : vector<8x32xf32> to vector<8x8xf32>
    %417 = vector.extract_strided_slice %410 {offsets = [0, 0], sizes = [8, 8], strides = [1, 1]} : vector<8x32xf32> to vector<8x8xf32>
    %cst_159 = arith.constant dense<0.000000e+00> : vector<8x8xf32>
    %418 = tpu.matmul %416, %417, %cst_159 {dimension_numbers = #tpu.dot_dimension_numbers<[1], [1], [0], [0], [0, 0, 1, 0], [], []>} : vector<8x8xf32>, vector<8x8xf32>, vector<8x8xf32> -> vector<8x8xf32>
    %419 = arith.addf %418, %7 : vector<8x8xf32>
    %cst_160 = arith.constant dense<0xFF800000> : vector<8xf32>
    %420 = vector.multi_reduction <maximumf>, %419, %cst_160 [1] : vector<8x8xf32> to vector<8xf32>
    %421 = vector.shape_cast %420 : vector<8xf32> to vector<8x1xf32>
    %422 = vector.broadcast %421 : vector<8x1xf32> to vector<8x8xf32>
    %423 = arith.subf %419, %422 : vector<8x8xf32>
    %424 = math.exp %423 : vector<8x8xf32>
    %cst_161 = arith.constant dense<0.000000e+00> : vector<8xf32>
    %425 = vector.multi_reduction <add>, %424, %cst_161 [1] : vector<8x8xf32> to vector<8xf32>
    %426 = vector.shape_cast %425 : vector<8xf32> to vector<8x1xf32>
    %427 = tpu.reciprocal %426 : vector<8x1xf32> -> vector<8x1xf32>
    %428 = vector.broadcast %427 : vector<8x1xf32> to vector<8x8xf32>
    %429 = arith.mulf %424, %428 : vector<8x8xf32>
    %430 = vector.extract_strided_slice %411 {offsets = [0, 0], sizes = [8, 32], strides = [1, 1]} : vector<8x128xf32> to vector<8x32xf32>
    %cst_162 = arith.constant dense<0.000000e+00> : vector<8x32xf32>
    %431 = tpu.matmul %429, %430, %cst_162 {dimension_numbers = #tpu.dot_dimension_numbers<[1], [0], [0], [1], [0, 0, 1, 1], [], []>} : vector<8x8xf32>, vector<8x32xf32>, vector<8x32xf32> -> vector<8x32xf32>
    %432 = arith.addf %415, %431 : vector<8x32xf32>
    %433 = vector.extract_strided_slice %409 {offsets = [0, 8], sizes = [8, 8], strides = [1, 1]} : vector<8x32xf32> to vector<8x8xf32>
    %434 = vector.extract_strided_slice %410 {offsets = [0, 8], sizes = [8, 8], strides = [1, 1]} : vector<8x32xf32> to vector<8x8xf32>
    %cst_163 = arith.constant dense<0.000000e+00> : vector<8x8xf32>
    %435 = tpu.matmul %433, %434, %cst_163 {dimension_numbers = #tpu.dot_dimension_numbers<[1], [1], [0], [0], [0, 0, 1, 0], [], []>} : vector<8x8xf32>, vector<8x8xf32>, vector<8x8xf32> -> vector<8x8xf32>
    %436 = arith.addf %435, %7 : vector<8x8xf32>
    %cst_164 = arith.constant dense<0xFF800000> : vector<8xf32>
    %437 = vector.multi_reduction <maximumf>, %436, %cst_164 [1] : vector<8x8xf32> to vector<8xf32>
    %438 = vector.shape_cast %437 : vector<8xf32> to vector<8x1xf32>
    %439 = vector.broadcast %438 : vector<8x1xf32> to vector<8x8xf32>
    %440 = arith.subf %436, %439 : vector<8x8xf32>
    %441 = math.exp %440 : vector<8x8xf32>
    %cst_165 = arith.constant dense<0.000000e+00> : vector<8xf32>
    %442 = vector.multi_reduction <add>, %441, %cst_165 [1] : vector<8x8xf32> to vector<8xf32>
    %443 = vector.shape_cast %442 : vector<8xf32> to vector<8x1xf32>
    %444 = tpu.reciprocal %443 : vector<8x1xf32> -> vector<8x1xf32>
    %445 = vector.broadcast %444 : vector<8x1xf32> to vector<8x8xf32>
    %446 = arith.mulf %441, %445 : vector<8x8xf32>
    %447 = vector.extract_strided_slice %411 {offsets = [0, 32], sizes = [8, 32], strides = [1, 1]} : vector<8x128xf32> to vector<8x32xf32>
    %cst_166 = arith.constant dense<0.000000e+00> : vector<8x32xf32>
    %448 = tpu.matmul %446, %447, %cst_166 {dimension_numbers = #tpu.dot_dimension_numbers<[1], [0], [0], [1], [0, 0, 1, 1], [], []>} : vector<8x8xf32>, vector<8x32xf32>, vector<8x32xf32> -> vector<8x32xf32>
    %449 = arith.addf %432, %448 : vector<8x32xf32>
    %450 = vector.extract_strided_slice %409 {offsets = [0, 16], sizes = [8, 8], strides = [1, 1]} : vector<8x32xf32> to vector<8x8xf32>
    %451 = vector.extract_strided_slice %410 {offsets = [0, 16], sizes = [8, 8], strides = [1, 1]} : vector<8x32xf32> to vector<8x8xf32>
    %cst_167 = arith.constant dense<0.000000e+00> : vector<8x8xf32>
    %452 = tpu.matmul %450, %451, %cst_167 {dimension_numbers = #tpu.dot_dimension_numbers<[1], [1], [0], [0], [0, 0, 1, 0], [], []>} : vector<8x8xf32>, vector<8x8xf32>, vector<8x8xf32> -> vector<8x8xf32>
    %453 = arith.addf %452, %7 : vector<8x8xf32>
    %cst_168 = arith.constant dense<0xFF800000> : vector<8xf32>
    %454 = vector.multi_reduction <maximumf>, %453, %cst_168 [1] : vector<8x8xf32> to vector<8xf32>
    %455 = vector.shape_cast %454 : vector<8xf32> to vector<8x1xf32>
    %456 = vector.broadcast %455 : vector<8x1xf32> to vector<8x8xf32>
    %457 = arith.subf %453, %456 : vector<8x8xf32>
    %458 = math.exp %457 : vector<8x8xf32>
    %cst_169 = arith.constant dense<0.000000e+00> : vector<8xf32>
    %459 = vector.multi_reduction <add>, %458, %cst_169 [1] : vector<8x8xf32> to vector<8xf32>
    %460 = vector.shape_cast %459 : vector<8xf32> to vector<8x1xf32>
    %461 = tpu.reciprocal %460 : vector<8x1xf32> -> vector<8x1xf32>
    %462 = vector.broadcast %461 : vector<8x1xf32> to vector<8x8xf32>
    %463 = arith.mulf %458, %462 : vector<8x8xf32>
    %464 = vector.extract_strided_slice %411 {offsets = [0, 64], sizes = [8, 32], strides = [1, 1]} : vector<8x128xf32> to vector<8x32xf32>
    %cst_170 = arith.constant dense<0.000000e+00> : vector<8x32xf32>
    %465 = tpu.matmul %463, %464, %cst_170 {dimension_numbers = #tpu.dot_dimension_numbers<[1], [0], [0], [1], [0, 0, 1, 1], [], []>} : vector<8x8xf32>, vector<8x32xf32>, vector<8x32xf32> -> vector<8x32xf32>
    %466 = arith.addf %449, %465 : vector<8x32xf32>
    %467 = vector.extract_strided_slice %409 {offsets = [0, 24], sizes = [8, 8], strides = [1, 1]} : vector<8x32xf32> to vector<8x8xf32>
    %468 = vector.extract_strided_slice %410 {offsets = [0, 24], sizes = [8, 8], strides = [1, 1]} : vector<8x32xf32> to vector<8x8xf32>
    %cst_171 = arith.constant dense<0.000000e+00> : vector<8x8xf32>
    %469 = tpu.matmul %467, %468, %cst_171 {dimension_numbers = #tpu.dot_dimension_numbers<[1], [1], [0], [0], [0, 0, 1, 0], [], []>} : vector<8x8xf32>, vector<8x8xf32>, vector<8x8xf32> -> vector<8x8xf32>
    %470 = arith.addf %469, %7 : vector<8x8xf32>
    %cst_172 = arith.constant dense<0xFF800000> : vector<8xf32>
    %471 = vector.multi_reduction <maximumf>, %470, %cst_172 [1] : vector<8x8xf32> to vector<8xf32>
    %472 = vector.shape_cast %471 : vector<8xf32> to vector<8x1xf32>
    %473 = vector.broadcast %472 : vector<8x1xf32> to vector<8x8xf32>
    %474 = arith.subf %470, %473 : vector<8x8xf32>
    %475 = math.exp %474 : vector<8x8xf32>
    %cst_173 = arith.constant dense<0.000000e+00> : vector<8xf32>
    %476 = vector.multi_reduction <add>, %475, %cst_173 [1] : vector<8x8xf32> to vector<8xf32>
    %477 = vector.shape_cast %476 : vector<8xf32> to vector<8x1xf32>
    %478 = tpu.reciprocal %477 : vector<8x1xf32> -> vector<8x1xf32>
    %479 = vector.broadcast %478 : vector<8x1xf32> to vector<8x8xf32>
    %480 = arith.mulf %475, %479 : vector<8x8xf32>
    %481 = vector.extract_strided_slice %411 {offsets = [0, 96], sizes = [8, 32], strides = [1, 1]} : vector<8x128xf32> to vector<8x32xf32>
    %cst_174 = arith.constant dense<0.000000e+00> : vector<8x32xf32>
    %482 = tpu.matmul %480, %481, %cst_174 {dimension_numbers = #tpu.dot_dimension_numbers<[1], [0], [0], [1], [0, 0, 1, 1], [], []>} : vector<8x8xf32>, vector<8x32xf32>, vector<8x32xf32> -> vector<8x32xf32>
    %483 = arith.addf %466, %482 : vector<8x32xf32>
    %484 = vector.extract_strided_slice %272 {offsets = [2, 0], sizes = [1, 32], strides = [1, 1]} : vector<3x32xf32> to vector<1x32xf32>
    %485 = vector.extract_strided_slice %274 {offsets = [2, 0], sizes = [1, 32], strides = [1, 1]} : vector<3x32xf32> to vector<1x32xf32>
    %cst_175 = arith.constant dense<0.000000e+00> : vector<8xf32>
    %486 = vector.multi_reduction <add>, %483, %cst_175 [1] : vector<8x32xf32> to vector<8xf32>
    %487 = vector.shape_cast %486 : vector<8xf32> to vector<8x1xf32>
    %cst_176 = arith.constant 3.200000e+01 : f32
    %488 = vector.broadcast %cst_176 : f32 to vector<8x1xf32>
    %489 = arith.divf %487, %488 : vector<8x1xf32>
    %490 = vector.broadcast %489 : vector<8x1xf32> to vector<8x32xf32>
    %491 = arith.subf %483, %490 : vector<8x32xf32>
    %492 = arith.mulf %491, %491 : vector<8x32xf32>
    %cst_177 = arith.constant dense<0.000000e+00> : vector<8xf32>
    %493 = vector.multi_reduction <add>, %492, %cst_177 [1] : vector<8x32xf32> to vector<8xf32>
    %494 = vector.shape_cast %493 : vector<8xf32> to vector<8x1xf32>
    %cst_178 = arith.constant 0.0322580636 : f32
    %495 = vector.broadcast %cst_178 : f32 to vector<8x1xf32>
    %496 = arith.mulf %494, %495 : vector<8x1xf32>
    %497 = math.sqrt %496 : vector<8x1xf32>
    %cst_179 = arith.constant 9.99999997E-7 : f32
    %498 = vector.broadcast %cst_179 : f32 to vector<8x1xf32>
    %499 = arith.addf %497, %498 : vector<8x1xf32>
    %500 = tpu.reciprocal %499 : vector<8x1xf32> -> vector<8x1xf32>
    %501 = vector.broadcast %500 : vector<8x1xf32> to vector<8x32xf32>
    %502 = arith.mulf %491, %501 : vector<8x32xf32>
    %503 = vector.broadcast %484 : vector<1x32xf32> to vector<8x32xf32>
    %504 = arith.mulf %503, %502 : vector<8x32xf32>
    %505 = vector.broadcast %485 : vector<1x32xf32> to vector<8x32xf32>
    %506 = arith.addf %504, %505 : vector<8x32xf32>
    %c1_180 = arith.constant 1 : index
    %c0_181 = arith.constant 0 : index
    %c0_182 = arith.constant 0 : index
    %507 = vector.load %arg17[%c1_180, %c0_181, %c0_182] : memref<2x32x64xf32, #tpu.memory_space<vmem>>, vector<1x32x64xf32>
    %508 = vector.shape_cast %507 : vector<1x32x64xf32> to vector<32x64xf32>
    %cst_183 = arith.constant dense<0.000000e+00> : vector<8x64xf32>
    %509 = tpu.matmul %506, %508, %cst_183 {dimension_numbers = #tpu.dot_dimension_numbers<[1], [0], [0], [1], [0, 0, 1, 1], [], []>} : vector<8x32xf32>, vector<32x64xf32>, vector<8x64xf32> -> vector<8x64xf32>
    %c1_184 = arith.constant 1 : index
    %c0_185 = arith.constant 0 : index
    %c0_186 = arith.constant 0 : index
    %510 = vector.load %arg18[%c1_184, %c0_185, %c0_186] : memref<2x1x64xf32, #tpu.memory_space<vmem>>, vector<1x1x64xf32>
    %511 = vector.shape_cast %510 : vector<1x1x64xf32> to vector<1x64xf32>
    %512 = vector.broadcast %511 : vector<1x64xf32> to vector<8x64xf32>
    %513 = arith.addf %509, %512 : vector<8x64xf32>
    %cst_187 = arith.constant 0.000000e+00 : f32
    %514 = vector.broadcast %cst_187 : f32 to vector<8x64xf32>
    %515 = arith.maximumf %513, %514 : vector<8x64xf32>
    %c1_188 = arith.constant 1 : index
    %c0_189 = arith.constant 0 : index
    %c0_190 = arith.constant 0 : index
    %516 = vector.load %arg19[%c1_188, %c0_189, %c0_190] : memref<2x64x32xf32, #tpu.memory_space<vmem>>, vector<1x64x32xf32>
    %517 = vector.shape_cast %516 : vector<1x64x32xf32> to vector<64x32xf32>
    %cst_191 = arith.constant dense<0.000000e+00> : vector<8x32xf32>
    %518 = tpu.matmul %515, %517, %cst_191 {dimension_numbers = #tpu.dot_dimension_numbers<[1], [0], [0], [1], [0, 0, 1, 1], [], []>} : vector<8x64xf32>, vector<64x32xf32>, vector<8x32xf32> -> vector<8x32xf32>
    %519 = arith.addf %483, %518 : vector<8x32xf32>
    %c1_192 = arith.constant 1 : index
    %c0_193 = arith.constant 0 : index
    %c0_194 = arith.constant 0 : index
    %520 = vector.load %arg20[%c1_192, %c0_193, %c0_194] : memref<2x1x32xf32, #tpu.memory_space<vmem>>, vector<1x1x32xf32>
    %521 = vector.shape_cast %520 : vector<1x1x32xf32> to vector<1x32xf32>
    %522 = vector.broadcast %521 : vector<1x32xf32> to vector<8x32xf32>
    %523 = arith.addf %519, %522 : vector<8x32xf32>
    %c0_195 = arith.constant 0 : index
    %c0_196 = arith.constant 0 : index
    %524 = vector.load %arg21[%c0_195, %c0_196] : memref<1x32xf32, #tpu.memory_space<vmem>>, vector<1x32xf32>
    %c0_197 = arith.constant 0 : index
    %c0_198 = arith.constant 0 : index
    %525 = vector.load %arg22[%c0_197, %c0_198] : memref<1x32xf32, #tpu.memory_space<vmem>>, vector<1x32xf32>
    %cst_199 = arith.constant dense<0.000000e+00> : vector<8xf32>
    %526 = vector.multi_reduction <add>, %523, %cst_199 [1] : vector<8x32xf32> to vector<8xf32>
    %527 = vector.shape_cast %526 : vector<8xf32> to vector<8x1xf32>
    %cst_200 = arith.constant 3.200000e+01 : f32
    %528 = vector.broadcast %cst_200 : f32 to vector<8x1xf32>
    %529 = arith.divf %527, %528 : vector<8x1xf32>
    %530 = vector.broadcast %529 : vector<8x1xf32> to vector<8x32xf32>
    %531 = arith.subf %523, %530 : vector<8x32xf32>
    %532 = arith.mulf %531, %531 : vector<8x32xf32>
    %cst_201 = arith.constant dense<0.000000e+00> : vector<8xf32>
    %533 = vector.multi_reduction <add>, %532, %cst_201 [1] : vector<8x32xf32> to vector<8xf32>
    %534 = vector.shape_cast %533 : vector<8xf32> to vector<8x1xf32>
    %cst_202 = arith.constant 0.0322580636 : f32
    %535 = vector.broadcast %cst_202 : f32 to vector<8x1xf32>
    %536 = arith.mulf %534, %535 : vector<8x1xf32>
    %537 = math.sqrt %536 : vector<8x1xf32>
    %cst_203 = arith.constant 9.99999997E-7 : f32
    %538 = vector.broadcast %cst_203 : f32 to vector<8x1xf32>
    %539 = arith.addf %537, %538 : vector<8x1xf32>
    %540 = tpu.reciprocal %539 : vector<8x1xf32> -> vector<8x1xf32>
    %541 = vector.broadcast %540 : vector<8x1xf32> to vector<8x32xf32>
    %542 = arith.mulf %531, %541 : vector<8x32xf32>
    %543 = vector.broadcast %524 : vector<1x32xf32> to vector<8x32xf32>
    %544 = arith.mulf %543, %542 : vector<8x32xf32>
    %545 = vector.broadcast %525 : vector<1x32xf32> to vector<8x32xf32>
    %546 = arith.addf %544, %545 : vector<8x32xf32>
    %c0_204 = arith.constant 0 : index
    %c0_205 = arith.constant 0 : index
    %c0_206 = arith.constant 0 : index
    %547 = vector.load %arg23[%c0_204, %c0_205, %c0_206] : memref<1x8x32xf32, #tpu.memory_space<vmem>>, vector<1x8x32xf32>
    %548 = vector.shape_cast %547 : vector<1x8x32xf32> to vector<8x32xf32>
    %549 = vector.shape_cast %546 : vector<8x32xf32> to vector<1x8x32xf32>
    tpu.vector_store %arg23[%c0_204, %c0_205, %c0_206], %549 {strides = array<i32>} : memref<1x8x32xf32, #tpu.memory_space<vmem>>, vector<1x8x32xf32>,
    return
  }
  func.func @transform_0(%arg0: i32) -> (i32, i32, i32) {
    %c0_i32 = arith.constant 0 : i32
    %c0_i32_0 = arith.constant 0 : i32
    %c0_i32_1 = arith.constant 0 : i32
    return %arg0, %c0_i32, %c0_i32_0 : i32, i32, i32
  }
  func.func @transform_1(%arg0: i32) -> (i32, i32, i32) {
    %c0_i32 = arith.constant 0 : i32
    %c0_i32_0 = arith.constant 0 : i32
    %c0_i32_1 = arith.constant 0 : i32
    return %arg0, %c0_i32, %c0_i32_0 : i32, i32, i32
  }
  func.func @transform_2(%arg0: i32) -> (i32, i32, i32) {
    %c0_i32 = arith.constant 0 : i32
    %c0_i32_0 = arith.constant 0 : i32
    %c0_i32_1 = arith.constant 0 : i32
    return %arg0, %c0_i32, %c0_i32_0 : i32, i32, i32
  }
  func.func @transform_3(%arg0: i32) -> (i32, i32, i32) {
    %c0_i32 = arith.constant 0 : i32
    %c0_i32_0 = arith.constant 0 : i32
    %c0_i32_1 = arith.constant 0 : i32
    return %arg0, %c0_i32, %c0_i32_0 : i32, i32, i32
  }
  func.func @transform_4(%arg0: i32) -> (i32, i32, i32) {
    %c0_i32 = arith.constant 0 : i32
    %c0_i32_0 = arith.constant 0 : i32
    %c0_i32_1 = arith.constant 0 : i32
    %c0_i32_2 = arith.constant 0 : i32
    return %c0_i32, %c0_i32_0, %c0_i32_1 : i32, i32, i32
  }
  func.func @transform_5(%arg0: i32) -> (i32, i32, i32) {
    %c0_i32 = arith.constant 0 : i32
    %c0_i32_0 = arith.constant 0 : i32
    %c0_i32_1 = arith.constant 0 : i32
    %c0_i32_2 = arith.constant 0 : i32
    return %c0_i32, %c0_i32_0, %c0_i32_1 : i32, i32, i32
  }
  func.func @transform_6(%arg0: i32) -> (i32, i32, i32) {
    %c0_i32 = arith.constant 0 : i32
    %c0_i32_0 = arith.constant 0 : i32
    %c0_i32_1 = arith.constant 0 : i32
    %c0_i32_2 = arith.constant 0 : i32
    return %c0_i32, %c0_i32_0, %c0_i32_1 : i32, i32, i32
  }
  func.func @transform_7(%arg0: i32) -> (i32, i32, i32) {
    %c0_i32 = arith.constant 0 : i32
    %c0_i32_0 = arith.constant 0 : i32
    %c0_i32_1 = arith.constant 0 : i32
    %c0_i32_2 = arith.constant 0 : i32
    return %c0_i32, %c0_i32_0, %c0_i32_1 : i32, i32, i32
  }
  func.func @transform_8(%arg0: i32) -> (i32, i32, i32) {
    %c0_i32 = arith.constant 0 : i32
    %c0_i32_0 = arith.constant 0 : i32
    %c0_i32_1 = arith.constant 0 : i32
    %c0_i32_2 = arith.constant 0 : i32
    return %c0_i32, %c0_i32_0, %c0_i32_1 : i32, i32, i32
  }
  func.func @transform_9(%arg0: i32) -> (i32, i32, i32) {
    %c0_i32 = arith.constant 0 : i32
    %c0_i32_0 = arith.constant 0 : i32
    %c0_i32_1 = arith.constant 0 : i32
    %c0_i32_2 = arith.constant 0 : i32
    return %c0_i32, %c0_i32_0, %c0_i32_1 : i32, i32, i32
  }
  func.func @transform_10(%arg0: i32) -> (i32, i32, i32) {
    %c0_i32 = arith.constant 0 : i32
    %c0_i32_0 = arith.constant 0 : i32
    %c0_i32_1 = arith.constant 0 : i32
    %c0_i32_2 = arith.constant 0 : i32
    return %c0_i32, %c0_i32_0, %c0_i32_1 : i32, i32, i32
  }
  func.func @transform_11(%arg0: i32) -> (i32, i32) {
    %c0_i32 = arith.constant 0 : i32
    %c0_i32_0 = arith.constant 0 : i32
    %c0_i32_1 = arith.constant 0 : i32
    return %c0_i32, %c0_i32_0 : i32, i32
  }
  func.func @transform_12(%arg0: i32) -> (i32, i32) {
    %c0_i32 = arith.constant 0 : i32
    %c0_i32_0 = arith.constant 0 : i32
    %c0_i32_1 = arith.constant 0 : i32
    return %c0_i32, %c0_i32_0 : i32, i32
  }
  func.func @transform_13(%arg0: i32) -> (i32, i32) {
    %c0_i32 = arith.constant 0 : i32
    %c0_i32_0 = arith.constant 0 : i32
    %c0_i32_1 = arith.constant 0 : i32
    return %c0_i32, %c0_i32_0 : i32, i32
  }
  func.func @transform_14(%arg0: i32) -> (i32, i32) {
    %c0_i32 = arith.constant 0 : i32
    %c0_i32_0 = arith.constant 0 : i32
    %c0_i32_1 = arith.constant 0 : i32
    return %c0_i32, %c0_i32_0 : i32, i32
  }
  func.func @transform_15(%arg0: i32) -> (i32, i32, i32) {
    %c0_i32 = arith.constant 0 : i32
    %c0_i32_0 = arith.constant 0 : i32
    %c0_i32_1 = arith.constant 0 : i32
    %c0_i32_2 = arith.constant 0 : i32
    return %c0_i32, %c0_i32_0, %c0_i32_1 : i32, i32, i32
  }
  func.func @transform_16(%arg0: i32) -> (i32, i32, i32) {
    %c0_i32 = arith.constant 0 : i32
    %c0_i32_0 = arith.constant 0 : i32
    %c0_i32_1 = arith.constant 0 : i32
    %c0_i32_2 = arith.constant 0 : i32
    return %c0_i32, %c0_i32_0, %c0_i32_1 : i32, i32, i32
  }
  func.func @transform_17(%arg0: i32) -> (i32, i32, i32) {
    %c0_i32 = arith.constant 0 : i32
    %c0_i32_0 = arith.constant 0 : i32
    %c0_i32_1 = arith.constant 0 : i32
    %c0_i32_2 = arith.constant 0 : i32
    return %c0_i32, %c0_i32_0, %c0_i32_1 : i32, i32, i32
  }
  func.func @transform_18(%arg0: i32) -> (i32, i32, i32) {
    %c0_i32 = arith.constant 0 : i32
    %c0_i32_0 = arith.constant 0 : i32
    %c0_i32_1 = arith.constant 0 : i32
    %c0_i32_2 = arith.constant 0 : i32
    return %c0_i32, %c0_i32_0, %c0_i32_1 : i32, i32, i32
  }
  func.func @transform_19(%arg0: i32) -> (i32, i32, i32) {
    %c0_i32 = arith.constant 0 : i32
    %c0_i32_0 = arith.constant 0 : i32
    %c0_i32_1 = arith.constant 0 : i32
    %c0_i32_2 = arith.constant 0 : i32
    return %c0_i32, %c0_i32_0, %c0_i32_1 : i32, i32, i32
  }
  func.func @transform_20(%arg0: i32) -> (i32, i32) {
    %c0_i32 = arith.constant 0 : i32
    %c0_i32_0 = arith.constant 0 : i32
    %c0_i32_1 = arith.constant 0 : i32
    return %c0_i32, %c0_i32_0 : i32, i32
  }
  func.func @transform_21(%arg0: i32) -> (i32, i32) {
    %c0_i32 = arith.constant 0 : i32
    %c0_i32_0 = arith.constant 0 : i32
    %c0_i32_1 = arith.constant 0 : i32
    return %c0_i32, %c0_i32_0 : i32, i32
  }
  func.func @transform_22(%arg0: i32) -> (i32, i32, i32) {
    %c0_i32 = arith.constant 0 : i32
    %c0_i32_0 = arith.constant 0 : i32
    %c0_i32_1 = arith.constant 0 : i32
    return %arg0, %c0_i32, %c0_i32_0 : i32, i32, i32
  }
}

</mosaic_0001>

<bundles_post_ra>
// kernel: twoway_forward.1
= control target key start
LH: loop header
LB: loop body
LE: loop exit
PB: predicated region body
PF: predicated region fallthrough
CT: control target
= control target key end

     0   :  { %s6349_s0 = inlined_call_operand.vmem [shape: f32[2,8,32], index: 0, kind: input, shape index: {}]   ;;  %s6350_s1 = inlined_call_operand.vmem [shape: f32[2,8,32], index: 1, kind: input, shape index: {}]   ;;  %s6351_s2 = inlined_call_operand.vmem [shape: f32[2,8,8], index: 2, kind: input, shape index: {}]   ;;  %s6352_s3 = inlined_call_operand.vmem [shape: f32[2,8,8], index: 3, kind: input, shape index: {}]   ;;  %s6353_s4 = inlined_call_operand.vmem [shape: f32[2,3,32], index: 4, kind: input, shape index: {}]   ;;  %s6354_s5 = inlined_call_operand.vmem [shape: f32[2,3,32], index: 5, kind: input, shape index: {}]   ;;  %s6355_s6 = inlined_call_operand.vmem [shape: f32[2,32,192], index: 6, kind: input, shape index: {}]   ;;  %s6356_s7 = inlined_call_operand.vmem [shape: f32[2,1,192], index: 7, kind: input, shape index: {}]   ;;  %s6357_s8 = inlined_call_operand.vmem [shape: f32[2,1,32], index: 8, kind: input, shape index: {}]   ;;  %s6358_s9 = inlined_call_operand.vmem [shape: f32[2,32,32], index: 9, kind: input, shape index: {}]   ;;  %s6359_s10 = inlined_call_operand.vmem [shape: f32[2,1,32], index: 10, kind: input, shape index: {}]   ;;  %s6360_s11 = inlined_call_operand.vmem [shape: f32[32,64], index: 11, kind: input, shape index: {}]   ;;  %s6361_s12 = inlined_call_operand.vmem [shape: f32[1,64], index: 12, kind: input, shape index: {}]   ;;  %s6362_s13 = inlined_call_operand.vmem [shape: f32[32,256], index: 13, kind: input, shape index: {}]   ;;  %s6363_s14 = inlined_call_operand.vmem [shape: f32[1,256], index: 14, kind: input, shape index: {}]   ;;  %s6364_s15 = inlined_call_operand.vmem [shape: f32[2,1,32], index: 15, kind: input, shape index: {}]   ;;  %s6365_s16 = inlined_call_operand.vmem [shape: f32[2,32,64], index: 16, kind: input, shape index: {}]   ;;  %s6366_s17 = inlined_call_operand.vmem [shape: f32[2,1,64], index: 17, kind: input, shape index: {}]   ;;  %s6367_s18 = inlined_call_operand.vmem [shape: f32[2,64,32], index: 18, kind: input, shape index: {}]   ;;  %s6368_s19 = inlined_call_operand.vmem [shape: f32[2,1,32], index: 19, kind: input, shape index: {}]   ;;  %s6369_s20 = inlined_call_operand.vmem [shape: f32[1,32], index: 20, kind: input, shape index: {}]   ;;  %s6370_s21 = inlined_call_operand.vmem [shape: f32[1,32], index: 21, kind: input, shape index: {}]   ;;  %s6371_s22 = inlined_call_operand.hbm [shape: f32[2,8,32], index: 22, kind: output, shape index: {}]  }
   0x1   :  { %6400 = sst [smem:[#allocation11_spill]] %s6349_s0 }
   0x2   :  { %6401 = sst [smem:[#allocation12_spill]] %s6350_s1 }
   0x3   :  { %6402 = sst [smem:[#allocation13_spill]] %s6351_s2 }
   0x4   :  { %6403 = sst [smem:[#allocation14_spill]] %s6352_s3 }
   0x5   :  { %6404 = sst [smem:[#allocation15_spill]] %s6353_s4 }
   0x6   :  { %6405 = sst [smem:[#allocation16_spill]] %s6354_s5 }
   0x7   :  { %6406 = sst [smem:[#allocation17_spill]] %s6355_s6 }
   0x8   :  { %6407 = sst [smem:[#allocation18_spill]] %s6360_s11 }
   0x9   :  { %6408 = sst [smem:[#allocation19_spill]] %s6361_s12 }
   0xa   :  { %6409 = sst [smem:[#allocation20_spill]] %s6362_s13 }
   0xb   :  { %6410 = sst [smem:[#allocation21_spill]] %s6363_s14 }
   0xc   :  { %6411 = sst [smem:[#allocation22_spill]] %s6369_s20 }
   0xd   :  { %6412 = sst [smem:[#allocation23_spill]] %s6370_s21 }
   0xe   :  { %6413 = sst [smem:[#allocation24_spill]] %s6371_s22 }
   0xf   :  { %27 = vsyncpa [#allocation3], 0 }
  0x10   :  { %29 = vsyncpa [#allocation3 + $0x1], 0  ;;  %s5553_s3 = smov 0   ;;  %s5555_s28 = smov 0  }
  0x11   :  { %s5557_s29 = smov 0   ;;  %s5559_s30 = smov 0  }
  0x12 LB: > { %6414 = sst [smem:[#allocation5_spill]] %s5411_s3  ;;  %s5574_s4 = sadd.s32 4294967295, %s5423_s30   ;;  %s5423_s30 = sphi %s5559_s30, %s6450_s30   ;;  %s5419_s29 = sphi %s5557_s29, %s6452_s29   ;;  %s5415_s28 = sphi %s5555_s28, %s6454_s28   ;;  %s5411_s3 = sphi %s5553_s3, %s6453_s3  }
  0x13   : > { %6415 = sst [smem:[#allocation6_spill]] %s5419_s29  ;;  %s4636_s0 = sadd.s32 4294967294, %s5423_s30  }
  0x14   : > { %6416 = sst [smem:[#allocation7_spill]] %s5423_s30  ;;  %s5578_s23 = sadd.s32 1, %s5423_s30  }
  0x15   : > { %6417 = sst [smem:[#allocation8_spill]] %s5578_s23  ;;  %s524_s1 = sadd.s32 1, %s5419_s29 }
  0x16   : > { %s521_s5 = ssub.s32 %s5423_s30, %s5578_s23  ;;  %p534_p0 = scmp.ne.s32.totalorder %s5419_s29, %s5415_s28 }
  0x17   : > { %p522_p1 = scmp.eq.s32.totalorder %s521_s5, 0  ;;  %p535_p2 = scmp.eq.s32.totalorder %s5574_s4, 1 }
  0x18   : > { %p540_p3 = scmp.ne.s32.totalorder %s5415_s28, %s5411_s3  ;;  %p541_p4 = scmp.eq.s32.totalorder %s4636_s0, 1 }
  0x19   : > { %s5589_s24 = scalar_select %p522_p1, %s5419_s29, %s524_s1  }
  0x1a   : > { %p5591_p5 = por %p535_p2, %p534_p0  ;;  %p5595_p6 = por %p541_p4, %p540_p3 }
  0x1b   : > { %6418 = sst [smem:[#allocation9_spill]] %s5589_s24  ;;  %p4639_p7 = scmp.ge.s32.totalorder %s5423_s30, 1 }
  0x1c   : > { %s6420_s25 = scalar_select %p5595_p6, 1, 0 }
  0x1d   : > { %p641_p8 = scmp.lt.s32.totalorder %s5423_s30, 3 }
  0x1e   : > { %6421 = sst [smem:[#allocation10_spill]] %s6420_s25 }
  0x1f   : > { %p642_p9 = pnand %p4639_p7, %p641_p8 }
  0x20   : > { %p714_p10 = scmp.lt.s32.totalorder (!%p642_p9), %s5574_s4, 1  ;;  %vm745_vm0 = vcmask (!%p642_p9), 261120   ;;  %s6422_s1 = sld [smem:[#allocation11_spill]] (!%p642_p9)  ;;  %v5425_v13 = vmov (!%p642_p9), 0.0|0.0   ;;  %vm5426_vm1 = vmmov (!%p642_p9), 0   ;;  %v5427_v14 = vmov (!%p642_p9), 0.0  }
  0x21   : > { %645 = sbr.rel (%p642_p9) target bundleno = 7733 (0x1e35), region = 108  ;;  %s6423_s11 = sld [smem:[#allocation18_spill]] (!%p642_p9)  ;;  %5112 = vmatprep.subr.bf16.mxu0 (!%p642_p9), %v5425_v13  ;;  %4867 = vmatprep.mubr.msk.f32.mxu0 (!%p642_p9), %vm5426_vm1, %v5427_v14  ;;  %v829_v35 = vlaneseq (!%p642_p9)  ;;  %v5693_v49 = vld [vmem:[%s6356_s7] sm:$0x3] (!%p642_p9)  ;;  %vm1048_vm4 = vcmask (!%p642_p9), 64512   ;;  %vm2612_vm9 = vcmask (!%p642_p9), 523264  }
  0x22   : > { %s6424_s30 = sld [smem:[#allocation17_spill]] (!%p642_p9)  ;;  %903 = vmatprep.mubr.f32.mxu1 (!%p642_p9), %v5427_v14  ;;  %s6427_s27 = sld [smem:[#allocation15_spill]] (!%p642_p9) }
  0x23   : > { %v5666_v37 = vshrl.u32 (!%p642_p9), %v829_v35, 7  ;;  %s6392_s3 = smov (!%p642_p9), 120   ;;  %s6394_s29 = smov (!%p642_p9), 96  }
  0x24   : > { %s6384_s25 = smov (!%p642_p9), 80   ;;  %s6388_s0 = smov (!%p642_p9), 104  }
  0x25   : > { %v5669_v38 = vsub.s32 (!%p642_p9), 0, %v5666_v37  ;;  %s6430_s13 = sld [smem:[#allocation20_spill]] (!%p642_p9)  ;;  %s6432_s12 = sld [smem:[#allocation19_spill]] (!%p642_p9) }
  0x26   : > { %s6433_s14 = sld [smem:[#allocation21_spill]] (!%p642_p9)  ;;  %s6436_s24 = smov (!%p642_p9), 104  }
  0x27   : > { %v734_v7 = vld [vmem:[%s6423_s11] sm:$0xff] (!%p642_p9)  ;;  %v735_v8 = vld [vmem:[%s6423_s11 + $0x8] sm:$0xff] (!%p642_p9)  ;;  %v736_v10 = vld [vmem:[%s6423_s11 + $0x10] sm:$0xff] (!%p642_p9)  ;;  %v956_v50 = vrot.slane (!%p642_p9), %v5693_v49, %v5669_v38  ;;  %s6437_s21 = sld [smem:[#allocation14_spill]] (!%p642_p9)  ;;  %s4749_s20 = sshll.u32 (!%p642_p9), %s5574_s4, 7 }
  0x28   : > { %s715_s26 = scalar_select %p714_p10, %s5574_s4, 1  ;;  %v5113_v9 = vpack.c.bf16 %v735_v8, %v734_v7  ;;  %v737_v11 = vld [vmem:[%s6423_s11 + $0x18] sm:$0xff]  ;;  %v944_v12 = vld [vmem:[%s6424_s30 + $0x8] sm:$0xff]  ;;  %v5674_v39 = vld [vmem:[%s6427_s27] sm:$0x7] }
  0x29   : > { %s6425_s22 = smov %s6424_s30  ;;  %v5116_v16 = vpack.c.bf16 %v737_v11, %v736_v10  ;;  %s6426_s30 = sld [smem:[#allocation12_spill]]  ;;  %v936_v41 = vrot.slane %v5674_v39, %v5669_v38 }
  0x2a   : > { %s5603_s2 = sshll.u32 %s715_s26, 3  ;;  %v946_v15 = vld [vmem:[%s6425_s22 + $0x18] sm:$0xff]  ;;  %5114 = vmatpush3.bf16.msra.mxu0 %v5113_v9  ;;  %v943_v18 = vld [vmem:[%s6425_s22] sm:$0xff]  ;;  %v945_v19 = vld [vmem:[%s6425_s22 + $0x10] sm:$0xff]  ;;  %s6390_s11 = smov 112  }
  0x2b   : > { %s717_s5 = scalar_lea.vmem %s6422_s1, %s5603_s2  ;;  %5115 = vmatprep.subr.bf16.mxu0 %v5425_v13  ;;  %v5126_v17 = vpack.c.bf16 %v946_v15, %v944_v12  ;;  %v948_v20 = vld [vmem:[%s6425_s22 + $0x28] sm:$0xff]  ;;  %v950_v21 = vld [vmem:[%s6425_s22 + $0x38] sm:$0xff]  ;;  %v5128_v23 = vpack.c.bf16 %v945_v19, %v943_v18  ;;  %v947_v25 = vld [vmem:[%s6425_s22 + $0x20] sm:$0xff]  ;;  %s6429_s26 = sld [smem:[#allocation13_spill]] }
  0x2c   : > { %v5609_v0 = vld [vmem:[%s717_s5] sm:$0xff]  ;;  %v5130_v24 = vpack.c.bf16 %v950_v21, %v948_v20  ;;  %v949_v26 = vld [vmem:[%s6425_s22 + $0x30] sm:$0xff]  ;;  %s6428_s5 = sld [smem:[#allocation16_spill]]  ;;  %v822_v18 = vld [vmem:[%s6430_s13 + $0x18] sm:$0xff]  ;;  %s6435_s1 = smov 112  }
  0x2d   : > { %v912_v1 = vsel %vm745_vm0, %v5609_v0, 0.0  ;;  %v5132_v27 = vpack.c.bf16 %v949_v26, %v947_v25  ;;  %v819_v19 = vld [vmem:[%s6430_s13] sm:$0xff]  ;;  %v821_v21 = vld [vmem:[%s6430_s13 + $0x10] sm:$0xff]  ;;  %s5437_s4 = smov [#allocation2]  }
  0x2e   : > { %913 = vadd.xlane.f32.xlu0 %v912_v1  ;;  %5117 = vmatpush3.bf16.msra.mxu0 %v5116_v16  ;;  %v5120_v25 = vpack.c.bf16 %v821_v21, %v819_v19 }
  0x2f   : > { %s721_s23 = scalar_lea.vmem %s6426_s30, %s5603_s2  ;;  %5127 = vmatprep.subr.bf16.mxu0 %v5126_v17  ;;  %s6386_s30 = smov 88   ;;  %v820_v17 = vld [vmem:[%s6430_s13 + $0x8] sm:$0xff] }
  0x30   : > { %v5654_v22 = vld [vmem:[%s721_s23] sm:$0xff]  ;;  %s6382_s23 = smov 72   ;;  %v5118_v20 = vpack.c.bf16 %v822_v18, %v820_v17 }
  0x31   : > { %4868 = vmatmul.mubr.msk.f32.vlgmr.msra.gmra.mrb[0].mxu0 %vm745_vm0, %v5654_v22  ;;  %v4649_v18 = vld [vmem:[%s6357_s8] ss:$0 sm:$0xff] }
  0x32   : > { %5129 = vmatpush1.bf16.msra.mxu0 %v5128_v23  ;;  %1030 = vmatprep.mubr.f32.mxu0 %v5427_v14  ;;  %v5679_v40 = vld [vmem:[%s6428_s5] sm:$0x7]  ;;  %v824_v23 = vld [vmem:[%s6430_s13 + $0x28] sm:$0xff]  ;;  %v1044_v19 = vadd.f32 %v4649_v18, %v5609_v0 }
  0x33   : > { %5131 = vmatprep.subr.bf16.mxu0 %v5130_v24  ;;  %v941_v44 = vrot.slane %v5679_v40, %v5669_v38  ;;  %v826_v24 = vld [vmem:[%s6430_s13 + $0x38] sm:$0xff]  ;;  %5119 = vmatprep.subr.bf16.mxu1 %v5118_v20 }
  0x34   : > { %v5122_v26 = vpack.c.bf16 %v826_v24, %v824_v23  ;;  %5121 = vmatpush1.bf16.msra.mxu1 %v5120_v25 }
  0x36   : > { %5133 = vmatpush1.bf16.msra.mxu0 %v5132_v27  ;;  %5123 = vmatprep.subr.bf16.mxu1 %v5122_v26 }
  0x37   : > { %4870 = vmatprep.subr.mxu0 %v5427_v14 }
  0xbb   : > { %v914_v2 = vpop.xlane.xlu0 %913 }
  0xbc   : > { %v916_v3 = vmul.f32 0.03125, %v914_v2 }
  0xbe   : > { %v917_v4 = vsub.f32 %v5609_v0, %v916_v3  ;;  %v1737_v0 = vld [vmem:[%s6358_s9] sm:$0xff] }
  0xc0   : > { %v918_v5 = vmul.f32 %v917_v4, %v917_v4 }
  0xc2   : > { %v919_v6 = vsel %vm745_vm0, %v918_v5, 0.0 }
  0xc3   : > { %920 = vadd.xlane.f32.xlu0 %v919_v6 }
 0x104   : > { %v5688_v47 = vpop.f32.mrb[0].mxu0 }
 0x105   : > { %v4869_v48 = vpop.f32.mrb[1].mxu0 }
 0x150   : > { %v921_v28 = vpop.xlane.xlu0 %920 }
 0x151   : > { %v922_v29 = vmul.f32 0.032258064, %v921_v28 }
 0x153   : > { %5269 = vrsqrt.f32 %v922_v29  ;;  %vm925_vm2 = vcmp.eq.f32.partialorder %v922_v29, inf  ;;  %v928_v32 = vand.u32 2147483648, %v922_v29  ;;  %vm927_vm3 = vcmp.eq.f32.partialorder %v922_v29, 0.0 }
 0x15d   : > { %v5270_v30 = vpop.eup %5269 }
 0x15e   : > { %v924_v31 = vmul.f32 %v5270_v30, %v922_v29 }
 0x160   : > { %v926_v33 = vsel %vm925_vm2, %v922_v29, %v924_v31 }
 0x161   : > { %v929_v34 = vsel %vm927_vm3, %v928_v32, %v926_v33 }
 0x162   : > { %v930_v36 = vadd.f32 1e-06, %v929_v34 }
 0x164   : > { %5271 = vrcp.f32 %v930_v36 }
 0x16e   : > { %v5272_v42 = vpop.eup %5271 }
 0x16f   : > { %v932_v43 = vmul.f32 %v5272_v42, %v917_v4 }
 0x171   : > { %v937_v45 = vmul.f32 %v936_v41, %v932_v43 }
 0x173   : > { %v942_v46 = vadd.f32 %v941_v44, %v937_v45  ;;  %v823_v44 = vld [vmem:[%s6430_s13 + $0x20] sm:$0xff]  ;;  %v825_v45 = vld [vmem:[%s6430_s13 + $0x30] sm:$0xff]  ;;  %s6440_s13 = smov 80  }
 0x175   : > { %4648 = vmatmul.mubr.msk.f32.vlgmr.msra.gmra.mrb[2].mxu0 %vm745_vm0, %v942_v46  ;;  %v5124_v46 = vpack.c.bf16 %v825_v45, %v823_v44 }
 0x176   : > { %4872 = vmatprep.mubr.msk.f32.mxu0 %vm5426_vm1, %v5427_v14 }
 0x177   : > { %5125 = vmatpush1.bf16.msra.mxu1 %v5124_v46 }
 0x178   : > { %4875 = vmatprep.subr.mxu1 %v5427_v14 }
 0x17a   : > { %4647 = vmatmul.mubr.msk.f32.vlgmr.msra.gmra.mrb[0].mxu1 %vm745_vm0, %v5654_v22 }
 0x17b   : > { %4877 = vmatprep.mubr.msk.f32.mxu1 %vm5426_vm1, %v5427_v14 }
 0x248   : > { %v1032_v51 = vpop.f32.mrb[2].mxu0 }
 0x249   : > { %v5697_v52 = vadd.f32 %v1032_v51, %v956_v50  ;;  %v5699_v53 = vpop.f32.mrb[3].mxu0 }
 0x24b   : > { %1211 = vrot.lane.b32.xlu0 %v5697_v52, %s6392_s3  ;;  %1046 = vrot.lane.b32.xlu1 %v5697_v52, %s6394_s29  ;;  %s6434_s29 = smov 120   ;;  %s729_s3 = scalar_lea.vmem %s6437_s21, %s5603_s2 }
 0x24c   : > { %s6439_s21 = smov 88  }
 0x24f   : > { %1213 = vrot.lane.b32.xlu1 %v5697_v52, %s6386_s30  ;;  %s6445_s30 = sld [smem:[#allocation24_spill]] }
 0x253   : > { %1379 = vrot.lane.b32.xlu1 %v5697_v52, %s6384_s25  ;;  %s6398_s25 = smov 64  }
 0x257   : > { %1377 = vrot.lane.b32.xlu1 %v5697_v52, %s6390_s11  ;;  %s6396_s11 = smov 32  }
 0x25b   : > { %1542 = vrot.lane.b32.xlu1 %v5697_v52, %s6382_s23  ;;  %s725_s23 = scalar_lea.vmem %s6429_s26, %s5603_s2  ;;  %s6438_s2 = smov 32  }
 0x25c   : > { %v5740_v61 = vld [vmem:[%s725_s23] sm:$0xff] }
 0x25f   : > { %1540 = vrot.lane.b32.xlu1 %v5697_v52, %s6388_s0  ;;  %s6431_s0 = smov 96  }
 0x2bd   : > { %v1047_v54 = vpop.permute.xlu1 %1046  ;;  %v1212_v56 = vpop.permute.xlu0 %1211 }
 0x2be   : > { %4871 = vmatpush3.xpose.msk.msra.mxu0 %vm1048_vm4, %v1047_v54 }
 0x2bf   : > { %4880 = vmatprep.subr.mxu0 %v5427_v14 }
 0x2c1   : > { %4873 = vmatmul.mubr.msk.f32.vlgmr.msra.gmra.mrb[4].mxu0 %vm1048_vm4, %v5697_v52  ;;  %v1214_v55 = vpop.permute.xlu1 %1213 }
 0x2c2   : > { %4881 = vmatpush3.xpose.msk.msra.mxu0 %vm1048_vm4, %v1214_v55  ;;  %4882 = vmatprep.mubr.msk.f32.mxu0 %vm5426_vm1, %v5427_v14 }
 0x2c3   : > { %4890 = vmatprep.subr.mxu0 %v5427_v14 }
 0x2c5   : > { %4883 = vmatmul.mubr.msk.f32.vlgmr.msra.gmra.mrb[6].mxu0 %vm1048_vm4, %v1212_v56  ;;  %v1380_v57 = vpop.permute.xlu1 %1379 }
 0x2c6   : > { %4891 = vmatpush3.xpose.msk.msra.mxu0 %vm1048_vm4, %v1380_v57  ;;  %4892 = vmatprep.mubr.msk.f32.mxu0 %vm5426_vm1, %v5427_v14 }
 0x2c7   : > { %4900 = vmatprep.subr.mxu0 %v5427_v14 }
 0x2c9   : > { %v1378_v58 = vpop.permute.xlu1 %1377 }
 0x2ca   : > { %4893 = vmatmul.mubr.msk.f32.vlgmr.msra.gmra.mrb[8].mxu0 %vm1048_vm4, %v1378_v58  ;;  %v5788_v58 = vsub.s32 1, %v5666_v37 }
 0x2cb   : > { %4902 = vmatprep.mubr.msk.f32.mxu0 %vm5426_vm1, %v5427_v14 }
 0x2cc   : > { %v960_v22 = vrot.slane %v5693_v49, %v5788_v58 }
 0x2cd   : > { %v1543_v59 = vpop.permute.xlu1 %1542 }
 0x2ce   : > { %4901 = vmatpush3.xpose.msk.msra.mxu0 %vm1048_vm4, %v1543_v59  ;;  %v1035_v59 = vadd.f32 %v5699_v53, %v960_v22  ;;  %v4662_v22 = vld [vmem:[%s6359_s10] ss:$0 sm:$0xff] }
 0x2cf   : > { %5134 = vmatprep.subr.bf16.mxu0 %v5425_v13 }
 0x2d1   : > { %v1541_v60 = vpop.permute.xlu1 %1540 }
 0x2d2   : > { %4903 = vmatmul.mubr.msk.f32.vlgmr.msra.gmra.mrb[10].mxu0 %vm1048_vm4, %v1541_v60 }
 0x2d3   : > { %4918 = vmatprep.mubr.msk.f32.mxu0 %vm5426_vm1, %v5427_v14 }
 0x394   : > { %v1119_v62 = vpop.f32.mrb[4].mxu0 }
 0x395   : > { %v1120_v63 = vadd.f32 %v1119_v62, %v5740_v61  ;;  %v4874_v1 = vpop.f32.mrb[5].mxu0 }
 0x397   : > { %v1123_v2 = vsel %vm1048_vm4, %v1120_v63, -inf }
 0x398   : > { %1124 = vmax.xlane.f32.xlu1 %v1123_v2  ;;  %v1285_v3 = vpop.f32.mrb[6].mxu0 }
 0x399   : > { %v1286_v4 = vadd.f32 %v1285_v3, %v5740_v61  ;;  %v4884_v5 = vpop.f32.mrb[7].mxu0 }
 0x39b   : > { %v1289_v6 = vsel %vm1048_vm4, %v1286_v4, -inf }
 0x39c   : > { %1290 = vmax.xlane.f32.xlu0 %v1289_v6 }
 0x39d   : > { %v1451_v7 = vpop.f32.mrb[8].mxu0 }
 0x39e   : > { %v1452_v8 = vadd.f32 %v1451_v7, %v5740_v61  ;;  %v4894_v9 = vpop.f32.mrb[9].mxu0 }
 0x39f   : > { %v4645_v9 = vld [vmem:[%s6432_s12] ss:$0 sm:$0xff] }
 0x3a0   : > { %v1455_v10 = vsel %vm1048_vm4, %v1452_v8, -inf }
 0x3a1   : > { %1456 = vmax.xlane.f32.xlu1 %v1455_v10 }
 0x3a5   : > { %v1614_v11 = vpop.f32.mrb[10].mxu0 }
 0x3a6   : > { %v1615_v12 = vadd.f32 %v1614_v11, %v5740_v61  ;;  %v4904_v15 = vpop.f32.mrb[11].mxu0  ;;  %v5811_v11 = vadd.f32 %v4645_v9, %v5688_v47 }
 0x3a8   : > { %v1618_v16 = vsel %vm1048_vm4, %v1615_v12, -inf }
 0x3a9   : > { %1619 = vmax.xlane.f32.xlu0 %v1618_v16  ;;  %v905_v16 = vpop.f32.mrb[0].mxu1 }
 0x3aa   : > { %v907_v17 = vpop.f32.mrb[1].mxu1 }
 0x425   : > { %v1125_v27 = vpop.xlane.xlu1 %1124 }
 0x426   : > { %v1126_v28 = vsub.f32 %v1120_v63, %v1125_v27 }
 0x428   : > { %v1127_v29 = vmul.f32 1.442695, %v1126_v28 }
 0x429   : > { %v1291_v30 = vpop.xlane.xlu0 %1290 }
 0x42a   : > { %5273 = vpow2.f32 %v1127_v29  ;;  %v1292_v31 = vsub.f32 %v1286_v4, %v1291_v30  ;;  %v1738_v30 = vld [vmem:[%s6358_s9 + $0x8] sm:$0xff] }
 0x42c   : > { %v1293_v32 = vmul.f32 1.442695, %v1292_v31  ;;  %v1739_v31 = vld [vmem:[%s6358_s9 + $0x10] sm:$0xff] }
 0x42e   : > { %5275 = vpow2.f32 %v1293_v32  ;;  %v1457_v51 = vpop.xlane.xlu1 %1456  ;;  %v5135_v32 = vpack.c.bf16 %v1738_v30, %v1737_v0 }
 0x42f   : > { %v1458_v54 = vsub.f32 %v1452_v8, %v1457_v51 }
 0x430   : > { %5136 = vmatpush3.bf16.msra.mxu0 %v5135_v32 }
 0x431   : > { %v1459_v55 = vmul.f32 1.442695, %v1458_v54  ;;  %5137 = vmatprep.subr.bf16.mxu0 %v5425_v13  ;;  %v1735_v54 = vrot.slane %v5679_v40, %v5788_v58 }
 0x434   : > { %v5274_v33 = vpop.eup %5273 }
 0x435   : > { %v1129_v34 = vsel %vm1048_vm4, %v5274_v33, 0.0 }
 0x436   : > { %v1620_v35 = vpop.xlane.xlu0 %1619  ;;  %1130 = vadd.xlane.f32.xlu1 %v1129_v34 }
 0x437   : > { %v1621_v36 = vsub.f32 %v1615_v12, %v1620_v35  ;;  %v827_v12 = vld [vmem:[%s6433_s14] sm:$0x3]  ;;  %s6306_s14 = scalar_lea.hbm %s6445_s30, %s4749_s20 }
 0x438   : > { %v5276_v41 = vpop.eup %5275  ;;  %v836_v15 = vrot.slane %v827_v12, %v5788_v58 }
 0x439   : > { %v1622_v42 = vmul.f32 1.442695, %v1621_v36  ;;  %v1295_v43 = vsel %vm1048_vm4, %v5276_v41, 0.0 }
 0x43a   : > { %1296 = vadd.xlane.f32.xlu0 %v1295_v43  ;;  %v5823_v47 = vadd.f32 %v907_v17, %v836_v15 }
 0x43b   : > { %5277 = vpow2.f32 %v1622_v42 }
 0x43c   : > { %5279 = vpow2.f32 %v1459_v55 }
 0x445   : > { %v5278_v48 = vpop.eup %5277 }
 0x446   : > { %v1624_v50 = vsel %vm1048_vm4, %v5278_v48, 0.0  ;;  %v5280_v56 = vpop.eup %5279 }
 0x447   : > { %1625 = vadd.xlane.f32.xlu0 %v1624_v50  ;;  %1134 = vrot.lane.b32.xlu1 %v5697_v52, %s6398_s25  ;;  %v1461_v57 = vsel %vm1048_vm4, %v5280_v56, 0.0 }
 0x45d   : > { %1300 = vrot.lane.b32.xlu0 %v5697_v52, %s6396_s11  ;;  %s6442_s11 = smov 64  }
 0x46b   : > { %1462 = vadd.xlane.f32.xlu1 %v1461_v57 }
 0x47c   : > { %1630 = vrot.lane.b32.xlu1 %v1035_v59, %s6431_s0 }
 0x4c3   : > { %v1131_v60 = vpop.xlane.xlu1 %1130 }
 0x4c4   : > { %5281 = vrcp.f32 %v1131_v60 }
 0x4c7   : > { %v1135_v62 = vpop.permute.xlu1 %1134  ;;  %v1297_v63 = vpop.xlane.xlu0 %1296 }
 0x4c8   : > { %4876 = vmatpush3.msra.mxu1 %v1135_v62  ;;  %5283 = vrcp.f32 %v1297_v63 }
 0x4c9   : > { %4885 = vmatprep.subr.mxu1 %v5427_v14 }
 0x4ce   : > { %v5282_v52 = vpop.eup %5281 }
 0x4cf   : > { %v1133_v1 = vmul.f32 %v5282_v52, %v5274_v33  ;;  %v1740_v33 = vld [vmem:[%s6358_s9 + $0x18] sm:$0xff] }
 0x4d0   : > { %v5138_v34 = vpack.c.bf16 %v1740_v33, %v1739_v31 }
 0x4d1   : > { %4878 = vmatmul.mubr.msk.f32.vlgmr.msra.gmra.mrb[2].mxu1 %vm1048_vm4, %v1133_v1 }
 0x4d2   : > { %4887 = vmatprep.mubr.msk.f32.mxu1 %vm5426_vm1, %v5427_v14  ;;  %v5284_v2 = vpop.eup %5283  ;;  %5139 = vmatpush3.bf16.msra.mxu0 %v5138_v34 }
 0x4d3   : > { %v1299_v53 = vmul.f32 %v5284_v2, %v5276_v41  ;;  %4931 = vmatprep.subr.mxu0 %v5427_v14 }
 0x4d4   : > { %v1626_v49 = vpop.xlane.xlu0 %1625 }
 0x4d8   : > { %v1301_v3 = vpop.permute.xlu0 %1300 }
 0x4d9   : > { %4886 = vmatpush3.msra.mxu1 %v1301_v3 }
 0x4da   : > { %4888 = vmatmul.mubr.msk.f32.vlgmr.msra.gmra.mrb[2].mxu1 %vm1048_vm4, %v1299_v53  ;;  %4895 = vmatprep.subr.mxu1 %v5427_v14 }
 0x4db   : > { %4896 = vmatpush3.msra.mxu1 %v1035_v59  ;;  %4897 = vmatprep.mubr.msk.f32.mxu1 %vm5426_vm1, %v5427_v14  ;;  %v832_v59 = vrot.slane %v827_v12, %v5669_v38 }
 0x4dc   : > { %4905 = vmatprep.subr.mxu1 %v5427_v14 }
 0x4dd   : > { %v5864_v52 = vadd.f32 %v905_v16, %v832_v59 }
 0x4f8   : > { %v1463_v4 = vpop.xlane.xlu1 %1462 }
 0x4f9   : > { %5285 = vrcp.f32 %v1463_v4  ;;  %v5895_v4 = vld [vmem:[%s729_s3] sm:$0xff]  ;;  %s6441_s3 = smov 72  }
 0x4fa   : > { %5287 = vrcp.f32 %v1626_v49 }
 0x4fc   : > { %v1631_v7 = vpop.permute.xlu1 %1630 }
 0x503   : > { %v5286_v5 = vpop.eup %5285 }
 0x504   : > { %v1465_v6 = vmul.f32 %v5286_v5, %v5280_v56  ;;  %v5288_v8 = vpop.eup %5287 }
 0x505   : > { %v1628_v10 = vmul.f32 %v5288_v8, %v5278_v48  ;;  %v1730_v48 = vrot.slane %v5674_v39, %v5788_v58 }
 0x506   : > { %4898 = vmatmul.mubr.msk.f32.vlgmr.msra.gmra.mrb[2].mxu1 %vm1048_vm4, %v1465_v6 }
 0x507   : > { %4906 = vmatpush3.msra.mxu1 %v1631_v7  ;;  %4907 = vmatprep.mubr.msk.f32.mxu1 %vm5426_vm1, %v5427_v14 }
 0x508   : > { %4921 = vmatprep.subr.mxu1 %v5427_v14 }
 0x50e   : > { %4908 = vmatmul.mubr.msk.f32.vlgmr.msra.gmra.mrb[2].mxu1 %vm1048_vm4, %v1628_v10 }
 0x50f   : > { %4922 = vmatpush3.xpose.msk.msra.mxu1 %vm1048_vm4, %v5811_v11  ;;  %4923 = vmatprep.mubr.msk.f32.mxu1 %vm5426_vm1, %v5427_v14 }
 0x510   : > { %4926 = vmatprep.subr.mxu1 %v5427_v14 }
 0x5e1   : > { %v1702_v20 = vpop.f32.mrb[2].mxu1 }
 0x5e2   : > { %v5829_v21 = vadd.f32 %v1702_v20, %v1044_v19  ;;  %v4909_v23 = vpop.f32.mrb[3].mxu1 }
 0x5e4   : > { %v1707_v24 = vsel %vm745_vm0, %v5829_v21, 0.0 }
 0x5e5   : > { %1708 = vadd.xlane.f32.xlu1 %v1707_v24 }
 0x672   : > { %v1709_v25 = vpop.xlane.xlu1 %1708 }
 0x673   : > { %v1710_v26 = vmul.f32 0.03125, %v1709_v25 }
 0x675   : > { %v1711_v27 = vsub.f32 %v5829_v21, %v1710_v26 }
 0x677   : > { %v1712_v28 = vmul.f32 %v1711_v27, %v1711_v27 }
 0x679   : > { %v1713_v29 = vsel %vm745_vm0, %v1712_v28, 0.0 }
 0x67a   : > { %1714 = vadd.xlane.f32.xlu0 %v1713_v29 }
 0x690   : > { %1992 = vrot.lane.b32.xlu0 %v5811_v11, %s6434_s29 }
 0x707   : > { %v1715_v35 = vpop.xlane.xlu0 %1714 }
 0x708   : > { %v1716_v36 = vmul.f32 0.032258064, %v1715_v35 }
 0x70a   : > { %5289 = vrsqrt.f32 %v1716_v36  ;;  %vm1719_vm5 = vcmp.eq.f32.partialorder %v1716_v36, inf  ;;  %v1722_v43 = vand.u32 2147483648, %v1716_v36  ;;  %vm1721_vm6 = vcmp.eq.f32.partialorder %v1716_v36, 0.0 }
 0x70b   : > { %v1993_v57 = vpop.permute.xlu0 %1992 }
 0x714   : > { %v5290_v41 = vpop.eup %5289 }
 0x715   : > { %v1718_v42 = vmul.f32 %v5290_v41, %v1716_v36 }
 0x717   : > { %v1720_v44 = vsel %vm1719_vm5, %v1716_v36, %v1718_v42 }
 0x718   : > { %v1723_v45 = vsel %vm1721_vm6, %v1722_v43, %v1720_v44 }
 0x719   : > { %v1724_v46 = vadd.f32 1e-06, %v1723_v45 }
 0x71b   : > { %5291 = vrcp.f32 %v1724_v46 }
 0x725   : > { %v5292_v50 = vpop.eup %5291 }
 0x726   : > { %v1726_v51 = vmul.f32 %v5292_v50, %v1711_v27 }
 0x728   : > { %v1731_v55 = vmul.f32 %v1730_v48, %v1726_v51 }
 0x72a   : > { %v1736_v56 = vadd.f32 %v1735_v54, %v1731_v55 }
 0x72c   : > { %4919 = vmatmul.mubr.msk.f32.vlgmr.msra.gmra.mrb[12].mxu0 %vm745_vm0, %v1736_v56 }
 0x72d   : > { %4932 = vmatpush3.xpose.msk.msra.mxu0 %vm1048_vm4, %v1993_v57  ;;  %4933 = vmatprep.mubr.msk.f32.mxu0 %vm5426_vm1, %v5427_v14 }
 0x72e   : > { %4941 = vmatprep.subr.mxu0 %v5427_v14 }
 0x7ff   : > { %v1817_v60 = vpop.f32.mrb[12].mxu0 }
 0x800   : > { %v1818_v62 = vadd.f32 %v4662_v22, %v1817_v60  ;;  %v4920_v63 = vpop.f32.mrb[13].mxu0 }
 0x802   : > { %2157 = vrot.lane.b32.xlu0 %v1818_v62, %s6435_s1  ;;  %1990 = vrot.lane.b32.xlu1 %v1818_v62, %s6434_s29 }
 0x803   : > { %4924 = vmatmul.mubr.msk.f32.vlgmr.msra.gmra.mrb[4].mxu1 %vm1048_vm4, %v1818_v62 }
 0x804   : > { %4927 = vmatpush3.msra.mxu1 %v5864_v52  ;;  %4928 = vmatprep.mubr.msk.f32.mxu1 %vm5426_vm1, %v5427_v14 }
 0x805   : > { %4936 = vmatprep.subr.mxu1 %v5427_v14 }
 0x806   : > { %2323 = vrot.lane.b32.xlu0 %v1818_v62, %s6436_s24  ;;  %2159 = vrot.lane.b32.xlu1 %v5811_v11, %s6435_s1 }
 0x80a   : > { %2325 = vrot.lane.b32.xlu1 %v5811_v11, %s6436_s24 }
 0x874   : > { %v1991_v1 = vpop.permute.xlu1 %1990  ;;  %v2158_v2 = vpop.permute.xlu0 %2157 }
 0x875   : > { %4934 = vmatmul.mubr.msk.f32.vlgmr.msra.gmra.mrb[14].mxu0 %vm1048_vm4, %v1991_v1 }
 0x876   : > { %4943 = vmatprep.mubr.msk.f32.mxu0 %vm5426_vm1, %v5427_v14 }
 0x878   : > { %v2160_v49 = vpop.permute.xlu1 %2159  ;;  %v2324_v3 = vpop.permute.xlu0 %2323 }
 0x879   : > { %4942 = vmatpush3.xpose.msk.msra.mxu0 %vm1048_vm4, %v2160_v49 }
 0x87a   : > { %4951 = vmatprep.subr.mxu0 %v5427_v14 }
 0x87c   : > { %v2326_v53 = vpop.permute.xlu1 %2325  ;;  %4944 = vmatmul.mubr.msk.f32.vlgmr.msra.gmra.mrb[16].mxu0 %vm1048_vm4, %v2158_v2 }
 0x87d   : > { %4952 = vmatpush3.xpose.msk.msra.mxu0 %vm1048_vm4, %v2326_v53  ;;  %4953 = vmatprep.mubr.msk.f32.mxu0 %vm5426_vm1, %v5427_v14 }
 0x87e   : > { %5140 = vmatprep.subr.bf16.mxu0 %v5425_v13 }
 0x880   : > { %4954 = vmatmul.mubr.msk.f32.vlgmr.msra.gmra.mrb[18].mxu0 %vm1048_vm4, %v2324_v3  ;;  %v4664_v3 = vld [vmem:[%s6364_s15] ss:$0 sm:$0xff] }
 0x881   : > { %4969 = vmatprep.mubr.msk.f32.mxu0 %vm5426_vm1, %v5427_v14 }
 0x8d6   : > { %v1901_v5 = vpop.f32.mrb[4].mxu1 }
 0x8d7   : > { %v1902_v6 = vadd.f32 %v1901_v5, %v5895_v4  ;;  %v4925_v7 = vpop.f32.mrb[5].mxu1  ;;  %v1828_v5 = vadd.f32 %v5829_v21, %v4664_v3  ;;  %v2519_v21 = vld [vmem:[%s6365_s16] sm:$0xff] }
 0x8d9   : > { %v1905_v8 = vsel %vm1048_vm4, %v1902_v6, -inf }
 0x8da   : > { %1906 = vmax.xlane.f32.xlu1 %v1905_v8 }
 0x948   : > { %v2064_v9 = vpop.f32.mrb[14].mxu0 }
 0x949   : > { %v2065_v10 = vadd.f32 %v2064_v9, %v5895_v4  ;;  %v4935_v12 = vpop.f32.mrb[15].mxu0 }
 0x94b   : > { %v2068_v15 = vsel %vm1048_vm4, %v2065_v10, -inf }
 0x94c   : > { %2069 = vmax.xlane.f32.xlu0 %v2068_v15 }
 0x94f   : > { %v2231_v16 = vpop.f32.mrb[16].mxu0 }
 0x950   : > { %v2232_v17 = vadd.f32 %v2231_v16, %v5895_v4  ;;  %v4945_v18 = vpop.f32.mrb[17].mxu0 }
 0x951   : > { %v2520_v18 = vld [vmem:[%s6365_s16 + $0x8] sm:$0xff] }
 0x952   : > { %v2235_v19 = vsel %vm1048_vm4, %v2232_v17, -inf }
 0x953   : > { %2236 = vmax.xlane.f32.xlu0 %v2235_v19  ;;  %v2397_v20 = vpop.f32.mrb[18].mxu0  ;;  %v2521_v19 = vld [vmem:[%s6365_s16 + $0x10] sm:$0xff] }
 0x954   : > { %v2398_v23 = vadd.f32 %v2397_v20, %v5895_v4  ;;  %v4955_v24 = vpop.f32.mrb[19].mxu0  ;;  %v5141_v20 = vpack.c.bf16 %v2520_v18, %v2519_v21 }
 0x956   : > { %v2401_v25 = vsel %vm1048_vm4, %v2398_v23, -inf  ;;  %5142 = vmatpush3.bf16.msra.mxu0 %v5141_v20  ;;  %v4689_v20 = vld [vmem:[%s6425_s22 + $0x70] sm:$0xff] }
 0x957   : > { %2402 = vmax.xlane.f32.xlu1 %v2401_v25  ;;  %5143 = vmatprep.subr.bf16.mxu0 %v5425_v13  ;;  %v2604_v25 = vld [vmem:[%s6367_s18] sm:$0xff] }
 0x967   : > { %v1907_v26 = vpop.xlane.xlu1 %1906 }
 0x968   : > { %v1908_v27 = vsub.f32 %v1902_v6, %v1907_v26  ;;  %v2605_v26 = vld [vmem:[%s6367_s18 + $0x8] sm:$0xff] }
 0x96a   : > { %v1909_v28 = vmul.f32 1.442695, %v1908_v27  ;;  %v2606_v27 = vld [vmem:[%s6367_s18 + $0x10] sm:$0xff] }
 0x96c   : > { %5293 = vpow2.f32 %v1909_v28  ;;  %v5147_v28 = vpack.c.bf16 %v2605_v26, %v2604_v25 }
 0x976   : > { %v5294_v29 = vpop.eup %5293 }
 0x977   : > { %v1911_v0 = vsel %vm1048_vm4, %v5294_v29, 0.0 }
 0x978   : > { %1912 = vadd.xlane.f32.xlu0 %v1911_v0 }
 0x9d9   : > { %v2070_v30 = vpop.xlane.xlu0 %2069 }
 0x9da   : > { %v2071_v31 = vsub.f32 %v2065_v10, %v2070_v30  ;;  %v2608_v30 = vld [vmem:[%s6367_s18 + $0x20] sm:$0xff] }
 0x9dc   : > { %v2072_v32 = vmul.f32 1.442695, %v2071_v31  ;;  %v2609_v31 = vld [vmem:[%s6367_s18 + $0x28] sm:$0xff] }
 0x9de   : > { %5295 = vpow2.f32 %v2072_v32  ;;  %v5153_v32 = vpack.c.bf16 %v2609_v31, %v2608_v30  ;;  %v6034_v31 = vld [vmem:[%s6427_s27 + $0x4] sm:$0x7] }
 0x9e0   : > { %v2237_v33 = vpop.xlane.xlu0 %2236 }
 0x9e1   : > { %v2238_v34 = vsub.f32 %v2232_v17, %v2237_v33 }
 0x9e3   : > { %v2239_v35 = vmul.f32 1.442695, %v2238_v34 }
 0x9e4   : > { %v2403_v45 = vpop.xlane.xlu1 %2402 }
 0x9e5   : > { %5297 = vpow2.f32 %v2239_v35  ;;  %v2404_v46 = vsub.f32 %v2398_v23, %v2403_v45  ;;  %v2522_v23 = vld [vmem:[%s6365_s16 + $0x18] sm:$0xff]  ;;  %v5975_v45 = vsub.s32 2, %v5666_v37 }
 0x9e6   : > { %v5144_v24 = vpack.c.bf16 %v2522_v23, %v2521_v19  ;;  %v2611_v37 = vld [vmem:[%s6367_s18 + $0x38] sm:$0xff]  ;;  %v4687_v19 = vld [vmem:[%s6425_s22 + $0x60] sm:$0xff] }
 0x9e7   : > { %v2405_v48 = vmul.f32 1.442695, %v2404_v46  ;;  %v2512_v46 = vrot.slane %v5674_v39, %v5975_v45  ;;  %v5164_v23 = vpack.c.bf16 %v4689_v20, %v4687_v19 }
 0x9e8   : > { %v5296_v36 = vpop.eup %5295  ;;  %5145 = vmatpush3.bf16.msra.mxu0 %v5144_v24 }
 0x9e9   : > { %v2074_v41 = vsel %vm1048_vm4, %v5296_v36, 0.0 }
 0x9ea   : > { %2075 = vadd.xlane.f32.xlu1 %v2074_v41 }
 0x9ef   : > { %v5298_v42 = vpop.eup %5297 }
 0x9f0   : > { %v2241_v43 = vsel %vm1048_vm4, %v5298_v42, 0.0 }
 0x9f1   : > { %2242 = vadd.xlane.f32.xlu0 %v2241_v43 }
 0x9fb   : > { %2246 = vrot.lane.b32.xlu1 %v5864_v52, %s6398_s25 }
 0xa05   : > { %v1913_v44 = vpop.xlane.xlu0 %1912 }
 0xa06   : > { %5299 = vrcp.f32 %v1913_v44 }
 0xa07   : > { %2080 = vrot.lane.b32.xlu0 %v5864_v52, %s6431_s0  ;;  %5301 = vpow2.f32 %v2405_v48 }
 0xa10   : > { %v5300_v50 = vpop.eup %5299 }
 0xa11   : > { %v1915_v51 = vmul.f32 %v5300_v50, %v5294_v29  ;;  %v5302_v54 = vpop.eup %5301  ;;  %v2607_v29 = vld [vmem:[%s6367_s18 + $0x18] sm:$0xff] }
 0xa12   : > { %v2407_v55 = vsel %vm1048_vm4, %v5302_v54, 0.0  ;;  %v5150_v0 = vpack.c.bf16 %v2607_v29, %v2606_v27 }
 0xa13   : > { %4929 = vmatmul.mubr.msk.f32.vlgmr.msra.gmra.mrb[6].mxu1 %vm1048_vm4, %v1915_v51  ;;  %v2517_v51 = vrot.slane %v5679_v40, %v5975_v45  ;;  %v4677_v40 = vld [vmem:[%s6366_s17] ss:$0 sm:$0xff] }
 0xa14   : > { %4938 = vmatprep.mubr.msk.f32.mxu1 %vm5426_vm1, %v5427_v14 }
 0xa1f   : > { %2408 = vadd.xlane.f32.xlu1 %v2407_v55 }
 0xa30   : > { %2412 = vrot.lane.b32.xlu1 %v5864_v52, %s6438_s2 }
 0xa77   : > { %v2076_v56 = vpop.xlane.xlu1 %2075 }
 0xa78   : > { %5303 = vrcp.f32 %v2076_v56  ;;  %v2610_v56 = vld [vmem:[%s6367_s18 + $0x30] sm:$0xff] }
 0xa79   : > { %v5156_v39 = vpack.c.bf16 %v2611_v37, %v2610_v56 }
 0xa7b   : > { %v2247_v62 = vpop.permute.xlu1 %2246 }
 0xa7e   : > { %v2243_v57 = vpop.xlane.xlu0 %2242 }
 0xa7f   : > { %5305 = vrcp.f32 %v2243_v57 }
 0xa82   : > { %v5304_v22 = vpop.eup %5303  ;;  %v2081_v59 = vpop.permute.xlu0 %2080 }
 0xa83   : > { %v2078_v60 = vmul.f32 %v5304_v22, %v5296_v36  ;;  %4937 = vmatpush3.msra.mxu1 %v2081_v59 }
 0xa84   : > { %4946 = vmatprep.subr.mxu1 %v5427_v14 }
 0xa85   : > { %4939 = vmatmul.mubr.msk.f32.vlgmr.msra.gmra.mrb[6].mxu1 %vm1048_vm4, %v2078_v60 }
 0xa86   : > { %4947 = vmatpush3.msra.mxu1 %v2247_v62  ;;  %4948 = vmatprep.mubr.msk.f32.mxu1 %vm5426_vm1, %v5427_v14 }
 0xa87   : > { %4956 = vmatprep.subr.mxu1 %v5427_v14 }
 0xa89   : > { %v5306_v63 = vpop.eup %5305 }
 0xa8a   : > { %v2245_v52 = vmul.f32 %v5306_v63, %v5298_v42  ;;  %v4680_v63 = vld [vmem:[%s6368_s19] ss:$0 sm:$0xff] }
 0xa8d   : > { %4949 = vmatmul.mubr.msk.f32.vlgmr.msra.gmra.mrb[6].mxu1 %vm1048_vm4, %v2245_v52 }
 0xa8e   : > { %4958 = vmatprep.mubr.msk.f32.mxu1 %vm5426_vm1, %v5427_v14 }
 0xaac   : > { %v2409_v1 = vpop.xlane.xlu1 %2408 }
 0xaad   : > { %5307 = vrcp.f32 %v2409_v1 }
 0xab0   : > { %v2413_v49 = vpop.permute.xlu1 %2412 }
 0xab1   : > { %4957 = vmatpush3.msra.mxu1 %v2413_v49 }
 0xab2   : > { %5146 = vmatprep.subr.bf16.mxu1 %v5425_v13 }
 0xab7   : > { %v5308_v2 = vpop.eup %5307 }
 0xab8   : > { %v2411_v53 = vmul.f32 %v5308_v2, %v5302_v54 }
 0xaba   : > { %4959 = vmatmul.mubr.msk.f32.vlgmr.msra.gmra.mrb[6].mxu1 %vm1048_vm4, %v2411_v53 }
 0xabb   : > { %4988 = vmatprep.mubr.msk.f32.mxu1 %vm5426_vm1, %v5427_v14  ;;  %5148 = vmatpush3.bf16.msra.mxu1 %v5147_v28 }
 0xabc   : > { %5149 = vmatprep.subr.bf16.mxu1 %v5425_v13 }
 0xabf   : > { %5151 = vmatpush3.bf16.msra.mxu1 %v5150_v0 }
 0xac0   : > { %5152 = vmatprep.subr.bf16.mxu1 %v5425_v13 }
 0xac3   : > { %5154 = vmatpush3.bf16.msra.mxu1 %v5153_v32  ;;  %v6039_v32 = vld [vmem:[%s6428_s5 + $0x4] sm:$0x7] }
 0xac4   : > { %5155 = vmatprep.subr.bf16.mxu1 %v5425_v13 }
 0xac7   : > { %5157 = vmatpush3.bf16.msra.mxu1 %v5156_v39 }
 0xac8   : > { %4996 = vmatprep.subr.mxu1 %v5427_v14 }
 0xb8d   : > { %v2484_v6 = vpop.f32.mrb[6].mxu1 }
 0xb8e   : > { %v5934_v7 = vadd.f32 %v2484_v6, %v1828_v5  ;;  %v4960_v8 = vpop.f32.mrb[7].mxu1 }
 0xb90   : > { %v2489_v9 = vsel %vm745_vm0, %v5934_v7, 0.0 }
 0xb91   : > { %2490 = vadd.xlane.f32.xlu0 %v2489_v9  ;;  %v4684_v9 = vld [vmem:[%s6425_s22 + $0x48] sm:$0xff] }
 0xc1e   : > { %v2491_v10 = vpop.xlane.xlu0 %2490 }
 0xc1f   : > { %v2492_v12 = vmul.f32 0.03125, %v2491_v10  ;;  %v4683_v10 = vld [vmem:[%s6425_s22 + $0x40] sm:$0xff] }
 0xc21   : > { %v2493_v15 = vsub.f32 %v5934_v7, %v2492_v12 }
 0xc23   : > { %v2494_v16 = vmul.f32 %v2493_v15, %v2493_v15 }
 0xc25   : > { %v2495_v17 = vsel %vm745_vm0, %v2494_v16, 0.0  ;;  %v4688_v16 = vld [vmem:[%s6425_s22 + $0x68] sm:$0xff] }
 0xc26   : > { %2496 = vadd.xlane.f32.xlu1 %v2495_v17  ;;  %v4690_v17 = vld [vmem:[%s6425_s22 + $0x78] sm:$0xff] }
 0xc27   : > { %v5162_v18 = vpack.c.bf16 %v4690_v17, %v4688_v16 }
 0xcb3   : > { %v2497_v33 = vpop.xlane.xlu1 %2496 }
 0xcb4   : > { %v2498_v34 = vmul.f32 0.032258064, %v2497_v33  ;;  %v2722_v33 = vrot.slane %v6034_v31, %v5669_v38 }
 0xcb6   : > { %5309 = vrsqrt.f32 %v2498_v34  ;;  %vm2501_vm7 = vcmp.eq.f32.partialorder %v2498_v34, inf  ;;  %v2504_v41 = vand.u32 2147483648, %v2498_v34  ;;  %vm2503_vm8 = vcmp.eq.f32.partialorder %v2498_v34, 0.0 }
 0xcc0   : > { %v5310_v35 = vpop.eup %5309 }
 0xcc1   : > { %v2500_v36 = vmul.f32 %v5310_v35, %v2498_v34 }
 0xcc3   : > { %v2502_v42 = vsel %vm2501_vm7, %v2498_v34, %v2500_v36  ;;  %v2727_v36 = vrot.slane %v6039_v32, %v5669_v38 }
 0xcc4   : > { %v2505_v43 = vsel %vm2503_vm8, %v2504_v41, %v2502_v42 }
 0xcc5   : > { %v2506_v44 = vadd.f32 1e-06, %v2505_v43  ;;  %v6051_v43 = vld [vmem:[%s6356_s7 + $0x2] sm:$0x3] }
 0xcc7   : > { %5311 = vrcp.f32 %v2506_v44  ;;  %v2744_v44 = vrot.slane %v6051_v43, %v5669_v38 }
 0xcd1   : > { %v5312_v48 = vpop.eup %5311 }
 0xcd2   : > { %v2508_v50 = vmul.f32 %v5312_v48, %v2493_v15  ;;  %v4685_v15 = vld [vmem:[%s6425_s22 + $0x50] sm:$0xff] }
 0xcd3   : > { %v5160_v21 = vpack.c.bf16 %v4685_v15, %v4683_v10 }
 0xcd4   : > { %v2513_v54 = vmul.f32 %v2512_v46, %v2508_v50 }
 0xcd6   : > { %v2518_v55 = vadd.f32 %v2517_v51, %v2513_v54 }
 0xcd8   : > { %4970 = vmatmul.mubr.msk.f32.vlgmr.msra.gmra.mrb[20].mxu0 %vm745_vm0, %v2518_v55 }
 0xcd9   : > { %2818 = vmatprep.mubr.f32.mxu0 %v5427_v14 }
 0xdab   : > { %v2599_v57 = vpop.f32.mrb[20].mxu0 }
 0xdac   : > { %v2600_v22 = vadd.f32 %v4677_v40, %v2599_v57  ;;  %v4971_v59 = vpop.f32.mrb[21].mxu0 }
 0xdae   : > { %v2603_v60 = vmax.f32 %v2600_v22, 0.0 }
 0xdb0   : > { %4989 = vmatmul.mubr.msk.f32.vlgmr.msra.gmra.mrb[8].mxu1 %vm2612_vm9, %v2603_v60 }
 0xdb1   : > { %4998 = vmatprep.mubr.msk.f32.mxu1 %vm5426_vm1, %v5427_v14 }
 0xe83   : > { %v2682_v62 = vpop.f32.mrb[8].mxu1 }
 0xe84   : > { %v2686_v52 = vadd.f32 %v5934_v7, %v2682_v62  ;;  %v4990_v1 = vpop.f32.mrb[9].mxu1  ;;  %v4686_v7 = vld [vmem:[%s6425_s22 + $0x58] sm:$0xff] }
 0xe85   : > { %v5158_v12 = vpack.c.bf16 %v4686_v7, %v4684_v9 }
 0xe86   : > { %v6000_v49 = vadd.f32 %v4680_v63, %v2686_v52 }
 0xe87   : > { %5159 = vmatprep.subr.bf16.mxu0 %v5158_v12 }
 0xe88   : > { %v2699_v2 = vsel %vm745_vm0, %v6000_v49, 0.0  ;;  %5161 = vmatpush1.bf16.msra.mxu0 %v5160_v21 }
 0xe89   : > { %2700 = vadd.xlane.f32.xlu0 %v2699_v2  ;;  %5163 = vmatprep.subr.bf16.mxu0 %v5162_v18 }
 0xe8c   : > { %5165 = vmatpush1.bf16.msra.mxu0 %v5164_v23 }
 0xe8d   : > { %4991 = vmatprep.subr.mxu0 %v5427_v14 }
 0xf16   : > { %v2701_v53 = vpop.xlane.xlu0 %2700 }
 0xf17   : > { %v2702_v3 = vmul.f32 0.03125, %v2701_v53 }
 0xf19   : > { %v2703_v5 = vsub.f32 %v6000_v49, %v2702_v3 }
 0xf1b   : > { %v2704_v6 = vmul.f32 %v2703_v5, %v2703_v5 }
 0xf1d   : > { %v2705_v8 = vsel %vm745_vm0, %v2704_v6, 0.0 }
 0xf1e   : > { %2706 = vadd.xlane.f32.xlu0 %v2705_v8 }
 0xfab   : > { %v2707_v24 = vpop.xlane.xlu0 %2706 }
 0xfac   : > { %v2708_v25 = vmul.f32 0.032258064, %v2707_v24 }
 0xfae   : > { %5313 = vrsqrt.f32 %v2708_v25  ;;  %vm2711_vm10 = vcmp.eq.f32.partialorder %v2708_v25, inf  ;;  %v2714_v28 = vand.u32 2147483648, %v2708_v25  ;;  %vm2713_vm11 = vcmp.eq.f32.partialorder %v2708_v25, 0.0 }
 0xfb8   : > { %v5314_v26 = vpop.eup %5313 }
 0xfb9   : > { %v2710_v27 = vmul.f32 %v5314_v26, %v2708_v25 }
 0xfbb   : > { %v2712_v29 = vsel %vm2711_vm10, %v2708_v25, %v2710_v27 }
 0xfbc   : > { %v2715_v0 = vsel %vm2713_vm11, %v2714_v28, %v2712_v29 }
 0xfbd   : > { %v2716_v30 = vadd.f32 1e-06, %v2715_v0 }
 0xfbf   : > { %5315 = vrcp.f32 %v2716_v30 }
 0xfc9   : > { %v5316_v34 = vpop.eup %5315 }
 0xfca   : > { %v2718_v35 = vmul.f32 %v5316_v34, %v2703_v5 }
 0xfcc   : > { %v2723_v41 = vmul.f32 %v2722_v33, %v2718_v35  ;;  %v2748_v33 = vrot.slane %v6051_v43, %v5788_v58 }
 0xfce   : > { %v2728_v42 = vadd.f32 %v2727_v36, %v2723_v41 }
 0xfd0   : > { %4692 = vmatmul.mubr.msk.f32.vlgmr.msra.gmra.mrb[22].mxu0 %vm745_vm0, %v2728_v42 }
 0xfd1   : > { %4993 = vmatprep.mubr.msk.f32.mxu0 %vm5426_vm1, %v5427_v14 }
0x10a3   : > { %v2820_v46 = vpop.f32.mrb[22].mxu0 }
0x10a4   : > { %v6055_v48 = vadd.f32 %v2820_v46, %v2744_v44  ;;  %v6057_v50 = vpop.f32.mrb[23].mxu0 }
0x10a5   : > { %v2823_v34 = vadd.f32 %v6057_v50, %v2748_v33 }
0x10a6   : > { %3001 = vrot.lane.b32.xlu0 %v6055_v48, %s6439_s21  ;;  %2835 = vrot.lane.b32.xlu1 %v6055_v48, %s6431_s0 }
0x10aa   : > { %3165 = vrot.lane.b32.xlu0 %v6055_v48, %s6435_s1  ;;  %2999 = vrot.lane.b32.xlu1 %v6055_v48, %s6434_s29 }
0x10ae   : > { %3328 = vrot.lane.b32.xlu0 %v6055_v48, %s6436_s24  ;;  %3167 = vrot.lane.b32.xlu1 %v6055_v48, %s6440_s13 }
0x10b2   : > { %3330 = vrot.lane.b32.xlu1 %v6055_v48, %s6441_s3 }
0x1118   : > { %v2836_v38 = vpop.permute.xlu1 %2835  ;;  %v3002_v51 = vpop.permute.xlu0 %3001 }
0x1119   : > { %4992 = vmatpush3.xpose.msk.msra.mxu0 %vm1048_vm4, %v2836_v38 }
0x111a   : > { %5001 = vmatprep.subr.mxu0 %v5427_v14 }
0x111c   : > { %4994 = vmatmul.mubr.msk.f32.vlgmr.msra.gmra.mrb[24].mxu0 %vm1048_vm4, %v6055_v48  ;;  %v3000_v54 = vpop.permute.xlu1 %2999  ;;  %v3166_v56 = vpop.permute.xlu0 %3165 }
0x111d   : > { %5002 = vmatpush3.xpose.msk.msra.mxu0 %vm1048_vm4, %v3002_v51  ;;  %5003 = vmatprep.mubr.msk.f32.mxu0 %vm5426_vm1, %v5427_v14 }
0x111e   : > { %5011 = vmatprep.subr.mxu0 %v5427_v14 }
0x1120   : > { %5004 = vmatmul.mubr.msk.f32.vlgmr.msra.gmra.mrb[26].mxu0 %vm1048_vm4, %v3000_v54  ;;  %v3168_v55 = vpop.permute.xlu1 %3167  ;;  %v3329_v39 = vpop.permute.xlu0 %3328 }
0x1121   : > { %5012 = vmatpush3.xpose.msk.msra.mxu0 %vm1048_vm4, %v3168_v55  ;;  %5013 = vmatprep.mubr.msk.f32.mxu0 %vm5426_vm1, %v5427_v14 }
0x1122   : > { %5021 = vmatprep.subr.mxu0 %v5427_v14 }
0x1124   : > { %5014 = vmatmul.mubr.msk.f32.vlgmr.msra.gmra.mrb[28].mxu0 %vm1048_vm4, %v3166_v56  ;;  %v3331_v37 = vpop.permute.xlu1 %3330 }
0x1125   : > { %5022 = vmatpush3.xpose.msk.msra.mxu0 %vm1048_vm4, %v3331_v37  ;;  %5023 = vmatprep.mubr.msk.f32.mxu0 %vm5426_vm1, %v5427_v14 }
0x1126   : > { %5166 = vmatprep.subr.bf16.mxu0 %v5425_v13 }
0x1128   : > { %5024 = vmatmul.mubr.msk.f32.vlgmr.msra.gmra.mrb[30].mxu0 %vm1048_vm4, %v3329_v39  ;;  %v4694_v39 = vld [vmem:[%s6357_s8 + $0x1] ss:$0 sm:$0xff] }
0x1129   : > { %5039 = vmatprep.mubr.msk.f32.mxu0 %vm5426_vm1, %v5427_v14 }
0x11ef   : > { %v2907_v40 = vpop.f32.mrb[24].mxu0 }
0x11f0   : > { %v2908_v57 = vadd.f32 %v2907_v40, %v5740_v61  ;;  %v4995_v22 = vpop.f32.mrb[25].mxu0  ;;  %v2833_v40 = vadd.f32 %v4694_v39, %v6000_v49 }
0x11f2   : > { %v2911_v59 = vsel %vm1048_vm4, %v2908_v57, -inf }
0x11f3   : > { %2912 = vmax.xlane.f32.xlu1 %v2911_v59  ;;  %v3073_v60 = vpop.f32.mrb[26].mxu0 }
0x11f4   : > { %v3074_v62 = vadd.f32 %v3073_v60, %v5740_v61  ;;  %v5005_v63 = vpop.f32.mrb[27].mxu0 }
0x11f6   : > { %v3077_v52 = vsel %vm1048_vm4, %v3074_v62, -inf }
0x11f7   : > { %3078 = vmax.xlane.f32.xlu0 %v3077_v52  ;;  %v3239_v1 = vpop.f32.mrb[28].mxu0 }
0x11f8   : > { %v3240_v2 = vadd.f32 %v3239_v1, %v5740_v61  ;;  %v5015_v53 = vpop.f32.mrb[29].mxu0 }
0x11f9   : > { %v4707_v53 = vld [vmem:[%s6358_s9 + $0x20] sm:$0xff] }
0x11fa   : > { %v3243_v3 = vsel %vm1048_vm4, %v3240_v2, -inf }
0x11fb   : > { %3244 = vmax.xlane.f32.xlu0 %v3243_v3  ;;  %v3402_v5 = vpop.f32.mrb[30].mxu0  ;;  %v4708_v3 = vld [vmem:[%s6358_s9 + $0x28] sm:$0xff] }
0x11fc   : > { %v3403_v6 = vadd.f32 %v3402_v5, %v5740_v61  ;;  %v5025_v8 = vpop.f32.mrb[31].mxu0  ;;  %v4709_v5 = vld [vmem:[%s6358_s9 + $0x30] sm:$0xff] }
0x11fd   : > { %v4710_v8 = vld [vmem:[%s6358_s9 + $0x38] sm:$0xff] }
0x11fe   : > { %v3406_v9 = vsel %vm1048_vm4, %v3403_v6, -inf }
0x11ff   : > { %3407 = vmax.xlane.f32.xlu1 %v3406_v9  ;;  %v5170_v9 = vpack.c.bf16 %v4710_v8, %v4709_v5 }
0x1280   : > { %v2913_v7 = vpop.xlane.xlu1 %2912 }
0x1281   : > { %v2914_v10 = vsub.f32 %v2908_v57, %v2913_v7 }
0x1283   : > { %v2915_v12 = vmul.f32 1.442695, %v2914_v10 }
0x1284   : > { %v3079_v15 = vpop.xlane.xlu0 %3078 }
0x1285   : > { %5317 = vpow2.f32 %v2915_v12  ;;  %v3080_v16 = vsub.f32 %v3074_v62, %v3079_v15 }
0x1287   : > { %v3081_v17 = vmul.f32 1.442695, %v3080_v16 }
0x1288   : > { %v3245_v21 = vpop.xlane.xlu0 %3244 }
0x1289   : > { %5319 = vpow2.f32 %v3081_v17  ;;  %v3246_v18 = vsub.f32 %v3240_v2, %v3245_v21 }
0x128b   : > { %v3247_v19 = vmul.f32 1.442695, %v3246_v18  ;;  %v3518_v18 = vrot.slane %v6034_v31, %v5788_v58 }
0x128c   : > { %v3408_v27 = vpop.xlane.xlu1 %3407 }
0x128d   : > { %5321 = vpow2.f32 %v3247_v19  ;;  %v3409_v28 = vsub.f32 %v3403_v6, %v3408_v27  ;;  %v5167_v6 = vpack.c.bf16 %v4708_v3, %v4707_v53 }
0x128f   : > { %v5318_v20 = vpop.eup %5317  ;;  %v3410_v29 = vmul.f32 1.442695, %v3409_v28  ;;  %5168 = vmatpush3.bf16.msra.mxu0 %v5167_v6 }
0x1290   : > { %v2917_v23 = vsel %vm1048_vm4, %v5318_v20, 0.0  ;;  %5169 = vmatprep.subr.bf16.mxu0 %v5425_v13 }
0x1291   : > { %2918 = vadd.xlane.f32.xlu0 %v2917_v23  ;;  %5323 = vpow2.f32 %v3410_v29  ;;  %v3523_v23 = vrot.slane %v6039_v32, %v5788_v58 }
0x1293   : > { %v5320_v61 = vpop.eup %5319  ;;  %5171 = vmatpush3.bf16.msra.mxu0 %v5170_v9 }
0x1294   : > { %v3083_v24 = vsel %vm1048_vm4, %v5320_v61, 0.0  ;;  %5052 = vmatprep.subr.mxu0 %v5427_v14 }
0x1295   : > { %3084 = vadd.xlane.f32.xlu1 %v3083_v24 }
0x1297   : > { %v5322_v25 = vpop.eup %5321 }
0x1298   : > { %v3249_v26 = vsel %vm1048_vm4, %v5322_v25, 0.0 }
0x1299   : > { %3250 = vadd.xlane.f32.xlu0 %v3249_v26  ;;  %v4712_v26 = vld [vmem:[%s6359_s10 + $0x1] ss:$0 sm:$0xff] }
0x129b   : > { %v5324_v0 = vpop.eup %5323 }
0x129c   : > { %v3412_v30 = vsel %vm1048_vm4, %v5324_v0, 0.0 }
0x12a6   : > { %3088 = vrot.lane.b32.xlu1 %v6055_v48, %s6438_s2 }
0x12af   : > { %2922 = vrot.lane.b32.xlu0 %v6055_v48, %s6442_s11 }
0x12ca   : > { %3413 = vadd.xlane.f32.xlu1 %v3412_v30 }
0x12db   : > { %3418 = vrot.lane.b32.xlu1 %v2823_v34, %s6431_s0 }
0x131e   : > { %v2919_v35 = vpop.xlane.xlu0 %2918 }
0x131f   : > { %5325 = vrcp.f32 %v2919_v35 }
0x1322   : > { %v3085_v36 = vpop.xlane.xlu1 %3084 }
0x1323   : > { %5327 = vrcp.f32 %v3085_v36 }
0x1326   : > { %v3251_v41 = vpop.xlane.xlu0 %3250  ;;  %v3089_v48 = vpop.permute.xlu1 %3088 }
0x1327   : > { %5329 = vrcp.f32 %v3251_v41 }
0x1329   : > { %v5326_v42 = vpop.eup %5325 }
0x132a   : > { %v2921_v44 = vmul.f32 %v5326_v42, %v5318_v20  ;;  %v2923_v46 = vpop.permute.xlu0 %2922 }
0x132b   : > { %4997 = vmatpush3.msra.mxu1 %v2923_v46 }
0x132c   : > { %4999 = vmatmul.mubr.msk.f32.vlgmr.msra.gmra.mrb[10].mxu1 %vm1048_vm4, %v2921_v44  ;;  %5006 = vmatprep.subr.mxu1 %v5427_v14 }
0x132d   : > { %5007 = vmatpush3.msra.mxu1 %v3089_v48  ;;  %5008 = vmatprep.mubr.msk.f32.mxu1 %vm5426_vm1, %v5427_v14  ;;  %v5328_v43 = vpop.eup %5327 }
0x132e   : > { %5016 = vmatprep.subr.mxu1 %v5427_v14  ;;  %v3087_v50 = vmul.f32 %v5328_v43, %v5320_v61 }
0x1331   : > { %v5330_v38 = vpop.eup %5329 }
0x1332   : > { %v3253_v51 = vmul.f32 %v5330_v38, %v5322_v25 }
0x1334   : > { %5009 = vmatmul.mubr.msk.f32.vlgmr.msra.gmra.mrb[10].mxu1 %vm1048_vm4, %v3087_v50 }
0x1335   : > { %5017 = vmatpush3.msra.mxu1 %v2823_v34  ;;  %5018 = vmatprep.mubr.msk.f32.mxu1 %vm5426_vm1, %v5427_v14 }
0x1336   : > { %5026 = vmatprep.subr.mxu1 %v5427_v14 }
0x133c   : > { %5019 = vmatmul.mubr.msk.f32.vlgmr.msra.gmra.mrb[10].mxu1 %vm1048_vm4, %v3253_v51 }
0x133d   : > { %5028 = vmatprep.mubr.msk.f32.mxu1 %vm5426_vm1, %v5427_v14 }
0x1357   : > { %v3414_v54 = vpop.xlane.xlu1 %3413 }
0x1358   : > { %5331 = vrcp.f32 %v3414_v54 }
0x135b   : > { %v3419_v55 = vpop.permute.xlu1 %3418 }
0x135c   : > { %5027 = vmatpush3.msra.mxu1 %v3419_v55 }
0x135d   : > { %5042 = vmatprep.subr.mxu1 %v5427_v14 }
0x1362   : > { %v5332_v56 = vpop.eup %5331 }
0x1363   : > { %v3416_v37 = vmul.f32 %v5332_v56, %v5324_v0 }
0x1365   : > { %5029 = vmatmul.mubr.msk.f32.vlgmr.msra.gmra.mrb[10].mxu1 %vm1048_vm4, %v3416_v37 }
0x1366   : > { %5044 = vmatprep.mubr.msk.f32.mxu1 %vm5426_vm1, %v5427_v14 }
0x1438   : > { %v3490_v57 = vpop.f32.mrb[10].mxu1 }
0x1439   : > { %v6134_v22 = vadd.f32 %v3490_v57, %v2833_v40  ;;  %v5030_v59 = vpop.f32.mrb[11].mxu1 }
0x143b   : > { %v3495_v60 = vsel %vm745_vm0, %v6134_v22, 0.0 }
0x143c   : > { %3496 = vadd.xlane.f32.xlu0 %v3495_v60 }
0x1452   : > { %3620 = vrot.lane.b32.xlu0 %v5811_v11, %s6431_s0 }
0x14c9   : > { %v3497_v62 = vpop.xlane.xlu0 %3496 }
0x14ca   : > { %v3498_v63 = vmul.f32 0.03125, %v3497_v62 }
0x14cc   : > { %v3499_v52 = vsub.f32 %v6134_v22, %v3498_v63 }
0x14cd   : > { %v3621_v1 = vpop.permute.xlu0 %3620 }
0x14ce   : > { %5043 = vmatpush3.xpose.msk.msra.mxu1 %vm1048_vm4, %v3621_v1  ;;  %v3500_v2 = vmul.f32 %v3499_v52, %v3499_v52 }
0x14cf   : > { %5047 = vmatprep.subr.mxu1 %v5427_v14 }
0x14d0   : > { %v3501_v49 = vsel %vm745_vm0, %v3500_v2, 0.0 }
0x14d1   : > { %3502 = vadd.xlane.f32.xlu1 %v3501_v49 }
0x14e2   : > { %3784 = vrot.lane.b32.xlu1 %v5811_v11, %s6439_s21  ;;  %s6446_s21 = smov %s6445_s30 }
0x14e6   : > { %3951 = vrot.lane.b32.xlu1 %v5811_v11, %s6440_s13  ;;  %s711_s13 = sand.u32 1, %s5415_s28  }
0x14ea   : > { %4117 = vrot.lane.b32.xlu1 %v5811_v11, %s6441_s3  ;;  %s4640_s3 = sshll.u32 %s711_s13, 3 }
0x14eb   : > { %s713_s12 = scalar_lea.vmem [#allocation2], %s4640_s3  ;;  %s5365_s3 = sshll.u32 %s5437_s4, 4  ;;  %s5366_s3 = int_to_ptr.vmem [resolvable:$false] %s5365_s3 }
0x14ec   : > { %s4541_s25 = sshll.u32 %s713_s12, 4  ;;  %s6308_s25 = int_to_ptr.vmem [resolvable:$true] %s4541_s25 }
0x14ed   : > { %p5368_p0 = scmp.lt.s32.totalorder %s6308_s25, %s5366_s3 }
0x155e   : > { %v3503_v11 = vpop.xlane.xlu1 %3502 }
0x155f   : > { %v3504_v7 = vmul.f32 0.032258064, %v3503_v11 }
0x1561   : > { %5333 = vrsqrt.f32 %v3504_v7  ;;  %vm3507_vm12 = vcmp.eq.f32.partialorder %v3504_v7, inf  ;;  %v3510_v15 = vand.u32 2147483648, %v3504_v7  ;;  %vm3509_vm13 = vcmp.eq.f32.partialorder %v3504_v7, 0.0 }
0x1562   : > { %v3785_v25 = vpop.permute.xlu1 %3784 }
0x1566   : > { %v3952_v58 = vpop.permute.xlu1 %3951 }
0x156a   : > { %v4118_v33 = vpop.permute.xlu1 %4117 }
0x156b   : > { %v5334_v10 = vpop.eup %5333 }
0x156c   : > { %v3506_v12 = vmul.f32 %v5334_v10, %v3504_v7 }
0x156e   : > { %v3508_v16 = vsel %vm3507_vm12, %v3504_v7, %v3506_v12 }
0x156f   : > { %v3511_v17 = vsel %vm3509_vm13, %v3510_v15, %v3508_v16 }
0x1570   : > { %v3512_v21 = vadd.f32 1e-06, %v3511_v17 }
0x1572   : > { %5335 = vrcp.f32 %v3512_v21 }
0x157c   : > { %v5336_v19 = vpop.eup %5335 }
0x157d   : > { %v3514_v20 = vmul.f32 %v5336_v19, %v3499_v52 }
0x157f   : > { %v3519_v61 = vmul.f32 %v3518_v18, %v3514_v20 }
0x1581   : > { %v3524_v24 = vadd.f32 %v3523_v23, %v3519_v61 }
0x1583   : > { %5040 = vmatmul.mubr.msk.f32.vlgmr.msra.gmra.mrb[32].mxu0 %vm745_vm0, %v3524_v24 }
0x1584   : > { %5053 = vmatpush3.xpose.msk.msra.mxu0 %vm1048_vm4, %v3785_v25  ;;  %5054 = vmatprep.mubr.msk.f32.mxu0 %vm5426_vm1, %v5427_v14 }
0x1585   : > { %5062 = vmatprep.subr.mxu0 %v5427_v14 }
0x1656   : > { %v3607_v27 = vpop.f32.mrb[32].mxu0 }
0x1657   : > { %v3608_v28 = vadd.f32 %v4712_v26, %v3607_v27  ;;  %v5041_v29 = vpop.f32.mrb[33].mxu0 }
0x1659   : > { %3782 = vrot.lane.b32.xlu0 %v3608_v28, %s6434_s29  ;;  %5045 = vmatmul.mubr.msk.f32.vlgmr.msra.gmra.mrb[12].mxu1 %vm1048_vm4, %v3608_v28  ;;  %s5361_s29 = scalar_lea.vmem %s6308_s25, 128 }
0x165a   : > { %5048 = vmatpush3.msra.mxu1 %v5823_v47  ;;  %5049 = vmatprep.mubr.msk.f32.mxu1 %vm5426_vm1, %v5427_v14  ;;  %p5362_p11 = scmp.ne.s32.totalorder %s6308_s25, %s5361_s29 }
0x165b   : > { %5057 = vmatprep.subr.mxu1 %v5427_v14 }
0x165c   : > { %p5363_p12 = pnand %p5362_p11, %p5591_p5 }
0x165d   : > { %3949 = vrot.lane.b32.xlu0 %v3608_v28, %s6435_s1  ;;  %s6443_s1 = sld [smem:[#allocation22_spill]] }
0x165e   : > { %p5364_p13 = pneg %p5363_p12 }
0x1661   : > { %4115 = vrot.lane.b32.xlu0 %v3608_v28, %s6436_s24  ;;  %v4715_v28 = vld [vmem:[%s6364_s15 + $0x1] ss:$0 sm:$0xff] }
0x1662   : > { %v3619_v29 = vadd.f32 %v6134_v22, %v4715_v28  ;;  %v4728_v22 = vld [vmem:[%s6365_s16 + $0x20] sm:$0xff] }
0x16cb   : > { %v3783_v0 = vpop.permute.xlu0 %3782 }
0x16cc   : > { %5055 = vmatmul.mubr.msk.f32.vlgmr.msra.gmra.mrb[34].mxu0 %vm1048_vm4, %v3783_v0 }
0x16cd   : > { %5063 = vmatpush3.xpose.msk.msra.mxu0 %vm1048_vm4, %v3952_v58  ;;  %5064 = vmatprep.mubr.msk.f32.mxu0 %vm5426_vm1, %v5427_v14 }
0x16ce   : > { %5072 = vmatprep.subr.mxu0 %v5427_v14 }
0x16cf   : > { %v3950_v30 = vpop.permute.xlu0 %3949 }
0x16d0   : > { %5065 = vmatmul.mubr.msk.f32.vlgmr.msra.gmra.mrb[36].mxu0 %vm1048_vm4, %v3950_v30 }
0x16d1   : > { %5073 = vmatpush3.xpose.msk.msra.mxu0 %vm1048_vm4, %v4118_v33  ;;  %5074 = vmatprep.mubr.msk.f32.mxu0 %vm5426_vm1, %v5427_v14 }
0x16d2   : > { %5172 = vmatprep.subr.bf16.mxu0 %v5425_v13 }
0x16d3   : > { %v4116_v34 = vpop.permute.xlu0 %4115 }
0x16d4   : > { %5075 = vmatmul.mubr.msk.f32.vlgmr.msra.gmra.mrb[38].mxu0 %vm1048_vm4, %v4116_v34 }
0x16d5   : > { %5090 = vmatprep.mubr.msk.f32.mxu0 %vm5426_vm1, %v5427_v14 }
0x172c   : > { %v3693_v35 = vpop.f32.mrb[12].mxu1 }
0x172d   : > { %v3694_v36 = vadd.f32 %v3693_v35, %v5895_v4  ;;  %v5046_v41 = vpop.f32.mrb[13].mxu1 }
0x172f   : > { %v3697_v42 = vsel %vm1048_vm4, %v3694_v36, -inf }
0x1730   : > { %3698 = vmax.xlane.f32.xlu1 %v3697_v42  ;;  %v4729_v42 = vld [vmem:[%s6365_s16 + $0x28] sm:$0xff] }
0x179f   : > { %v3856_v44 = vpop.f32.mrb[34].mxu0 }
0x17a0   : > { %v3857_v46 = vadd.f32 %v3856_v44, %v5895_v4  ;;  %v5056_v48 = vpop.f32.mrb[35].mxu0  ;;  %v4730_v44 = vld [vmem:[%s6365_s16 + $0x30] sm:$0xff] }
0x17a1   : > { %v4731_v48 = vld [vmem:[%s6365_s16 + $0x38] sm:$0xff] }
0x17a2   : > { %v3860_v43 = vsel %vm1048_vm4, %v3857_v46, -inf }
0x17a3   : > { %3861 = vmax.xlane.f32.xlu0 %v3860_v43  ;;  %v4023_v50 = vpop.f32.mrb[36].mxu0  ;;  %v5176_v43 = vpack.c.bf16 %v4731_v48, %v4730_v44 }
0x17a4   : > { %v4024_v38 = vadd.f32 %v4023_v50, %v5895_v4  ;;  %v5066_v51 = vpop.f32.mrb[37].mxu0  ;;  %v4735_v50 = vld [vmem:[%s6367_s18 + $0x40] sm:$0xff] }
0x17a5   : > { %v4737_v51 = vld [vmem:[%s6367_s18 + $0x50] sm:$0xff] }
0x17a6   : > { %v4027_v54 = vsel %vm1048_vm4, %v4024_v38, -inf }
0x17a7   : > { %4028 = vmax.xlane.f32.xlu0 %v4027_v54  ;;  %v4189_v55 = vpop.f32.mrb[38].mxu0 }
0x17a8   : > { %v4190_v56 = vadd.f32 %v4189_v55, %v5895_v4  ;;  %v5076_v37 = vpop.f32.mrb[39].mxu0  ;;  %v4738_v55 = vld [vmem:[%s6367_s18 + $0x58] sm:$0xff] }
0x17a9   : > { %v4739_v37 = vld [vmem:[%s6367_s18 + $0x60] sm:$0xff] }
0x17aa   : > { %v4193_v39 = vsel %vm1048_vm4, %v4190_v56, -inf }
0x17ab   : > { %4194 = vmax.xlane.f32.xlu1 %v4193_v39  ;;  %v4740_v39 = vld [vmem:[%s6367_s18 + $0x68] sm:$0xff] }
0x17bd   : > { %v3699_v40 = vpop.xlane.xlu1 %3698 }
0x17be   : > { %v3700_v57 = vsub.f32 %v3694_v36, %v3699_v40  ;;  %v5185_v40 = vpack.c.bf16 %v4740_v39, %v4739_v37 }
0x17c0   : > { %v3701_v59 = vmul.f32 1.442695, %v3700_v57 }
0x17c2   : > { %5337 = vpow2.f32 %v3701_v59 }
0x17cc   : > { %v5338_v60 = vpop.eup %5337 }
0x17cd   : > { %v3703_v62 = vsel %vm1048_vm4, %v5338_v60, 0.0 }
0x17ce   : > { %3704 = vadd.xlane.f32.xlu0 %v3703_v62 }
0x1830   : > { %v3862_v63 = vpop.xlane.xlu0 %3861 }
0x1831   : > { %v3863_v52 = vsub.f32 %v3857_v46, %v3862_v63  ;;  %v5173_v46 = vpack.c.bf16 %v4729_v42, %v4728_v22 }
0x1833   : > { %v3864_v1 = vmul.f32 1.442695, %v3863_v52  ;;  %5174 = vmatpush3.bf16.msra.mxu0 %v5173_v46 }
0x1834   : > { %v4029_v2 = vpop.xlane.xlu0 %4028  ;;  %5175 = vmatprep.subr.bf16.mxu0 %v5425_v13 }
0x1835   : > { %5339 = vpow2.f32 %v3864_v1  ;;  %v4030_v49 = vsub.f32 %v4024_v38, %v4029_v2  ;;  %v4736_v38 = vld [vmem:[%s6367_s18 + $0x48] sm:$0xff] }
0x1836   : > { %v5179_v54 = vpack.c.bf16 %v4736_v38, %v4735_v50 }
0x1837   : > { %v4031_v53 = vmul.f32 1.442695, %v4030_v49  ;;  %5177 = vmatpush3.bf16.msra.mxu0 %v5176_v43  ;;  %v4304_v49 = vrot.slane %v6034_v31, %v5975_v45  ;;  %v4733_v31 = vld [vmem:[%s6366_s17 + $0x1] ss:$0 sm:$0xff] }
0x1838   : > { %v4195_v9 = vpop.xlane.xlu1 %4194 }
0x1839   : > { %5341 = vpow2.f32 %v4031_v53  ;;  %v4196_v11 = vsub.f32 %v4190_v56, %v4195_v9  ;;  %v5182_v56 = vpack.c.bf16 %v4738_v55, %v4737_v51 }
0x183b   : > { %v4197_v7 = vmul.f32 1.442695, %v4196_v11 }
0x183f   : > { %v5340_v4 = vpop.eup %5339 }
0x1840   : > { %v3866_v3 = vsel %vm1048_vm4, %v5340_v4, 0.0 }
0x1841   : > { %3867 = vadd.xlane.f32.xlu1 %v3866_v3 }
0x1843   : > { %v5342_v5 = vpop.eup %5341 }
0x1844   : > { %v4033_v6 = vsel %vm1048_vm4, %v5342_v5, 0.0 }
0x1845   : > { %4034 = vadd.xlane.f32.xlu0 %v4033_v6  ;;  %v4741_v6 = vld [vmem:[%s6367_s18 + $0x70] sm:$0xff] }
0x1852   : > { %4038 = vrot.lane.b32.xlu1 %v5823_v47, %s6442_s11  ;;  %s6444_s11 = sld [smem:[#allocation23_spill]] }
0x185b   : > { %3872 = vrot.lane.b32.xlu0 %v5823_v47, %s6431_s0  ;;  %v3705_v8 = vpop.xlane.xlu0 %3704  ;;  %s4528_s0 = scalar_lea.sflag [#allocation3], %s711_s13 }
0x185c   : > { %5343 = vrcp.f32 %v3705_v8  ;;  %v4742_v8 = vld [vmem:[%s6367_s18 + $0x78] sm:$0xff] }
0x185d   : > { %5345 = vpow2.f32 %v4197_v7  ;;  %v5188_v9 = vpack.c.bf16 %v4742_v8, %v4741_v6 }
0x1866   : > { %v5344_v10 = vpop.eup %5343 }
0x1867   : > { %v3707_v12 = vmul.f32 %v5344_v10, %v5338_v60  ;;  %v5346_v15 = vpop.eup %5345 }
0x1868   : > { %v4199_v16 = vsel %vm1048_vm4, %v5346_v15, 0.0 }
0x1869   : > { %5050 = vmatmul.mubr.msk.f32.vlgmr.msra.gmra.mrb[14].mxu1 %vm1048_vm4, %v3707_v12  ;;  %v4745_v12 = vld [vmem:[%s6368_s19 + $0x1] ss:$0 sm:$0xff] }
0x186a   : > { %5059 = vmatprep.mubr.msk.f32.mxu1 %vm5426_vm1, %v5427_v14 }
0x1876   : > { %4200 = vadd.xlane.f32.xlu1 %v4199_v16 }
0x1887   : > { %4204 = vrot.lane.b32.xlu1 %v5823_v47, %s6438_s2 }
0x18ce   : > { %v3868_v17 = vpop.xlane.xlu1 %3867 }
0x18cf   : > { %5347 = vrcp.f32 %v3868_v17 }
0x18d2   : > { %v4035_v21 = vpop.xlane.xlu0 %4034  ;;  %v4039_v23 = vpop.permute.xlu1 %4038 }
0x18d3   : > { %5349 = vrcp.f32 %v4035_v21 }
0x18d6   : > { %v3873_v18 = vpop.permute.xlu0 %3872 }
0x18d7   : > { %5058 = vmatpush3.msra.mxu1 %v3873_v18 }
0x18d8   : > { %5067 = vmatprep.subr.mxu1 %v5427_v14 }
0x18d9   : > { %v5348_v19 = vpop.eup %5347 }
0x18da   : > { %v3870_v20 = vmul.f32 %v5348_v19, %v5340_v4 }
0x18dc   : > { %5060 = vmatmul.mubr.msk.f32.vlgmr.msra.gmra.mrb[14].mxu1 %vm1048_vm4, %v3870_v20 }
0x18dd   : > { %5068 = vmatpush3.msra.mxu1 %v4039_v23  ;;  %5069 = vmatprep.mubr.msk.f32.mxu1 %vm5426_vm1, %v5427_v14  ;;  %v5350_v47 = vpop.eup %5349 }
0x18de   : > { %5077 = vmatprep.subr.mxu1 %v5427_v14  ;;  %v4037_v61 = vmul.f32 %v5350_v47, %v5342_v5 }
0x18e4   : > { %5070 = vmatmul.mubr.msk.f32.vlgmr.msra.gmra.mrb[14].mxu1 %vm1048_vm4, %v4037_v61 }
0x18e5   : > { %5079 = vmatprep.mubr.msk.f32.mxu1 %vm5426_vm1, %v5427_v14 }
0x1903   : > { %v4201_v24 = vpop.xlane.xlu1 %4200 }
0x1904   : > { %5351 = vrcp.f32 %v4201_v24 }
0x1907   : > { %v4205_v25 = vpop.permute.xlu1 %4204 }
0x1908   : > { %5078 = vmatpush3.msra.mxu1 %v4205_v25 }
0x1909   : > { %5178 = vmatprep.subr.bf16.mxu1 %v5425_v13 }
0x190e   : > { %v5352_v26 = vpop.eup %5351 }
0x190f   : > { %v4203_v27 = vmul.f32 %v5352_v26, %v5346_v15 }
0x1911   : > { %5080 = vmatmul.mubr.msk.f32.vlgmr.msra.gmra.mrb[14].mxu1 %vm1048_vm4, %v4203_v27 }
0x1912   : > { %5109 = vmatprep.mubr.msk.f32.mxu1 %vm5426_vm1, %v5427_v14  ;;  %5180 = vmatpush3.bf16.msra.mxu1 %v5179_v54 }
0x1913   : > { %5181 = vmatprep.subr.bf16.mxu1 %v5425_v13 }
0x1916   : > { %5183 = vmatpush3.bf16.msra.mxu1 %v5182_v56 }
0x1917   : > { %5184 = vmatprep.subr.bf16.mxu1 %v5425_v13 }
0x191a   : > { %5186 = vmatpush3.bf16.msra.mxu1 %v5185_v40 }
0x191b   : > { %5187 = vmatprep.subr.bf16.mxu1 %v5425_v13  ;;  %v4309_v13 = vrot.slane %v6039_v32, %v5975_v45 }
0x191e   : > { %5189 = vmatpush3.bf16.msra.mxu1 %v5188_v9 }
0x19e4   : > { %v4276_v58 = vpop.f32.mrb[14].mxu1 }
0x19e5   : > { %v6234_v0 = vadd.f32 %v4276_v58, %v3619_v29  ;;  %v5081_v30 = vpop.f32.mrb[15].mxu1 }
0x19e6   : > { %v4746_v30 = vld [vmem:[%s6443_s1] ss:$0 sm:$0xff]  ;;  %s5367_s1 = scalar_lea.vmem %s5366_s3, 256 }
0x19e7   : > { %v4281_v33 = vsel %vm745_vm0, %v6234_v0, 0.0  ;;  %p5369_p1 = scmp.lt.s32.totalorder %s5367_s1, %s5361_s29 }
0x19e8   : > { %4282 = vadd.xlane.f32.xlu0 %v4281_v33 }
0x19e9   : > { %p5370_p2 = por %p5369_p1, %p5368_p0 }
0x19eb   : > { %p5371_p3 = pnand %p5370_p2, %p5364_p13 }
0x1a75   : > { %v4283_v34 = vpop.xlane.xlu0 %4282 }
0x1a76   : > { %v4284_v35 = vmul.f32 0.03125, %v4283_v34  ;;  %v4747_v34 = vld [vmem:[%s6444_s11] ss:$0 sm:$0xff] }
0x1a78   : > { %v4285_v36 = vsub.f32 %v6234_v0, %v4284_v35 }
0x1a7a   : > { %v4286_v41 = vmul.f32 %v4285_v36, %v4285_v36 }
0x1a7c   : > { %v4287_v14 = vsel %vm745_vm0, %v4286_v41, 0.0 }
0x1a7d   : > { %4288 = vadd.xlane.f32.xlu1 %v4287_v14 }
0x1b0a   : > { %v4289_v57 = vpop.xlane.xlu1 %4288 }
0x1b0b   : > { %v4290_v59 = vmul.f32 0.032258064, %v4289_v57 }
0x1b0d   : > { %5353 = vrsqrt.f32 %v4290_v59  ;;  %vm4293_vm14 = vcmp.eq.f32.partialorder %v4290_v59, inf  ;;  %v4296_v63 = vand.u32 2147483648, %v4290_v59  ;;  %vm4295_vm15 = vcmp.eq.f32.partialorder %v4290_v59, 0.0 }
0x1b17   : > { %v5354_v60 = vpop.eup %5353 }
0x1b18   : > { %v4292_v62 = vmul.f32 %v5354_v60, %v4290_v59 }
0x1b1a   : > { %v4294_v52 = vsel %vm4293_vm14, %v4290_v59, %v4292_v62 }
0x1b1b   : > { %v4297_v1 = vsel %vm4295_vm15, %v4296_v63, %v4294_v52 }
0x1b1c   : > { %v4298_v2 = vadd.f32 1e-06, %v4297_v1 }
0x1b1e   : > { %5355 = vrcp.f32 %v4298_v2 }
0x1b28   : > { %v5356_v53 = vpop.eup %5355 }
0x1b29   : > { %v4300_v4 = vmul.f32 %v5356_v53, %v4285_v36 }
0x1b2b   : > { %v4305_v3 = vmul.f32 %v4304_v49, %v4300_v4 }
0x1b2d   : > { %v4310_v5 = vadd.f32 %v4309_v13, %v4305_v3 }
0x1b2f   : > { %5091 = vmatmul.mubr.msk.f32.vlgmr.msra.gmra.mrb[40].mxu0 %vm745_vm0, %v4310_v5 }
0x1c02   : > { %v4393_v11 = vpop.f32.mrb[40].mxu0 }
0x1c03   : > { %v4394_v45 = vadd.f32 %v4733_v31, %v4393_v11  ;;  %v5092_v32 = vpop.f32.mrb[41].mxu0 }
0x1c05   : > { %v4397_v7 = vmax.f32 %v4394_v45, 0.0 }
0x1c07   : > { %5110 = vmatmul.mubr.msk.f32.vlgmr.msra.gmra.mrb[16].mxu1 %vm2612_vm9, %v4397_v7 }
0x1cda   : > { %v4476_v10 = vpop.f32.mrb[16].mxu1 }
0x1cdb   : > { %v4480_v15 = vadd.f32 %v6234_v0, %v4476_v10  ;;  %v5111_v16 = vpop.f32.mrb[17].mxu1 }
0x1cdd   : > { %v4489_v17 = vadd.f32 %v4745_v12, %v4480_v15 }
0x1cdf   : > { %v4492_v21 = vsel %vm745_vm0, %v4489_v17, 0.0 }
0x1ce0   : > { %4493 = vadd.xlane.f32.xlu0 %v4492_v21 }
0x1d6d   : > { %v4494_v18 = vpop.xlane.xlu0 %4493 }
0x1d6e   : > { %v4495_v19 = vmul.f32 0.03125, %v4494_v18 }
0x1d70   : > { %v4496_v20 = vsub.f32 %v4489_v17, %v4495_v19 }
0x1d72   : > { %v4497_v23 = vmul.f32 %v4496_v20, %v4496_v20 }
0x1d74   : > { %v4498_v47 = vsel %vm745_vm0, %v4497_v23, 0.0 }
0x1d75   : > { %4499 = vadd.xlane.f32.xlu0 %v4498_v47 }
0x1e02   : > { %v4500_v61 = vpop.xlane.xlu0 %4499 }
0x1e03   : > { %v4501_v24 = vmul.f32 0.032258064, %v4500_v61 }
0x1e05   : > { %5357 = vrsqrt.f32 %v4501_v24  ;;  %vm4504_vm1 = vcmp.eq.f32.partialorder %v4501_v24, inf  ;;  %v4507_v27 = vand.u32 2147483648, %v4501_v24  ;;  %vm4506_vm2 = vcmp.eq.f32.partialorder %v4501_v24, 0.0 }
0x1e0f   : > { %v5358_v25 = vpop.eup %5357 }
0x1e10   : > { %v4503_v26 = vmul.f32 %v5358_v25, %v4501_v24 }
0x1e12   : > { %v4505_v28 = vsel %vm4504_vm1, %v4501_v24, %v4503_v26 }
0x1e13   : > { %v4508_v29 = vsel %vm4506_vm2, %v4507_v27, %v4505_v28 }
0x1e14   : > { %v4509_v58 = vadd.f32 1e-06, %v4508_v29 }
0x1e16   : > { %5359 = vrcp.f32 %v4509_v58 }
0x1e20   : > { %v5360_v0 = vpop.eup %5359 }
0x1e21   : > { %v4511_v33 = vmul.f32 %v5360_v0, %v4496_v20 }
0x1e23   : > { %v4518_v35 = vmul.f32 %v4746_v30, %v4511_v33 }
0x1e25   : > { %v4525_v36 = vadd.f32 %v4747_v34, %v4518_v35 }
0x1e27   : > { %4526 = vst.msk [vmem:[%s713_s12] sm:$0xff] %vm745_vm0, %v4525_v36 }
0x1e28   : > { %5374 = shalt.err (!%p5371_p3)
}
0x1e29   : > { %s5375_s13 = scalar_lea.hbm %s6306_s14, 128  ;;  %s5379_s11 = scalar_lea.hbm %s6446_s21, 256 }
0x1e2a   : > { %p5376_p4 = scmp.ne.s32.totalorder %s6306_s14, %s5375_s13  ;;  %p5380_p9 = scmp.lt.u32.totalorder %s6306_s14, %s6446_s21 }
0x1e2b   : > { %p5381_p10 = scmp.lt.u32.totalorder %s5379_s11, %s5375_s13  ;;  %p5383_p12 = scmp.lt.u32.totalorder %s5375_s13, %s6306_s14 }
0x1e2c   : > { %p5377_p7 = pnand %p5376_p4, %p5591_p5 }
0x1e2d   : > { %p5382_p11 = por %p5381_p10, %p5380_p9 }
0x1e2e   : > { %p5378_p8 = pneg %p5377_p7 }
0x1e2f   : > { %p5384_p13 = por %p5383_p12, %p5382_p11 }
0x1e31   : > { %p5385_p0 = pnand %p5384_p13, %p5378_p8 }
0x1e33   : > { %5388 = shalt.err (!%p5385_p0)
}
0x1e34   : > { %5218 = dma.vmem_to_hbm [thread:$0]  (%p5591_p5), %s6308_s25, 128, %s6306_s14, %s4528_s0  }
0x1e35 PF: > { %s6447_s26 = sld [smem:[#allocation7_spill]]  ;;  %s6448_s23 = sld [smem:[#allocation5_spill]] }
0x1e3b   : > { %p5224_p1 = scmp.ge.s32.totalorder %s6447_s26, 2  ;;  %s4553_s29 = sand.u32 1, %s6448_s23  }
0x1e3c   : > { %s4554_s4 = scalar_lea.sflag [#allocation3], %s4553_s29 }
0x1e3d   : > { %p5221_p2 = pnand %p5224_p1, %p5595_p6 }
0x1e3f   : > { %5406 = dma.done.wait (!%p5221_p2), %s4554_s4, 128  }
0x1e40   : > { %5408 = vsyncadd (!%p5221_p2), %s4554_s4, 4294967168  ;;  %s6450_s30 = sld [smem:[#allocation8_spill]]  ;;  %s6451_s1 = sld [smem:[#allocation6_spill]] }
0x1e41   : > { %s6452_s29 = sld [smem:[#allocation9_spill]]  ;;  %s6453_s3 = smov %s5415_s28 }
0x1e46   : > { %p32_p3 = scmp.ge.s32.totalorder %s6450_s30, 4   ;;  %s6454_s28 = smov %s6451_s1 }
0x1e48   :  { %34 = sbr.rel (!%p32_p3) target bundleno = 18 (0x12), region = 164 }
0x1e4f   :  { %4559 = vsyncpa [#allocation3], 1 }
0x1e50   :  { %4561 = vsyncpa [#allocation3 + $0x1], 1 }

</bundles_post_ra>
